<compile_context>
chip_gen: v6e
topology: v6e:2x2x1
jax: 0.10.0
libtpu: 0.0.40
codegen_flags: <defaults>
</compile_context>

<pallas_src>
import math

import numpy as np
import jax
import jax.numpy as jnp
from jax.experimental import pallas as pl
from jax.experimental.pallas import tpu as pltpu

# ----------------------- small, module-consistent config -----------------------
NUM_PATCHES = 16            # 4x4 grid -> valid 2-D sincos pos-embed
IN_CHANNEL  = 4             # metadata only (unused by forward)
PATCH_SIZE  = 4             # metadata only (unused by forward)
EMBED_DIM   = 32
DEPTH       = 2
NUM_HEADS   = 4
MLP_RATIO   = 4.0
NR_CLASSES  = 10
BATCH       = 2

SEQ      = NUM_PATCHES + 1
HEAD_DIM = EMBED_DIM // NUM_HEADS
HIDDEN   = int(EMBED_DIM * MLP_RATIO)     # 128
LN_EPS   = 1e-6
OUT_PAD  = 128                            # lane-dense padded class-head width
OUT_ROWS = max(8, -(-BATCH // 8) * 8)     # sublane-padded rows for the cls-only output
NEG_INF  = -1e30

# rows of the packed narrow (width-D) per-layer vector table
R_LN1_W, R_LN1_B, R_BPROJ, R_LN2_W, R_LN2_B, R_FC2_B = range(6)
# rows of the packed wide (width-128) per-layer vector table
R_BQKV, R_FC1_B = range(2)


# ----------------------------- shared math helpers ------------------------------
def _layernorm(x, w, b):
    mu = jnp.mean(x, axis=-1, keepdims=True)
    xc = x - mu
    var = jnp.mean(xc * xc, axis=-1, keepdims=True)
    return xc * jax.lax.rsqrt(var + LN_EPS) * w + b


def _gelu(x):
    # TODO(synk): PyTorch nn.GELU is erf-exact; using the tanh approximation since erf
    #             lowering is not guaranteed in Mosaic. Reference uses the same approx.
    c = 0.7978845608028654  # sqrt(2/pi)
    return 0.5 * x * (1.0 + jnp.tanh(c * (x + 0.044715 * x * x * x)))


# --------------------------------- the kernel -----------------------------------
def vit_decoder_kernel(x_ref, bias_pos_ref, attn_bias_ref, patch_w_ref,
                       w_qkv_ref, w_proj_ref, w_fc1_ref, w_fc2_ref,
                       vecs_d_ref, vecs_w_ref, pred_w_ref, pred_b_ref, out_ref):
    f32, bf16 = jnp.float32, jnp.bfloat16
    D, HD = EMBED_DIM, HEAD_DIM
    BS = BATCH * SEQ

    def mxu(a_f32, b_bf16):
        # bf16 operands on the MXU, f32 accumulate.
        return jnp.dot(a_f32.astype(bf16), b_bf16, preferred_element_type=f32)

    # ---- patch_embed + cls prepend + pos embed ----
    # cls rows of x are zero; (cls + pos) / (patch_b + pos) are folded into bias_pos.
    h = mxu(x_ref[...], patch_w_ref[...]) + bias_pos_ref[...]          # (BS, D) f32

    attn_bias = attn_bias_ref[...]          # (BS, BS) block-diagonal 0 / -1e30

    # Static per-head lane masks (bf16 0/1), built once and reused by every layer.
    lane_d = jax.lax.broadcasted_iota(jnp.int32, (1, D), 1)
    lane_w = jax.lax.broadcasted_iota(jnp.int32, (1, 128), 1)
    q_masks = [jnp.where(jnp.logical_and(lane_d >= hh * HD, lane_d < (hh + 1) * HD),
                         1.0, 0.0).astype(bf16) for hh in range(NUM_HEADS)]
    v_masks = [jnp.where(jnp.logical_and(lane_w >= 2 * D + hh * HD,
                                         lane_w < 2 * D + (hh + 1) * HD),
                         1.0, 0.0).astype(bf16) for hh in range(NUM_HEADS)]

    # ---- transformer blocks (statically unrolled) ----
    for l in range(DEPTH):
        # hoist this layer's small vectors once (no repeated ref slices / broadcasts)
        ln1_w = vecs_d_ref[l, R_LN1_W:R_LN1_W + 1, :]
        ln1_b = vecs_d_ref[l, R_LN1_B:R_LN1_B + 1, :]
        b_proj = vecs_d_ref[l, R_BPROJ:R_BPROJ + 1, :]
        ln2_w = vecs_d_ref[l, R_LN2_W:R_LN2_W + 1, :]
        ln2_b = vecs_d_ref[l, R_LN2_B:R_LN2_B + 1, :]
        b_fc2 = vecs_d_ref[l, R_FC2_B:R_FC2_B + 1, :]
        b_qkv = vecs_w_ref[l, R_BQKV:R_BQKV + 1, :]
        b_fc1 = vecs_w_ref[l, R_FC1_B:R_FC1_B + 1, :]

        # --- multi-head self-attention ---
        xn = _layernorm(h, ln1_w, ln1_b)
        # fused QKV: lanes [0:D)=q (attention scale pre-folded), [D:2D)=k, [2D:3D)=v
        qkv = mxu(xn, w_qkv_ref[l]) + b_qkv                         # (BS, 128) f32
        qkv_bf = qkv.astype(bf16)
        q = qkv_bf[:, 0:D]                                          # (BS, D) bf16
        # one K transpose per layer (hoisted out of the per-head loop)
        kT = jnp.transpose(qkv[:, D:2 * D]).astype(bf16)            # (D, BS) bf16

        attn_acc = jnp.zeros((BS, 128), f32)
        for hh in range(NUM_HEADS):
            # masked Q against the shared kT: full-D contraction == per-head contraction
            s = jax.lax.dot_general(q * q_masks[hh], kT, (((1,), (0,)), ((), ())),
                                    preferred_element_type=f32)
            s = s + attn_bias
            s = s - jnp.max(s, axis=-1, keepdims=True)
            e = jnp.exp(s)
            p = e * pl.reciprocal(jnp.sum(e, axis=-1, keepdims=True), approx=True)
            # masked V (in place in the fused qkv lanes): head output lands in its own
            # lane block of [2D, 3D); summing heads reproduces the concatenated output.
            attn_acc = attn_acc + jnp.dot(p.astype(bf16), qkv_bf * v_masks[hh],
                                          preferred_element_type=f32)
        # w_proj is sublane-padded to (128, D) reading exactly the [2D, 3D) lane block.
        h = h + mxu(attn_acc, w_proj_ref[l]) + b_proj

        # --- MLP ---
        xn2 = _layernorm(h, ln2_w, ln2_b)
        mid = _gelu(mxu(xn2, w_fc1_ref[l]) + b_fc1)                 # (BS, HIDDEN)
        h = h + mxu(mid, w_fc2_ref[l]) + b_fc2

    # ---- final LayerNorm (affine folded into pred weights) + class head, cls rows only ----
    cls_rows = [h[b * SEQ:b * SEQ + 1, :] for b in range(BATCH)]
    cls_rows.append(jnp.zeros((OUT_ROWS - BATCH, D), f32))
    hc = jnp.concatenate(cls_rows, axis=0)                          # (OUT_ROWS, D)
    mu = jnp.mean(hc, axis=-1, keepdims=True)
    xc = hc - mu
    var = jnp.mean(xc * xc, axis=-1, keepdims=True)
    z = xc * jax.lax.rsqrt(var + LN_EPS)
    out_ref[...] = mxu(z, pred_w_ref[...]) + pred_b_ref[...]        # (OUT_ROWS, 128) store


# ------------------------------ parameter packing --------------------------------
def pack_params(p):
    """Pre-transpose / pre-fuse / pre-fold / pre-cast parameters + per-call constants."""
    D = EMBED_DIM
    bf16 = jnp.bfloat16
    scale = 1.0 / math.sqrt(HEAD_DIM)

    patch_w_t = p['patch_w'].T.astype(bf16)                        # (D, D) in->out, bf16

    # fused QKV weight (in->out), attention scale folded into the Q columns, padded to 128
    qkv_w_t = jnp.transpose(p['qkv_w'], (0, 2, 1))                 # (DEPTH, D, 3D)
    col_scale = jnp.concatenate([jnp.full((D,), scale, jnp.float32),
                                 jnp.ones((2 * D,), jnp.float32)])
    qkv_w_scaled = qkv_w_t * col_scale[None, None, :]
    w_qkv = jnp.pad(qkv_w_scaled, ((0, 0), (0, 0), (0, 128 - 3 * D))).astype(bf16)

    # proj weight (in->out) sublane-padded so it reads the v-lane block [2D, 3D) directly
    proj_t = jnp.transpose(p['proj_w'], (0, 2, 1))                 # (DEPTH, D, D)
    w_proj = jnp.zeros((DEPTH, 128, D), jnp.float32)
    w_proj = w_proj.at[:, 2 * D:3 * D, :].set(proj_t).astype(bf16)

    w_fc1 = jnp.transpose(p['fc1_w'], (0, 2, 1)).astype(bf16)      # (DEPTH, D, HIDDEN)
    w_fc2 = jnp.transpose(p['fc2_w'], (0, 2, 1)).astype(bf16)      # (DEPTH, HIDDEN, D)

    # narrow (width-D) per-layer vectors, f32
    vecs_d = jnp.stack([p['ln1_w'], p['ln1_b'], p['proj_b'],
                        p['ln2_w'], p['ln2_b'], p['fc2_b']], axis=1)   # (DEPTH, 6, D)

    # wide (width-128) per-layer vectors, f32: fused qkv bias (q part scaled) and fc1 bias
    qkv_b_scaled = p['qkv_b'] * col_scale[None, :]
    b_qkv = jnp.pad(qkv_b_scaled, ((0, 0), (0, 128 - 3 * D)))
    vecs_w = jnp.stack([b_qkv, p['fc1_b']], axis=1)                # (DEPTH, 2, 128)

    # fold final LayerNorm affine into the (transposed, lane-padded) prediction head
    pred_w_t = p['pred_w'].T                                       # (D, C)
    w_fold = p['norm_w'][:, None] * pred_w_t
    b_fold = p['norm_b'] @ pred_w_t + p['pred_b']
    pred_w = jnp.pad(w_fold, ((0, 0), (0, OUT_PAD - NR_CLASSES))).astype(bf16)
    pred_b = jnp.pad(b_fold, (0, OUT_PAD - NR_CLASSES))[None, :].astype(jnp.float32)

    # per-row additive bias after patch_embed (cls / patch bias + pos), tiled over batch
    bias_pos_seq = jnp.concatenate(
        [(p['cls'] + p['pos'][0])[None, :],
         p['patch_b'][None, :] + p['pos'][1:]], axis=0)            # (SEQ, D)
    bias_pos = jnp.tile(bias_pos_seq, (BATCH, 1))                  # (B*SEQ, D)

    # block-diagonal additive attention bias (static given BATCH), precomputed here
    bid = np.arange(BATCH * SEQ) // SEQ
    attn_bias = jnp.asarray(np.where(bid[:, None] == bid[None, :], 0.0, NEG_INF),
                            dtype=jnp.float32)                    # (B*SEQ, B*SEQ)

    return dict(patch_w_t=patch_w_t, w_qkv=w_qkv, w_proj=w_proj, w_fc1=w_fc1, w_fc2=w_fc2,
                vecs_d=vecs_d, vecs_w=vecs_w, pred_w=pred_w, pred_b=pred_b,
                bias_pos=bias_pos, attn_bias=attn_bias)


# ----------------------------------- wrapper --------------------------------------
@jax.jit
def vit_decoder_forward(x, packed):
    B, P, D = x.shape
    # Prepend a zero cls row per batch element and flatten (B, SEQ) into rows.
    x_pad = jnp.concatenate([jnp.zeros((B, 1, D), x.dtype), x], axis=1)     # (B, SEQ, D)
    x_flat = x_pad.reshape(B * SEQ, D)

    out = pl.pallas_call(
        vit_decoder_kernel,
        out_shape=jax.ShapeDtypeStruct((OUT_ROWS, OUT_PAD), jnp.float32),
        in_specs=[pl.BlockSpec(memory_space=pltpu.MemorySpace.VMEM)] * 12,
        out_specs=pl.BlockSpec(memory_space=pltpu.MemorySpace.VMEM),
    )(x_flat, packed['bias_pos'], packed['attn_bias'], packed['patch_w_t'],
      packed['w_qkv'], packed['w_proj'], packed['w_fc1'], packed['w_fc2'],
      packed['vecs_d'], packed['vecs_w'], packed['pred_w'], packed['pred_b'])

    # kernel already reduced to cls rows; just drop sublane/lane padding
    return out[:B, :NR_CLASSES]


# ------------------------ deterministic parameter init ----------------------------
def _get_1d_sincos(embed_dim, pos):
    omega = np.arange(embed_dim // 2, dtype=np.float32)
    omega /= embed_dim / 2.0
    omega = 1.0 / 10000 ** omega
    out = np.einsum('m,d->md', pos.reshape(-1), omega)
    return np.concatenate([np.sin(out), np.cos(out)], axis=1)


def get_2d_sincos_pos_embed(embed_dim, grid_size, cls_token=True):
    grid_h = np.arange(grid_size, dtype=np.float32)
    grid_w = np.arange(grid_size, dtype=np.float32)
    grid = np.stack(np.meshgrid(grid_w, grid_h), axis=0)
    grid = grid.reshape([2, 1, grid_size, grid_size])
    emb = np.concatenate([_get_1d_sincos(embed_dim // 2, grid[0]),
                          _get_1d_sincos(embed_dim // 2, grid[1])], axis=1)
    if cls_token:
        emb = np.concatenate([np.zeros([1, embed_dim], dtype=np.float32), emb], axis=0)
    return emb.astype(np.float32)


def xavier_uniform(key, out_f, in_f):
    bound = math.sqrt(6.0 / (in_f + out_f))
    return jax.random.uniform(key, (out_f, in_f), jnp.float32, -bound, bound)


def init_params(key):
    keys = jax.random.split(key, 4 * DEPTH + 2)
    ki = iter(range(len(keys)))
    p = {}
    p['patch_w'] = xavier_uniform(keys[next(ki)], EMBED_DIM, EMBED_DIM)
    p['patch_b'] = jnp.zeros((EMBED_DIM,), jnp.float32)
    p['cls'] = jnp.zeros((EMBED_DIM,), jnp.float32)          # torch.zeros, never re-inited
    p['pos'] = jnp.asarray(get_2d_sincos_pos_embed(EMBED_DIM, int(NUM_PATCHES ** 0.5)))
    p['ln1_w'] = jnp.ones((DEPTH, EMBED_DIM), jnp.float32)
    p['ln1_b'] = jnp.zeros((DEPTH, EMBED_DIM), jnp.float32)
    p['qkv_w'] = jnp.stack([xavier_uniform(keys[next(ki)], 3 * EMBED_DIM, EMBED_DIM)
                            for _ in range(DEPTH)])
    p['qkv_b'] = jnp.zeros((DEPTH, 3 * EMBED_DIM), jnp.float32)
    p['proj_w'] = jnp.stack([xavier_uniform(keys[next(ki)], EMBED_DIM, EMBED_DIM)
                             for _ in range(DEPTH)])
    p['proj_b'] = jnp.zeros((DEPTH, EMBED_DIM), jnp.float32)
    p['ln2_w'] = jnp.ones((DEPTH, EMBED_DIM), jnp.float32)
    p['ln2_b'] = jnp.zeros((DEPTH, EMBED_DIM), jnp.float32)
    p['fc1_w'] = jnp.stack([xavier_uniform(keys[next(ki)], HIDDEN, EMBED_DIM)
                            for _ in range(DEPTH)])
    p['fc1_b'] = jnp.zeros((DEPTH, HIDDEN), jnp.float32)
    p['fc2_w'] = jnp.stack([xavier_uniform(keys[next(ki)], EMBED_DIM, HIDDEN)
                            for _ in range(DEPTH)])
    p['fc2_b'] = jnp.zeros((DEPTH, EMBED_DIM), jnp.float32)
    p['norm_w'] = jnp.ones((EMBED_DIM,), jnp.float32)
    p['norm_b'] = jnp.zeros((EMBED_DIM,), jnp.float32)
    p['pred_w'] = xavier_uniform(keys[next(ki)], NR_CLASSES, EMBED_DIM)
    p['pred_b'] = jnp.zeros((NR_CLASSES,), jnp.float32)
    return p


# ------------------------------ pure-JAX reference --------------------------------
HI = jax.lax.Precision.HIGHEST


def reference_forward(x, p):
    B = x.shape[0]
    h = jnp.einsum('bpd,ed->bpe', x, p['patch_w'], precision=HI) + p['patch_b']
    cls = jnp.broadcast_to(p['cls'][None, None, :], (B, 1, EMBED_DIM))
    h = jnp.concatenate([cls, h], axis=1) + p['pos'][None]
    scale = 1.0 / math.sqrt(HEAD_DIM)
    for l in range(DEPTH):
        xn = _layernorm(h, p['ln1_w'][l], p['ln1_b'][l])
        qkv = jnp.einsum('bsd,ed->bse', xn, p['qkv_w'][l], precision=HI) + p['qkv_b'][l]
        q, k, v = jnp.split(qkv, 3, axis=-1)
        q = q.reshape(B, SEQ, NUM_HEADS, HEAD_DIM).transpose(0, 2, 1, 3)
        k = k.reshape(B, SEQ, NUM_HEADS, HEAD_DIM).transpose(0, 2, 1, 3)
        v = v.reshape(B, SEQ, NUM_HEADS, HEAD_DIM).transpose(0, 2, 1, 3)
        att = jnp.einsum('bhqd,bhkd->bhqk', q, k, precision=HI) * scale
        att = jax.nn.softmax(att, axis=-1)
        o = jnp.einsum('bhqk,bhkd->bhqd', att, v, precision=HI)
        o = o.transpose(0, 2, 1, 3).reshape(B, SEQ, EMBED_DIM)
        o = jnp.einsum('bsd,ed->bse', o, p['proj_w'][l], precision=HI) + p['proj_b'][l]
        h = h + o
        xn2 = _layernorm(h, p['ln2_w'][l], p['ln2_b'][l])
        mid = _gelu(jnp.einsum('bsd,hd->bsh', xn2, p['fc1_w'][l], precision=HI) + p['fc1_b'][l])
        h = h + jnp.einsum('bsh,dh->bsd', mid, p['fc2_w'][l], precision=HI) + p['fc2_b'][l]
    h = _layernorm(h, p['norm_w'], p['norm_b'])
    y = jnp.einsum('bsd,cd->bsc', h, p['pred_w'], precision=HI) + p['pred_b']
    return y[:, 0]


# -------------------------------------- main ---------------------------------------
if __name__ == "__main__":
    root = jax.random.PRNGKey(0)
    kx, kp = jax.random.split(root)
    params = init_params(kp)
    packed = pack_params(params)
    x = jax.random.normal(kx, (BATCH, NUM_PATCHES, EMBED_DIM), jnp.float32)

    out = jax.block_until_ready(vit_decoder_forward(x, packed))
    assert out.shape == (BATCH, NR_CLASSES), out.shape

    # Tolerance is loosened vs. the pure-f32 version because the kernel now feeds the MXU
    # bf16 operands (f32 accumulate) per the performance review; structural bugs would
    # still produce O(1) errors and be caught here.
    ref = reference_forward(x, params)
    np.testing.assert_allclose(np.asarray(out), np.asarray(ref), atol=1e-1, rtol=1e-1)

    print("KERNEL_OK")
</pallas_src>

<mosaic_0001>
module attributes {stable_mosaic.version = 11 : i64} {
  func.func @vit_decoder_kernel(%arg0: memref<34x32xf32, #tpu.memory_space<vmem>>, %arg1: memref<34x32xf32, #tpu.memory_space<vmem>>, %arg2: memref<34x34xf32, #tpu.memory_space<vmem>>, %arg3: memref<32x32xbf16, #tpu.memory_space<vmem>>, %arg4: memref<2x32x128xbf16, #tpu.memory_space<vmem>>, %arg5: memref<2x128x32xbf16, #tpu.memory_space<vmem>>, %arg6: memref<2x32x128xbf16, #tpu.memory_space<vmem>>, %arg7: memref<2x128x32xbf16, #tpu.memory_space<vmem>>, %arg8: memref<2x6x32xf32, #tpu.memory_space<vmem>>, %arg9: memref<2x2x128xf32, #tpu.memory_space<vmem>>, %arg10: memref<32x128xbf16, #tpu.memory_space<vmem>>, %arg11: memref<1x128xf32, #tpu.memory_space<vmem>>, %arg12: memref<8x128xf32, #tpu.memory_space<vmem>>) attributes {dimension_semantics = [], scalar_prefetch = 0 : i64, scratch_operands = 0 : i64, tpu.core_type = #tpu.core_type<tc>} {
    %c0 = arith.constant 0 : index
    %c0_0 = arith.constant 0 : index
    %0 = vector.load %arg0[%c0, %c0_0] : memref<34x32xf32, #tpu.memory_space<vmem>>, vector<34x32xf32>
    %c0_1 = arith.constant 0 : index
    %c0_2 = arith.constant 0 : index
    %1 = vector.load %arg3[%c0_1, %c0_2] : memref<32x32xbf16, #tpu.memory_space<vmem>>, vector<32x32xbf16>
    %2 = arith.truncf %0 : vector<34x32xf32> to vector<34x32xbf16>
    %cst = arith.constant dense<0.000000e+00> : vector<34x32xf32>
    %3 = tpu.matmul %2, %1, %cst {dimension_numbers = #tpu.dot_dimension_numbers<[1], [0], [0], [1], [0, 0, 1, 1], [], []>} : vector<34x32xbf16>, vector<32x32xbf16>, vector<34x32xf32> -> vector<34x32xf32>
    %c0_3 = arith.constant 0 : index
    %c0_4 = arith.constant 0 : index
    %4 = vector.load %arg1[%c0_3, %c0_4] : memref<34x32xf32, #tpu.memory_space<vmem>>, vector<34x32xf32>
    %5 = arith.addf %3, %4 : vector<34x32xf32>
    %c0_5 = arith.constant 0 : index
    %c0_6 = arith.constant 0 : index
    %6 = vector.load %arg2[%c0_5, %c0_6] : memref<34x34xf32, #tpu.memory_space<vmem>>, vector<34x34xf32>
    %7 = tpu.iota {dimensions = array<i32: 1>} : vector<1x32xi32>
    %8 = tpu.iota {dimensions = array<i32: 1>} : vector<1x128xi32>
    %c0_i32 = arith.constant 0 : i32
    %9 = vector.broadcast %c0_i32 : i32 to vector<1x32xi32>
    %10 = arith.cmpi sge, %7, %9 : vector<1x32xi32>
    %c8_i32 = arith.constant 8 : i32
    %11 = vector.broadcast %c8_i32 : i32 to vector<1x32xi32>
    %12 = arith.cmpi slt, %7, %11 : vector<1x32xi32>
    %13 = arith.andi %10, %12 : vector<1x32xi1>
    %cst_7 = arith.constant 1.000000e+00 : f32
    %cst_8 = arith.constant 0.000000e+00 : f32
    %14 = vector.broadcast %cst_7 : f32 to vector<1x32xf32>
    %15 = vector.broadcast %cst_8 : f32 to vector<1x32xf32>
    %16 = arith.select %13, %14, %15 : vector<1x32xi1>, vector<1x32xf32>
    %17 = arith.truncf %16 : vector<1x32xf32> to vector<1x32xbf16>
    %c8_i32_9 = arith.constant 8 : i32
    %18 = vector.broadcast %c8_i32_9 : i32 to vector<1x32xi32>
    %19 = arith.cmpi sge, %7, %18 : vector<1x32xi32>
    %c16_i32 = arith.constant 16 : i32
    %20 = vector.broadcast %c16_i32 : i32 to vector<1x32xi32>
    %21 = arith.cmpi slt, %7, %20 : vector<1x32xi32>
    %22 = arith.andi %19, %21 : vector<1x32xi1>
    %cst_10 = arith.constant 1.000000e+00 : f32
    %cst_11 = arith.constant 0.000000e+00 : f32
    %23 = vector.broadcast %cst_10 : f32 to vector<1x32xf32>
    %24 = vector.broadcast %cst_11 : f32 to vector<1x32xf32>
    %25 = arith.select %22, %23, %24 : vector<1x32xi1>, vector<1x32xf32>
    %26 = arith.truncf %25 : vector<1x32xf32> to vector<1x32xbf16>
    %c16_i32_12 = arith.constant 16 : i32
    %27 = vector.broadcast %c16_i32_12 : i32 to vector<1x32xi32>
    %28 = arith.cmpi sge, %7, %27 : vector<1x32xi32>
    %c24_i32 = arith.constant 24 : i32
    %29 = vector.broadcast %c24_i32 : i32 to vector<1x32xi32>
    %30 = arith.cmpi slt, %7, %29 : vector<1x32xi32>
    %31 = arith.andi %28, %30 : vector<1x32xi1>
    %cst_13 = arith.constant 1.000000e+00 : f32
    %cst_14 = arith.constant 0.000000e+00 : f32
    %32 = vector.broadcast %cst_13 : f32 to vector<1x32xf32>
    %33 = vector.broadcast %cst_14 : f32 to vector<1x32xf32>
    %34 = arith.select %31, %32, %33 : vector<1x32xi1>, vector<1x32xf32>
    %35 = arith.truncf %34 : vector<1x32xf32> to vector<1x32xbf16>
    %c24_i32_15 = arith.constant 24 : i32
    %36 = vector.broadcast %c24_i32_15 : i32 to vector<1x32xi32>
    %37 = arith.cmpi sge, %7, %36 : vector<1x32xi32>
    %c32_i32 = arith.constant 32 : i32
    %38 = vector.broadcast %c32_i32 : i32 to vector<1x32xi32>
    %39 = arith.cmpi slt, %7, %38 : vector<1x32xi32>
    %40 = arith.andi %37, %39 : vector<1x32xi1>
    %cst_16 = arith.constant 1.000000e+00 : f32
    %cst_17 = arith.constant 0.000000e+00 : f32
    %41 = vector.broadcast %cst_16 : f32 to vector<1x32xf32>
    %42 = vector.broadcast %cst_17 : f32 to vector<1x32xf32>
    %43 = arith.select %40, %41, %42 : vector<1x32xi1>, vector<1x32xf32>
    %44 = arith.truncf %43 : vector<1x32xf32> to vector<1x32xbf16>
    %c64_i32 = arith.constant 64 : i32
    %45 = vector.broadcast %c64_i32 : i32 to vector<1x128xi32>
    %46 = arith.cmpi sge, %8, %45 : vector<1x128xi32>
    %c72_i32 = arith.constant 72 : i32
    %47 = vector.broadcast %c72_i32 : i32 to vector<1x128xi32>
    %48 = arith.cmpi slt, %8, %47 : vector<1x128xi32>
    %49 = arith.andi %46, %48 : vector<1x128xi1>
    %cst_18 = arith.constant 1.000000e+00 : f32
    %cst_19 = arith.constant 0.000000e+00 : f32
    %50 = vector.broadcast %cst_18 : f32 to vector<1x128xf32>
    %51 = vector.broadcast %cst_19 : f32 to vector<1x128xf32>
    %52 = arith.select %49, %50, %51 : vector<1x128xi1>, vector<1x128xf32>
    %53 = arith.truncf %52 : vector<1x128xf32> to vector<1x128xbf16>
    %c72_i32_20 = arith.constant 72 : i32
    %54 = vector.broadcast %c72_i32_20 : i32 to vector<1x128xi32>
    %55 = arith.cmpi sge, %8, %54 : vector<1x128xi32>
    %c80_i32 = arith.constant 80 : i32
    %56 = vector.broadcast %c80_i32 : i32 to vector<1x128xi32>
    %57 = arith.cmpi slt, %8, %56 : vector<1x128xi32>
    %58 = arith.andi %55, %57 : vector<1x128xi1>
    %cst_21 = arith.constant 1.000000e+00 : f32
    %cst_22 = arith.constant 0.000000e+00 : f32
    %59 = vector.broadcast %cst_21 : f32 to vector<1x128xf32>
    %60 = vector.broadcast %cst_22 : f32 to vector<1x128xf32>
    %61 = arith.select %58, %59, %60 : vector<1x128xi1>, vector<1x128xf32>
    %62 = arith.truncf %61 : vector<1x128xf32> to vector<1x128xbf16>
    %c80_i32_23 = arith.constant 80 : i32
    %63 = vector.broadcast %c80_i32_23 : i32 to vector<1x128xi32>
    %64 = arith.cmpi sge, %8, %63 : vector<1x128xi32>
    %c88_i32 = arith.constant 88 : i32
    %65 = vector.broadcast %c88_i32 : i32 to vector<1x128xi32>
    %66 = arith.cmpi slt, %8, %65 : vector<1x128xi32>
    %67 = arith.andi %64, %66 : vector<1x128xi1>
    %cst_24 = arith.constant 1.000000e+00 : f32
    %cst_25 = arith.constant 0.000000e+00 : f32
    %68 = vector.broadcast %cst_24 : f32 to vector<1x128xf32>
    %69 = vector.broadcast %cst_25 : f32 to vector<1x128xf32>
    %70 = arith.select %67, %68, %69 : vector<1x128xi1>, vector<1x128xf32>
    %71 = arith.truncf %70 : vector<1x128xf32> to vector<1x128xbf16>
    %c88_i32_26 = arith.constant 88 : i32
    %72 = vector.broadcast %c88_i32_26 : i32 to vector<1x128xi32>
    %73 = arith.cmpi sge, %8, %72 : vector<1x128xi32>
    %c96_i32 = arith.constant 96 : i32
    %74 = vector.broadcast %c96_i32 : i32 to vector<1x128xi32>
    %75 = arith.cmpi slt, %8, %74 : vector<1x128xi32>
    %76 = arith.andi %73, %75 : vector<1x128xi1>
    %cst_27 = arith.constant 1.000000e+00 : f32
    %cst_28 = arith.constant 0.000000e+00 : f32
    %77 = vector.broadcast %cst_27 : f32 to vector<1x128xf32>
    %78 = vector.broadcast %cst_28 : f32 to vector<1x128xf32>
    %79 = arith.select %76, %77, %78 : vector<1x128xi1>, vector<1x128xf32>
    %80 = arith.truncf %79 : vector<1x128xf32> to vector<1x128xbf16>
    %c0_29 = arith.constant 0 : index
    %c0_30 = arith.constant 0 : index
    %c0_31 = arith.constant 0 : index
    %81 = vector.load %arg8[%c0_29, %c0_30, %c0_31] : memref<2x6x32xf32, #tpu.memory_space<vmem>>, vector<1x1x32xf32>
    %82 = vector.shape_cast %81 : vector<1x1x32xf32> to vector<1x32xf32>
    %c0_32 = arith.constant 0 : index
    %c1 = arith.constant 1 : index
    %c0_33 = arith.constant 0 : index
    %83 = vector.load %arg8[%c0_32, %c1, %c0_33] : memref<2x6x32xf32, #tpu.memory_space<vmem>>, vector<1x1x32xf32>
    %84 = vector.shape_cast %83 : vector<1x1x32xf32> to vector<1x32xf32>
    %c0_34 = arith.constant 0 : index
    %c2 = arith.constant 2 : index
    %c0_35 = arith.constant 0 : index
    %85 = vector.load %arg8[%c0_34, %c2, %c0_35] : memref<2x6x32xf32, #tpu.memory_space<vmem>>, vector<1x1x32xf32>
    %86 = vector.shape_cast %85 : vector<1x1x32xf32> to vector<1x32xf32>
    %c0_36 = arith.constant 0 : index
    %c3 = arith.constant 3 : index
    %c0_37 = arith.constant 0 : index
    %87 = vector.load %arg8[%c0_36, %c3, %c0_37] : memref<2x6x32xf32, #tpu.memory_space<vmem>>, vector<1x1x32xf32>
    %88 = vector.shape_cast %87 : vector<1x1x32xf32> to vector<1x32xf32>
    %c0_38 = arith.constant 0 : index
    %c4 = arith.constant 4 : index
    %c0_39 = arith.constant 0 : index
    %89 = vector.load %arg8[%c0_38, %c4, %c0_39] : memref<2x6x32xf32, #tpu.memory_space<vmem>>, vector<1x1x32xf32>
    %90 = vector.shape_cast %89 : vector<1x1x32xf32> to vector<1x32xf32>
    %c0_40 = arith.constant 0 : index
    %c5 = arith.constant 5 : index
    %c0_41 = arith.constant 0 : index
    %91 = vector.load %arg8[%c0_40, %c5, %c0_41] : memref<2x6x32xf32, #tpu.memory_space<vmem>>, vector<1x1x32xf32>
    %92 = vector.shape_cast %91 : vector<1x1x32xf32> to vector<1x32xf32>
    %c0_42 = arith.constant 0 : index
    %c0_43 = arith.constant 0 : index
    %c0_44 = arith.constant 0 : index
    %93 = vector.load %arg9[%c0_42, %c0_43, %c0_44] : memref<2x2x128xf32, #tpu.memory_space<vmem>>, vector<1x1x128xf32>
    %94 = vector.shape_cast %93 : vector<1x1x128xf32> to vector<1x128xf32>
    %c0_45 = arith.constant 0 : index
    %c1_46 = arith.constant 1 : index
    %c0_47 = arith.constant 0 : index
    %95 = vector.load %arg9[%c0_45, %c1_46, %c0_47] : memref<2x2x128xf32, #tpu.memory_space<vmem>>, vector<1x1x128xf32>
    %96 = vector.shape_cast %95 : vector<1x1x128xf32> to vector<1x128xf32>
    %cst_48 = arith.constant dense<0.000000e+00> : vector<34xf32>
    %97 = vector.multi_reduction <add>, %5, %cst_48 [1] : vector<34x32xf32> to vector<34xf32>
    %98 = vector.shape_cast %97 : vector<34xf32> to vector<34x1xf32>
    %cst_49 = arith.constant 3.200000e+01 : f32
    %99 = vector.broadcast %cst_49 : f32 to vector<34x1xf32>
    %100 = arith.divf %98, %99 : vector<34x1xf32>
    %101 = vector.broadcast %100 : vector<34x1xf32> to vector<34x32xf32>
    %102 = arith.subf %5, %101 : vector<34x32xf32>
    %103 = arith.mulf %102, %102 : vector<34x32xf32>
    %cst_50 = arith.constant dense<0.000000e+00> : vector<34xf32>
    %104 = vector.multi_reduction <add>, %103, %cst_50 [1] : vector<34x32xf32> to vector<34xf32>
    %105 = vector.shape_cast %104 : vector<34xf32> to vector<34x1xf32>
    %cst_51 = arith.constant 3.200000e+01 : f32
    %106 = vector.broadcast %cst_51 : f32 to vector<34x1xf32>
    %107 = arith.divf %105, %106 : vector<34x1xf32>
    %cst_52 = arith.constant 9.99999997E-7 : f32
    %108 = vector.broadcast %cst_52 : f32 to vector<34x1xf32>
    %109 = arith.addf %107, %108 : vector<34x1xf32>
    %110 = math.rsqrt %109 : vector<34x1xf32>
    %111 = vector.broadcast %110 : vector<34x1xf32> to vector<34x32xf32>
    %112 = arith.mulf %102, %111 : vector<34x32xf32>
    %113 = vector.broadcast %82 : vector<1x32xf32> to vector<34x32xf32>
    %114 = arith.mulf %112, %113 : vector<34x32xf32>
    %115 = vector.broadcast %84 : vector<1x32xf32> to vector<34x32xf32>
    %116 = arith.addf %114, %115 : vector<34x32xf32>
    %c0_53 = arith.constant 0 : index
    %c0_54 = arith.constant 0 : index
    %c0_55 = arith.constant 0 : index
    %117 = vector.load %arg4[%c0_53, %c0_54, %c0_55] : memref<2x32x128xbf16, #tpu.memory_space<vmem>>, vector<1x32x128xbf16>
    %118 = vector.shape_cast %117 : vector<1x32x128xbf16> to vector<32x128xbf16>
    %119 = arith.truncf %116 : vector<34x32xf32> to vector<34x32xbf16>
    %cst_56 = arith.constant dense<0.000000e+00> : vector<34x128xf32>
    %120 = tpu.matmul %119, %118, %cst_56 {dimension_numbers = #tpu.dot_dimension_numbers<[1], [0], [0], [1], [0, 0, 1, 1], [], []>} : vector<34x32xbf16>, vector<32x128xbf16>, vector<34x128xf32> -> vector<34x128xf32>
    %121 = vector.broadcast %94 : vector<1x128xf32> to vector<34x128xf32>
    %122 = arith.addf %120, %121 : vector<34x128xf32>
    %123 = arith.truncf %122 : vector<34x128xf32> to vector<34x128xbf16>
    %124 = vector.extract_strided_slice %123 {offsets = [0, 0], sizes = [34, 32], strides = [1, 1]} : vector<34x128xbf16> to vector<34x32xbf16>
    %125 = vector.extract_strided_slice %122 {offsets = [0, 32], sizes = [34, 32], strides = [1, 1]} : vector<34x128xf32> to vector<34x32xf32>
    %126 = tpu.transpose %125, [1, 0] : vector<34x32xf32> -> vector<32x34xf32>
    %127 = arith.truncf %126 : vector<32x34xf32> to vector<32x34xbf16>
    %cst_57 = arith.constant 0.000000e+00 : f32
    %128 = vector.broadcast %cst_57 : f32 to vector<34x128xf32>
    %129 = vector.broadcast %17 : vector<1x32xbf16> to vector<34x32xbf16>
    %130 = arith.mulf %124, %129 : vector<34x32xbf16>
    %cst_58 = arith.constant dense<0.000000e+00> : vector<34x34xf32>
    %131 = tpu.matmul %130, %127, %cst_58 {dimension_numbers = #tpu.dot_dimension_numbers<[1], [0], [0], [1], [0, 0, 1, 1], [], []>} : vector<34x32xbf16>, vector<32x34xbf16>, vector<34x34xf32> -> vector<34x34xf32>
    %132 = arith.addf %131, %6 : vector<34x34xf32>
    %cst_59 = arith.constant dense<0xFF800000> : vector<34xf32>
    %133 = vector.multi_reduction <maximumf>, %132, %cst_59 [1] : vector<34x34xf32> to vector<34xf32>
    %134 = vector.shape_cast %133 : vector<34xf32> to vector<34x1xf32>
    %135 = vector.broadcast %134 : vector<34x1xf32> to vector<34x34xf32>
    %136 = arith.subf %132, %135 : vector<34x34xf32>
    %137 = math.exp %136 : vector<34x34xf32>
    %cst_60 = arith.constant dense<0.000000e+00> : vector<34xf32>
    %138 = vector.multi_reduction <add>, %137, %cst_60 [1] : vector<34x34xf32> to vector<34xf32>
    %139 = vector.shape_cast %138 : vector<34xf32> to vector<34x1xf32>
    %140 = tpu.reciprocal %139 {approx = true} : vector<34x1xf32> -> vector<34x1xf32>
    %141 = vector.broadcast %140 : vector<34x1xf32> to vector<34x34xf32>
    %142 = arith.mulf %137, %141 : vector<34x34xf32>
    %143 = arith.truncf %142 : vector<34x34xf32> to vector<34x34xbf16>
    %144 = vector.broadcast %53 : vector<1x128xbf16> to vector<34x128xbf16>
    %145 = arith.mulf %123, %144 : vector<34x128xbf16>
    %cst_61 = arith.constant dense<0.000000e+00> : vector<34x128xf32>
    %146 = tpu.matmul %143, %145, %cst_61 {dimension_numbers = #tpu.dot_dimension_numbers<[1], [0], [0], [1], [0, 0, 1, 1], [], []>} : vector<34x34xbf16>, vector<34x128xbf16>, vector<34x128xf32> -> vector<34x128xf32>
    %147 = arith.addf %128, %146 : vector<34x128xf32>
    %148 = vector.broadcast %26 : vector<1x32xbf16> to vector<34x32xbf16>
    %149 = arith.mulf %124, %148 : vector<34x32xbf16>
    %cst_62 = arith.constant dense<0.000000e+00> : vector<34x34xf32>
    %150 = tpu.matmul %149, %127, %cst_62 {dimension_numbers = #tpu.dot_dimension_numbers<[1], [0], [0], [1], [0, 0, 1, 1], [], []>} : vector<34x32xbf16>, vector<32x34xbf16>, vector<34x34xf32> -> vector<34x34xf32>
    %151 = arith.addf %150, %6 : vector<34x34xf32>
    %cst_63 = arith.constant dense<0xFF800000> : vector<34xf32>
    %152 = vector.multi_reduction <maximumf>, %151, %cst_63 [1] : vector<34x34xf32> to vector<34xf32>
    %153 = vector.shape_cast %152 : vector<34xf32> to vector<34x1xf32>
    %154 = vector.broadcast %153 : vector<34x1xf32> to vector<34x34xf32>
    %155 = arith.subf %151, %154 : vector<34x34xf32>
    %156 = math.exp %155 : vector<34x34xf32>
    %cst_64 = arith.constant dense<0.000000e+00> : vector<34xf32>
    %157 = vector.multi_reduction <add>, %156, %cst_64 [1] : vector<34x34xf32> to vector<34xf32>
    %158 = vector.shape_cast %157 : vector<34xf32> to vector<34x1xf32>
    %159 = tpu.reciprocal %158 {approx = true} : vector<34x1xf32> -> vector<34x1xf32>
    %160 = vector.broadcast %159 : vector<34x1xf32> to vector<34x34xf32>
    %161 = arith.mulf %156, %160 : vector<34x34xf32>
    %162 = arith.truncf %161 : vector<34x34xf32> to vector<34x34xbf16>
    %163 = vector.broadcast %62 : vector<1x128xbf16> to vector<34x128xbf16>
    %164 = arith.mulf %123, %163 : vector<34x128xbf16>
    %cst_65 = arith.constant dense<0.000000e+00> : vector<34x128xf32>
    %165 = tpu.matmul %162, %164, %cst_65 {dimension_numbers = #tpu.dot_dimension_numbers<[1], [0], [0], [1], [0, 0, 1, 1], [], []>} : vector<34x34xbf16>, vector<34x128xbf16>, vector<34x128xf32> -> vector<34x128xf32>
    %166 = arith.addf %147, %165 : vector<34x128xf32>
    %167 = vector.broadcast %35 : vector<1x32xbf16> to vector<34x32xbf16>
    %168 = arith.mulf %124, %167 : vector<34x32xbf16>
    %cst_66 = arith.constant dense<0.000000e+00> : vector<34x34xf32>
    %169 = tpu.matmul %168, %127, %cst_66 {dimension_numbers = #tpu.dot_dimension_numbers<[1], [0], [0], [1], [0, 0, 1, 1], [], []>} : vector<34x32xbf16>, vector<32x34xbf16>, vector<34x34xf32> -> vector<34x34xf32>
    %170 = arith.addf %169, %6 : vector<34x34xf32>
    %cst_67 = arith.constant dense<0xFF800000> : vector<34xf32>
    %171 = vector.multi_reduction <maximumf>, %170, %cst_67 [1] : vector<34x34xf32> to vector<34xf32>
    %172 = vector.shape_cast %171 : vector<34xf32> to vector<34x1xf32>
    %173 = vector.broadcast %172 : vector<34x1xf32> to vector<34x34xf32>
    %174 = arith.subf %170, %173 : vector<34x34xf32>
    %175 = math.exp %174 : vector<34x34xf32>
    %cst_68 = arith.constant dense<0.000000e+00> : vector<34xf32>
    %176 = vector.multi_reduction <add>, %175, %cst_68 [1] : vector<34x34xf32> to vector<34xf32>
    %177 = vector.shape_cast %176 : vector<34xf32> to vector<34x1xf32>
    %178 = tpu.reciprocal %177 {approx = true} : vector<34x1xf32> -> vector<34x1xf32>
    %179 = vector.broadcast %178 : vector<34x1xf32> to vector<34x34xf32>
    %180 = arith.mulf %175, %179 : vector<34x34xf32>
    %181 = arith.truncf %180 : vector<34x34xf32> to vector<34x34xbf16>
    %182 = vector.broadcast %71 : vector<1x128xbf16> to vector<34x128xbf16>
    %183 = arith.mulf %123, %182 : vector<34x128xbf16>
    %cst_69 = arith.constant dense<0.000000e+00> : vector<34x128xf32>
    %184 = tpu.matmul %181, %183, %cst_69 {dimension_numbers = #tpu.dot_dimension_numbers<[1], [0], [0], [1], [0, 0, 1, 1], [], []>} : vector<34x34xbf16>, vector<34x128xbf16>, vector<34x128xf32> -> vector<34x128xf32>
    %185 = arith.addf %166, %184 : vector<34x128xf32>
    %186 = vector.broadcast %44 : vector<1x32xbf16> to vector<34x32xbf16>
    %187 = arith.mulf %124, %186 : vector<34x32xbf16>
    %cst_70 = arith.constant dense<0.000000e+00> : vector<34x34xf32>
    %188 = tpu.matmul %187, %127, %cst_70 {dimension_numbers = #tpu.dot_dimension_numbers<[1], [0], [0], [1], [0, 0, 1, 1], [], []>} : vector<34x32xbf16>, vector<32x34xbf16>, vector<34x34xf32> -> vector<34x34xf32>
    %189 = arith.addf %188, %6 : vector<34x34xf32>
    %cst_71 = arith.constant dense<0xFF800000> : vector<34xf32>
    %190 = vector.multi_reduction <maximumf>, %189, %cst_71 [1] : vector<34x34xf32> to vector<34xf32>
    %191 = vector.shape_cast %190 : vector<34xf32> to vector<34x1xf32>
    %192 = vector.broadcast %191 : vector<34x1xf32> to vector<34x34xf32>
    %193 = arith.subf %189, %192 : vector<34x34xf32>
    %194 = math.exp %193 : vector<34x34xf32>
    %cst_72 = arith.constant dense<0.000000e+00> : vector<34xf32>
    %195 = vector.multi_reduction <add>, %194, %cst_72 [1] : vector<34x34xf32> to vector<34xf32>
    %196 = vector.shape_cast %195 : vector<34xf32> to vector<34x1xf32>
    %197 = tpu.reciprocal %196 {approx = true} : vector<34x1xf32> -> vector<34x1xf32>
    %198 = vector.broadcast %197 : vector<34x1xf32> to vector<34x34xf32>
    %199 = arith.mulf %194, %198 : vector<34x34xf32>
    %200 = arith.truncf %199 : vector<34x34xf32> to vector<34x34xbf16>
    %201 = vector.broadcast %80 : vector<1x128xbf16> to vector<34x128xbf16>
    %202 = arith.mulf %123, %201 : vector<34x128xbf16>
    %cst_73 = arith.constant dense<0.000000e+00> : vector<34x128xf32>
    %203 = tpu.matmul %200, %202, %cst_73 {dimension_numbers = #tpu.dot_dimension_numbers<[1], [0], [0], [1], [0, 0, 1, 1], [], []>} : vector<34x34xbf16>, vector<34x128xbf16>, vector<34x128xf32> -> vector<34x128xf32>
    %204 = arith.addf %185, %203 : vector<34x128xf32>
    %c0_74 = arith.constant 0 : index
    %c0_75 = arith.constant 0 : index
    %c0_76 = arith.constant 0 : index
    %205 = vector.load %arg5[%c0_74, %c0_75, %c0_76] : memref<2x128x32xbf16, #tpu.memory_space<vmem>>, vector<1x128x32xbf16>
    %206 = vector.shape_cast %205 : vector<1x128x32xbf16> to vector<128x32xbf16>
    %207 = arith.truncf %204 : vector<34x128xf32> to vector<34x128xbf16>
    %cst_77 = arith.constant dense<0.000000e+00> : vector<34x32xf32>
    %208 = tpu.matmul %207, %206, %cst_77 {dimension_numbers = #tpu.dot_dimension_numbers<[1], [0], [0], [1], [0, 0, 1, 1], [], []>} : vector<34x128xbf16>, vector<128x32xbf16>, vector<34x32xf32> -> vector<34x32xf32>
    %209 = arith.addf %5, %208 : vector<34x32xf32>
    %210 = vector.broadcast %86 : vector<1x32xf32> to vector<34x32xf32>
    %211 = arith.addf %209, %210 : vector<34x32xf32>
    %cst_78 = arith.constant dense<0.000000e+00> : vector<34xf32>
    %212 = vector.multi_reduction <add>, %211, %cst_78 [1] : vector<34x32xf32> to vector<34xf32>
    %213 = vector.shape_cast %212 : vector<34xf32> to vector<34x1xf32>
    %cst_79 = arith.constant 3.200000e+01 : f32
    %214 = vector.broadcast %cst_79 : f32 to vector<34x1xf32>
    %215 = arith.divf %213, %214 : vector<34x1xf32>
    %216 = vector.broadcast %215 : vector<34x1xf32> to vector<34x32xf32>
    %217 = arith.subf %211, %216 : vector<34x32xf32>
    %218 = arith.mulf %217, %217 : vector<34x32xf32>
    %cst_80 = arith.constant dense<0.000000e+00> : vector<34xf32>
    %219 = vector.multi_reduction <add>, %218, %cst_80 [1] : vector<34x32xf32> to vector<34xf32>
    %220 = vector.shape_cast %219 : vector<34xf32> to vector<34x1xf32>
    %cst_81 = arith.constant 3.200000e+01 : f32
    %221 = vector.broadcast %cst_81 : f32 to vector<34x1xf32>
    %222 = arith.divf %220, %221 : vector<34x1xf32>
    %cst_82 = arith.constant 9.99999997E-7 : f32
    %223 = vector.broadcast %cst_82 : f32 to vector<34x1xf32>
    %224 = arith.addf %222, %223 : vector<34x1xf32>
    %225 = math.rsqrt %224 : vector<34x1xf32>
    %226 = vector.broadcast %225 : vector<34x1xf32> to vector<34x32xf32>
    %227 = arith.mulf %217, %226 : vector<34x32xf32>
    %228 = vector.broadcast %88 : vector<1x32xf32> to vector<34x32xf32>
    %229 = arith.mulf %227, %228 : vector<34x32xf32>
    %230 = vector.broadcast %90 : vector<1x32xf32> to vector<34x32xf32>
    %231 = arith.addf %229, %230 : vector<34x32xf32>
    %c0_83 = arith.constant 0 : index
    %c0_84 = arith.constant 0 : index
    %c0_85 = arith.constant 0 : index
    %232 = vector.load %arg6[%c0_83, %c0_84, %c0_85] : memref<2x32x128xbf16, #tpu.memory_space<vmem>>, vector<1x32x128xbf16>
    %233 = vector.shape_cast %232 : vector<1x32x128xbf16> to vector<32x128xbf16>
    %234 = arith.truncf %231 : vector<34x32xf32> to vector<34x32xbf16>
    %cst_86 = arith.constant dense<0.000000e+00> : vector<34x128xf32>
    %235 = tpu.matmul %234, %233, %cst_86 {dimension_numbers = #tpu.dot_dimension_numbers<[1], [0], [0], [1], [0, 0, 1, 1], [], []>} : vector<34x32xbf16>, vector<32x128xbf16>, vector<34x128xf32> -> vector<34x128xf32>
    %236 = vector.broadcast %96 : vector<1x128xf32> to vector<34x128xf32>
    %237 = arith.addf %235, %236 : vector<34x128xf32>
    %cst_87 = arith.constant 5.000000e-01 : f32
    %238 = vector.broadcast %cst_87 : f32 to vector<34x128xf32>
    %239 = arith.mulf %238, %237 : vector<34x128xf32>
    %cst_88 = arith.constant 4.471500e-02 : f32
    %240 = vector.broadcast %cst_88 : f32 to vector<34x128xf32>
    %241 = arith.mulf %240, %237 : vector<34x128xf32>
    %242 = arith.mulf %241, %237 : vector<34x128xf32>
    %243 = arith.mulf %242, %237 : vector<34x128xf32>
    %244 = arith.addf %237, %243 : vector<34x128xf32>
    %cst_89 = arith.constant 0.797884583 : f32
    %245 = vector.broadcast %cst_89 : f32 to vector<34x128xf32>
    %246 = arith.mulf %245, %244 : vector<34x128xf32>
    %247 = math.tanh %246 : vector<34x128xf32>
    %cst_90 = arith.constant 1.000000e+00 : f32
    %248 = vector.broadcast %cst_90 : f32 to vector<34x128xf32>
    %249 = arith.addf %248, %247 : vector<34x128xf32>
    %250 = arith.mulf %239, %249 : vector<34x128xf32>
    %c0_91 = arith.constant 0 : index
    %c0_92 = arith.constant 0 : index
    %c0_93 = arith.constant 0 : index
    %251 = vector.load %arg7[%c0_91, %c0_92, %c0_93] : memref<2x128x32xbf16, #tpu.memory_space<vmem>>, vector<1x128x32xbf16>
    %252 = vector.shape_cast %251 : vector<1x128x32xbf16> to vector<128x32xbf16>
    %253 = arith.truncf %250 : vector<34x128xf32> to vector<34x128xbf16>
    %cst_94 = arith.constant dense<0.000000e+00> : vector<34x32xf32>
    %254 = tpu.matmul %253, %252, %cst_94 {dimension_numbers = #tpu.dot_dimension_numbers<[1], [0], [0], [1], [0, 0, 1, 1], [], []>} : vector<34x128xbf16>, vector<128x32xbf16>, vector<34x32xf32> -> vector<34x32xf32>
    %255 = arith.addf %211, %254 : vector<34x32xf32>
    %256 = vector.broadcast %92 : vector<1x32xf32> to vector<34x32xf32>
    %257 = arith.addf %255, %256 : vector<34x32xf32>
    %c1_95 = arith.constant 1 : index
    %c0_96 = arith.constant 0 : index
    %c0_97 = arith.constant 0 : index
    %258 = vector.load %arg8[%c1_95, %c0_96, %c0_97] : memref<2x6x32xf32, #tpu.memory_space<vmem>>, vector<1x1x32xf32>
    %259 = vector.shape_cast %258 : vector<1x1x32xf32> to vector<1x32xf32>
    %c1_98 = arith.constant 1 : index
    %c1_99 = arith.constant 1 : index
    %c0_100 = arith.constant 0 : index
    %260 = vector.load %arg8[%c1_98, %c1_99, %c0_100] : memref<2x6x32xf32, #tpu.memory_space<vmem>>, vector<1x1x32xf32>
    %261 = vector.shape_cast %260 : vector<1x1x32xf32> to vector<1x32xf32>
    %c1_101 = arith.constant 1 : index
    %c2_102 = arith.constant 2 : index
    %c0_103 = arith.constant 0 : index
    %262 = vector.load %arg8[%c1_101, %c2_102, %c0_103] : memref<2x6x32xf32, #tpu.memory_space<vmem>>, vector<1x1x32xf32>
    %263 = vector.shape_cast %262 : vector<1x1x32xf32> to vector<1x32xf32>
    %c1_104 = arith.constant 1 : index
    %c3_105 = arith.constant 3 : index
    %c0_106 = arith.constant 0 : index
    %264 = vector.load %arg8[%c1_104, %c3_105, %c0_106] : memref<2x6x32xf32, #tpu.memory_space<vmem>>, vector<1x1x32xf32>
    %265 = vector.shape_cast %264 : vector<1x1x32xf32> to vector<1x32xf32>
    %c1_107 = arith.constant 1 : index
    %c4_108 = arith.constant 4 : index
    %c0_109 = arith.constant 0 : index
    %266 = vector.load %arg8[%c1_107, %c4_108, %c0_109] : memref<2x6x32xf32, #tpu.memory_space<vmem>>, vector<1x1x32xf32>
    %267 = vector.shape_cast %266 : vector<1x1x32xf32> to vector<1x32xf32>
    %c1_110 = arith.constant 1 : index
    %c5_111 = arith.constant 5 : index
    %c0_112 = arith.constant 0 : index
    %268 = vector.load %arg8[%c1_110, %c5_111, %c0_112] : memref<2x6x32xf32, #tpu.memory_space<vmem>>, vector<1x1x32xf32>
    %269 = vector.shape_cast %268 : vector<1x1x32xf32> to vector<1x32xf32>
    %c1_113 = arith.constant 1 : index
    %c0_114 = arith.constant 0 : index
    %c0_115 = arith.constant 0 : index
    %270 = vector.load %arg9[%c1_113, %c0_114, %c0_115] : memref<2x2x128xf32, #tpu.memory_space<vmem>>, vector<1x1x128xf32>
    %271 = vector.shape_cast %270 : vector<1x1x128xf32> to vector<1x128xf32>
    %c1_116 = arith.constant 1 : index
    %c1_117 = arith.constant 1 : index
    %c0_118 = arith.constant 0 : index
    %272 = vector.load %arg9[%c1_116, %c1_117, %c0_118] : memref<2x2x128xf32, #tpu.memory_space<vmem>>, vector<1x1x128xf32>
    %273 = vector.shape_cast %272 : vector<1x1x128xf32> to vector<1x128xf32>
    %cst_119 = arith.constant dense<0.000000e+00> : vector<34xf32>
    %274 = vector.multi_reduction <add>, %257, %cst_119 [1] : vector<34x32xf32> to vector<34xf32>
    %275 = vector.shape_cast %274 : vector<34xf32> to vector<34x1xf32>
    %cst_120 = arith.constant 3.200000e+01 : f32
    %276 = vector.broadcast %cst_120 : f32 to vector<34x1xf32>
    %277 = arith.divf %275, %276 : vector<34x1xf32>
    %278 = vector.broadcast %277 : vector<34x1xf32> to vector<34x32xf32>
    %279 = arith.subf %257, %278 : vector<34x32xf32>
    %280 = arith.mulf %279, %279 : vector<34x32xf32>
    %cst_121 = arith.constant dense<0.000000e+00> : vector<34xf32>
    %281 = vector.multi_reduction <add>, %280, %cst_121 [1] : vector<34x32xf32> to vector<34xf32>
    %282 = vector.shape_cast %281 : vector<34xf32> to vector<34x1xf32>
    %cst_122 = arith.constant 3.200000e+01 : f32
    %283 = vector.broadcast %cst_122 : f32 to vector<34x1xf32>
    %284 = arith.divf %282, %283 : vector<34x1xf32>
    %cst_123 = arith.constant 9.99999997E-7 : f32
    %285 = vector.broadcast %cst_123 : f32 to vector<34x1xf32>
    %286 = arith.addf %284, %285 : vector<34x1xf32>
    %287 = math.rsqrt %286 : vector<34x1xf32>
    %288 = vector.broadcast %287 : vector<34x1xf32> to vector<34x32xf32>
    %289 = arith.mulf %279, %288 : vector<34x32xf32>
    %290 = vector.broadcast %259 : vector<1x32xf32> to vector<34x32xf32>
    %291 = arith.mulf %289, %290 : vector<34x32xf32>
    %292 = vector.broadcast %261 : vector<1x32xf32> to vector<34x32xf32>
    %293 = arith.addf %291, %292 : vector<34x32xf32>
    %c1_124 = arith.constant 1 : index
    %c0_125 = arith.constant 0 : index
    %c0_126 = arith.constant 0 : index
    %294 = vector.load %arg4[%c1_124, %c0_125, %c0_126] : memref<2x32x128xbf16, #tpu.memory_space<vmem>>, vector<1x32x128xbf16>
    %295 = vector.shape_cast %294 : vector<1x32x128xbf16> to vector<32x128xbf16>
    %296 = arith.truncf %293 : vector<34x32xf32> to vector<34x32xbf16>
    %cst_127 = arith.constant dense<0.000000e+00> : vector<34x128xf32>
    %297 = tpu.matmul %296, %295, %cst_127 {dimension_numbers = #tpu.dot_dimension_numbers<[1], [0], [0], [1], [0, 0, 1, 1], [], []>} : vector<34x32xbf16>, vector<32x128xbf16>, vector<34x128xf32> -> vector<34x128xf32>
    %298 = vector.broadcast %271 : vector<1x128xf32> to vector<34x128xf32>
    %299 = arith.addf %297, %298 : vector<34x128xf32>
    %300 = arith.truncf %299 : vector<34x128xf32> to vector<34x128xbf16>
    %301 = vector.extract_strided_slice %300 {offsets = [0, 0], sizes = [34, 32], strides = [1, 1]} : vector<34x128xbf16> to vector<34x32xbf16>
    %302 = vector.extract_strided_slice %299 {offsets = [0, 32], sizes = [34, 32], strides = [1, 1]} : vector<34x128xf32> to vector<34x32xf32>
    %303 = tpu.transpose %302, [1, 0] : vector<34x32xf32> -> vector<32x34xf32>
    %304 = arith.truncf %303 : vector<32x34xf32> to vector<32x34xbf16>
    %cst_128 = arith.constant 0.000000e+00 : f32
    %305 = vector.broadcast %cst_128 : f32 to vector<34x128xf32>
    %306 = vector.broadcast %17 : vector<1x32xbf16> to vector<34x32xbf16>
    %307 = arith.mulf %301, %306 : vector<34x32xbf16>
    %cst_129 = arith.constant dense<0.000000e+00> : vector<34x34xf32>
    %308 = tpu.matmul %307, %304, %cst_129 {dimension_numbers = #tpu.dot_dimension_numbers<[1], [0], [0], [1], [0, 0, 1, 1], [], []>} : vector<34x32xbf16>, vector<32x34xbf16>, vector<34x34xf32> -> vector<34x34xf32>
    %309 = arith.addf %308, %6 : vector<34x34xf32>
    %cst_130 = arith.constant dense<0xFF800000> : vector<34xf32>
    %310 = vector.multi_reduction <maximumf>, %309, %cst_130 [1] : vector<34x34xf32> to vector<34xf32>
    %311 = vector.shape_cast %310 : vector<34xf32> to vector<34x1xf32>
    %312 = vector.broadcast %311 : vector<34x1xf32> to vector<34x34xf32>
    %313 = arith.subf %309, %312 : vector<34x34xf32>
    %314 = math.exp %313 : vector<34x34xf32>
    %cst_131 = arith.constant dense<0.000000e+00> : vector<34xf32>
    %315 = vector.multi_reduction <add>, %314, %cst_131 [1] : vector<34x34xf32> to vector<34xf32>
    %316 = vector.shape_cast %315 : vector<34xf32> to vector<34x1xf32>
    %317 = tpu.reciprocal %316 {approx = true} : vector<34x1xf32> -> vector<34x1xf32>
    %318 = vector.broadcast %317 : vector<34x1xf32> to vector<34x34xf32>
    %319 = arith.mulf %314, %318 : vector<34x34xf32>
    %320 = arith.truncf %319 : vector<34x34xf32> to vector<34x34xbf16>
    %321 = vector.broadcast %53 : vector<1x128xbf16> to vector<34x128xbf16>
    %322 = arith.mulf %300, %321 : vector<34x128xbf16>
    %cst_132 = arith.constant dense<0.000000e+00> : vector<34x128xf32>
    %323 = tpu.matmul %320, %322, %cst_132 {dimension_numbers = #tpu.dot_dimension_numbers<[1], [0], [0], [1], [0, 0, 1, 1], [], []>} : vector<34x34xbf16>, vector<34x128xbf16>, vector<34x128xf32> -> vector<34x128xf32>
    %324 = arith.addf %305, %323 : vector<34x128xf32>
    %325 = vector.broadcast %26 : vector<1x32xbf16> to vector<34x32xbf16>
    %326 = arith.mulf %301, %325 : vector<34x32xbf16>
    %cst_133 = arith.constant dense<0.000000e+00> : vector<34x34xf32>
    %327 = tpu.matmul %326, %304, %cst_133 {dimension_numbers = #tpu.dot_dimension_numbers<[1], [0], [0], [1], [0, 0, 1, 1], [], []>} : vector<34x32xbf16>, vector<32x34xbf16>, vector<34x34xf32> -> vector<34x34xf32>
    %328 = arith.addf %327, %6 : vector<34x34xf32>
    %cst_134 = arith.constant dense<0xFF800000> : vector<34xf32>
    %329 = vector.multi_reduction <maximumf>, %328, %cst_134 [1] : vector<34x34xf32> to vector<34xf32>
    %330 = vector.shape_cast %329 : vector<34xf32> to vector<34x1xf32>
    %331 = vector.broadcast %330 : vector<34x1xf32> to vector<34x34xf32>
    %332 = arith.subf %328, %331 : vector<34x34xf32>
    %333 = math.exp %332 : vector<34x34xf32>
    %cst_135 = arith.constant dense<0.000000e+00> : vector<34xf32>
    %334 = vector.multi_reduction <add>, %333, %cst_135 [1] : vector<34x34xf32> to vector<34xf32>
    %335 = vector.shape_cast %334 : vector<34xf32> to vector<34x1xf32>
    %336 = tpu.reciprocal %335 {approx = true} : vector<34x1xf32> -> vector<34x1xf32>
    %337 = vector.broadcast %336 : vector<34x1xf32> to vector<34x34xf32>
    %338 = arith.mulf %333, %337 : vector<34x34xf32>
    %339 = arith.truncf %338 : vector<34x34xf32> to vector<34x34xbf16>
    %340 = vector.broadcast %62 : vector<1x128xbf16> to vector<34x128xbf16>
    %341 = arith.mulf %300, %340 : vector<34x128xbf16>
    %cst_136 = arith.constant dense<0.000000e+00> : vector<34x128xf32>
    %342 = tpu.matmul %339, %341, %cst_136 {dimension_numbers = #tpu.dot_dimension_numbers<[1], [0], [0], [1], [0, 0, 1, 1], [], []>} : vector<34x34xbf16>, vector<34x128xbf16>, vector<34x128xf32> -> vector<34x128xf32>
    %343 = arith.addf %324, %342 : vector<34x128xf32>
    %344 = vector.broadcast %35 : vector<1x32xbf16> to vector<34x32xbf16>
    %345 = arith.mulf %301, %344 : vector<34x32xbf16>
    %cst_137 = arith.constant dense<0.000000e+00> : vector<34x34xf32>
    %346 = tpu.matmul %345, %304, %cst_137 {dimension_numbers = #tpu.dot_dimension_numbers<[1], [0], [0], [1], [0, 0, 1, 1], [], []>} : vector<34x32xbf16>, vector<32x34xbf16>, vector<34x34xf32> -> vector<34x34xf32>
    %347 = arith.addf %346, %6 : vector<34x34xf32>
    %cst_138 = arith.constant dense<0xFF800000> : vector<34xf32>
    %348 = vector.multi_reduction <maximumf>, %347, %cst_138 [1] : vector<34x34xf32> to vector<34xf32>
    %349 = vector.shape_cast %348 : vector<34xf32> to vector<34x1xf32>
    %350 = vector.broadcast %349 : vector<34x1xf32> to vector<34x34xf32>
    %351 = arith.subf %347, %350 : vector<34x34xf32>
    %352 = math.exp %351 : vector<34x34xf32>
    %cst_139 = arith.constant dense<0.000000e+00> : vector<34xf32>
    %353 = vector.multi_reduction <add>, %352, %cst_139 [1] : vector<34x34xf32> to vector<34xf32>
    %354 = vector.shape_cast %353 : vector<34xf32> to vector<34x1xf32>
    %355 = tpu.reciprocal %354 {approx = true} : vector<34x1xf32> -> vector<34x1xf32>
    %356 = vector.broadcast %355 : vector<34x1xf32> to vector<34x34xf32>
    %357 = arith.mulf %352, %356 : vector<34x34xf32>
    %358 = arith.truncf %357 : vector<34x34xf32> to vector<34x34xbf16>
    %359 = vector.broadcast %71 : vector<1x128xbf16> to vector<34x128xbf16>
    %360 = arith.mulf %300, %359 : vector<34x128xbf16>
    %cst_140 = arith.constant dense<0.000000e+00> : vector<34x128xf32>
    %361 = tpu.matmul %358, %360, %cst_140 {dimension_numbers = #tpu.dot_dimension_numbers<[1], [0], [0], [1], [0, 0, 1, 1], [], []>} : vector<34x34xbf16>, vector<34x128xbf16>, vector<34x128xf32> -> vector<34x128xf32>
    %362 = arith.addf %343, %361 : vector<34x128xf32>
    %363 = vector.broadcast %44 : vector<1x32xbf16> to vector<34x32xbf16>
    %364 = arith.mulf %301, %363 : vector<34x32xbf16>
    %cst_141 = arith.constant dense<0.000000e+00> : vector<34x34xf32>
    %365 = tpu.matmul %364, %304, %cst_141 {dimension_numbers = #tpu.dot_dimension_numbers<[1], [0], [0], [1], [0, 0, 1, 1], [], []>} : vector<34x32xbf16>, vector<32x34xbf16>, vector<34x34xf32> -> vector<34x34xf32>
    %366 = arith.addf %365, %6 : vector<34x34xf32>
    %cst_142 = arith.constant dense<0xFF800000> : vector<34xf32>
    %367 = vector.multi_reduction <maximumf>, %366, %cst_142 [1] : vector<34x34xf32> to vector<34xf32>
    %368 = vector.shape_cast %367 : vector<34xf32> to vector<34x1xf32>
    %369 = vector.broadcast %368 : vector<34x1xf32> to vector<34x34xf32>
    %370 = arith.subf %366, %369 : vector<34x34xf32>
    %371 = math.exp %370 : vector<34x34xf32>
    %cst_143 = arith.constant dense<0.000000e+00> : vector<34xf32>
    %372 = vector.multi_reduction <add>, %371, %cst_143 [1] : vector<34x34xf32> to vector<34xf32>
    %373 = vector.shape_cast %372 : vector<34xf32> to vector<34x1xf32>
    %374 = tpu.reciprocal %373 {approx = true} : vector<34x1xf32> -> vector<34x1xf32>
    %375 = vector.broadcast %374 : vector<34x1xf32> to vector<34x34xf32>
    %376 = arith.mulf %371, %375 : vector<34x34xf32>
    %377 = arith.truncf %376 : vector<34x34xf32> to vector<34x34xbf16>
    %378 = vector.broadcast %80 : vector<1x128xbf16> to vector<34x128xbf16>
    %379 = arith.mulf %300, %378 : vector<34x128xbf16>
    %cst_144 = arith.constant dense<0.000000e+00> : vector<34x128xf32>
    %380 = tpu.matmul %377, %379, %cst_144 {dimension_numbers = #tpu.dot_dimension_numbers<[1], [0], [0], [1], [0, 0, 1, 1], [], []>} : vector<34x34xbf16>, vector<34x128xbf16>, vector<34x128xf32> -> vector<34x128xf32>
    %381 = arith.addf %362, %380 : vector<34x128xf32>
    %c1_145 = arith.constant 1 : index
    %c0_146 = arith.constant 0 : index
    %c0_147 = arith.constant 0 : index
    %382 = vector.load %arg5[%c1_145, %c0_146, %c0_147] : memref<2x128x32xbf16, #tpu.memory_space<vmem>>, vector<1x128x32xbf16>
    %383 = vector.shape_cast %382 : vector<1x128x32xbf16> to vector<128x32xbf16>
    %384 = arith.truncf %381 : vector<34x128xf32> to vector<34x128xbf16>
    %cst_148 = arith.constant dense<0.000000e+00> : vector<34x32xf32>
    %385 = tpu.matmul %384, %383, %cst_148 {dimension_numbers = #tpu.dot_dimension_numbers<[1], [0], [0], [1], [0, 0, 1, 1], [], []>} : vector<34x128xbf16>, vector<128x32xbf16>, vector<34x32xf32> -> vector<34x32xf32>
    %386 = arith.addf %257, %385 : vector<34x32xf32>
    %387 = vector.broadcast %263 : vector<1x32xf32> to vector<34x32xf32>
    %388 = arith.addf %386, %387 : vector<34x32xf32>
    %cst_149 = arith.constant dense<0.000000e+00> : vector<34xf32>
    %389 = vector.multi_reduction <add>, %388, %cst_149 [1] : vector<34x32xf32> to vector<34xf32>
    %390 = vector.shape_cast %389 : vector<34xf32> to vector<34x1xf32>
    %cst_150 = arith.constant 3.200000e+01 : f32
    %391 = vector.broadcast %cst_150 : f32 to vector<34x1xf32>
    %392 = arith.divf %390, %391 : vector<34x1xf32>
    %393 = vector.broadcast %392 : vector<34x1xf32> to vector<34x32xf32>
    %394 = arith.subf %388, %393 : vector<34x32xf32>
    %395 = arith.mulf %394, %394 : vector<34x32xf32>
    %cst_151 = arith.constant dense<0.000000e+00> : vector<34xf32>
    %396 = vector.multi_reduction <add>, %395, %cst_151 [1] : vector<34x32xf32> to vector<34xf32>
    %397 = vector.shape_cast %396 : vector<34xf32> to vector<34x1xf32>
    %cst_152 = arith.constant 3.200000e+01 : f32
    %398 = vector.broadcast %cst_152 : f32 to vector<34x1xf32>
    %399 = arith.divf %397, %398 : vector<34x1xf32>
    %cst_153 = arith.constant 9.99999997E-7 : f32
    %400 = vector.broadcast %cst_153 : f32 to vector<34x1xf32>
    %401 = arith.addf %399, %400 : vector<34x1xf32>
    %402 = math.rsqrt %401 : vector<34x1xf32>
    %403 = vector.broadcast %402 : vector<34x1xf32> to vector<34x32xf32>
    %404 = arith.mulf %394, %403 : vector<34x32xf32>
    %405 = vector.broadcast %265 : vector<1x32xf32> to vector<34x32xf32>
    %406 = arith.mulf %404, %405 : vector<34x32xf32>
    %407 = vector.broadcast %267 : vector<1x32xf32> to vector<34x32xf32>
    %408 = arith.addf %406, %407 : vector<34x32xf32>
    %c1_154 = arith.constant 1 : index
    %c0_155 = arith.constant 0 : index
    %c0_156 = arith.constant 0 : index
    %409 = vector.load %arg6[%c1_154, %c0_155, %c0_156] : memref<2x32x128xbf16, #tpu.memory_space<vmem>>, vector<1x32x128xbf16>
    %410 = vector.shape_cast %409 : vector<1x32x128xbf16> to vector<32x128xbf16>
    %411 = arith.truncf %408 : vector<34x32xf32> to vector<34x32xbf16>
    %cst_157 = arith.constant dense<0.000000e+00> : vector<34x128xf32>
    %412 = tpu.matmul %411, %410, %cst_157 {dimension_numbers = #tpu.dot_dimension_numbers<[1], [0], [0], [1], [0, 0, 1, 1], [], []>} : vector<34x32xbf16>, vector<32x128xbf16>, vector<34x128xf32> -> vector<34x128xf32>
    %413 = vector.broadcast %273 : vector<1x128xf32> to vector<34x128xf32>
    %414 = arith.addf %412, %413 : vector<34x128xf32>
    %cst_158 = arith.constant 5.000000e-01 : f32
    %415 = vector.broadcast %cst_158 : f32 to vector<34x128xf32>
    %416 = arith.mulf %415, %414 : vector<34x128xf32>
    %cst_159 = arith.constant 4.471500e-02 : f32
    %417 = vector.broadcast %cst_159 : f32 to vector<34x128xf32>
    %418 = arith.mulf %417, %414 : vector<34x128xf32>
    %419 = arith.mulf %418, %414 : vector<34x128xf32>
    %420 = arith.mulf %419, %414 : vector<34x128xf32>
    %421 = arith.addf %414, %420 : vector<34x128xf32>
    %cst_160 = arith.constant 0.797884583 : f32
    %422 = vector.broadcast %cst_160 : f32 to vector<34x128xf32>
    %423 = arith.mulf %422, %421 : vector<34x128xf32>
    %424 = math.tanh %423 : vector<34x128xf32>
    %cst_161 = arith.constant 1.000000e+00 : f32
    %425 = vector.broadcast %cst_161 : f32 to vector<34x128xf32>
    %426 = arith.addf %425, %424 : vector<34x128xf32>
    %427 = arith.mulf %416, %426 : vector<34x128xf32>
    %c1_162 = arith.constant 1 : index
    %c0_163 = arith.constant 0 : index
    %c0_164 = arith.constant 0 : index
    %428 = vector.load %arg7[%c1_162, %c0_163, %c0_164] : memref<2x128x32xbf16, #tpu.memory_space<vmem>>, vector<1x128x32xbf16>
    %429 = vector.shape_cast %428 : vector<1x128x32xbf16> to vector<128x32xbf16>
    %430 = arith.truncf %427 : vector<34x128xf32> to vector<34x128xbf16>
    %cst_165 = arith.constant dense<0.000000e+00> : vector<34x32xf32>
    %431 = tpu.matmul %430, %429, %cst_165 {dimension_numbers = #tpu.dot_dimension_numbers<[1], [0], [0], [1], [0, 0, 1, 1], [], []>} : vector<34x128xbf16>, vector<128x32xbf16>, vector<34x32xf32> -> vector<34x32xf32>
    %432 = arith.addf %388, %431 : vector<34x32xf32>
    %433 = vector.broadcast %269 : vector<1x32xf32> to vector<34x32xf32>
    %434 = arith.addf %432, %433 : vector<34x32xf32>
    %435 = vector.extract_strided_slice %434 {offsets = [0, 0], sizes = [1, 32], strides = [1, 1]} : vector<34x32xf32> to vector<1x32xf32>
    %436 = vector.extract_strided_slice %434 {offsets = [17, 0], sizes = [1, 32], strides = [1, 1]} : vector<34x32xf32> to vector<1x32xf32>
    %cst_166 = arith.constant 0.000000e+00 : f32
    %437 = vector.broadcast %cst_166 : f32 to vector<6x32xf32>
    %438 = tpu.concatenate %435, %436, %437 in 0 : vector<1x32xf32>, vector<1x32xf32>, vector<6x32xf32> -> vector<8x32xf32>
    %cst_167 = arith.constant dense<0.000000e+00> : vector<8xf32>
    %439 = vector.multi_reduction <add>, %438, %cst_167 [1] : vector<8x32xf32> to vector<8xf32>
    %440 = vector.shape_cast %439 : vector<8xf32> to vector<8x1xf32>
    %cst_168 = arith.constant 3.200000e+01 : f32
    %441 = vector.broadcast %cst_168 : f32 to vector<8x1xf32>
    %442 = arith.divf %440, %441 : vector<8x1xf32>
    %443 = vector.broadcast %442 : vector<8x1xf32> to vector<8x32xf32>
    %444 = arith.subf %438, %443 : vector<8x32xf32>
    %445 = arith.mulf %444, %444 : vector<8x32xf32>
    %cst_169 = arith.constant dense<0.000000e+00> : vector<8xf32>
    %446 = vector.multi_reduction <add>, %445, %cst_169 [1] : vector<8x32xf32> to vector<8xf32>
    %447 = vector.shape_cast %446 : vector<8xf32> to vector<8x1xf32>
    %cst_170 = arith.constant 3.200000e+01 : f32
    %448 = vector.broadcast %cst_170 : f32 to vector<8x1xf32>
    %449 = arith.divf %447, %448 : vector<8x1xf32>
    %cst_171 = arith.constant 9.99999997E-7 : f32
    %450 = vector.broadcast %cst_171 : f32 to vector<8x1xf32>
    %451 = arith.addf %449, %450 : vector<8x1xf32>
    %452 = math.rsqrt %451 : vector<8x1xf32>
    %453 = vector.broadcast %452 : vector<8x1xf32> to vector<8x32xf32>
    %454 = arith.mulf %444, %453 : vector<8x32xf32>
    %c0_172 = arith.constant 0 : index
    %c0_173 = arith.constant 0 : index
    %455 = vector.load %arg10[%c0_172, %c0_173] : memref<32x128xbf16, #tpu.memory_space<vmem>>, vector<32x128xbf16>
    %456 = arith.truncf %454 : vector<8x32xf32> to vector<8x32xbf16>
    %cst_174 = arith.constant dense<0.000000e+00> : vector<8x128xf32>
    %457 = tpu.matmul %456, %455, %cst_174 {dimension_numbers = #tpu.dot_dimension_numbers<[1], [0], [0], [1], [0, 0, 1, 1], [], []>} : vector<8x32xbf16>, vector<32x128xbf16>, vector<8x128xf32> -> vector<8x128xf32>
    %c0_175 = arith.constant 0 : index
    %c0_176 = arith.constant 0 : index
    %458 = vector.load %arg11[%c0_175, %c0_176] : memref<1x128xf32, #tpu.memory_space<vmem>>, vector<1x128xf32>
    %459 = vector.broadcast %458 : vector<1x128xf32> to vector<8x128xf32>
    %460 = arith.addf %457, %459 : vector<8x128xf32>
    %c0_177 = arith.constant 0 : index
    %c0_178 = arith.constant 0 : index
    %461 = vector.load %arg12[%c0_177, %c0_178] : memref<8x128xf32, #tpu.memory_space<vmem>>, vector<8x128xf32>
    tpu.vector_store %arg12[%c0_177, %c0_178], %460 {strides = array<i32>} : memref<8x128xf32, #tpu.memory_space<vmem>>, vector<8x128xf32>,
    return
  }
}

</mosaic_0001>

<bundles_post_ra>
// kernel: vit_decoder_forward.1
= control target key start
LH: loop header
LB: loop body
LE: loop exit
PB: predicated region body
PF: predicated region fallthrough
CT: control target
= control target key end

     0   :  { %v4405_v0 = vmov 0.0   ;;  %vm4406_vm0 = vmmov 0   ;;  %vm71_vm1 = vcmask 261120   ;;  %vm204_vm2 = vcmask 254976   ;;  %s4407_s15 = smov 96   ;;  %s5767_s3 = inlined_call_operand.vmem [shape: bf16[32,32], index: 3, kind: input, shape index: {}]   ;;  %s5768_s0 = inlined_call_operand.vmem [shape: f32[34,32], index: 0, kind: input, shape index: {}]   ;;  %s5769_s1 = inlined_call_operand.vmem [shape: f32[34,32], index: 1, kind: input, shape index: {}]   ;;  %s5770_s4 = inlined_call_operand.vmem [shape: bf16[2,32,128], index: 4, kind: input, shape index: {}]   ;;  %s5771_s8 = inlined_call_operand.vmem [shape: f32[2,6,32], index: 8, kind: input, shape index: {}]   ;;  %s5772_s9 = inlined_call_operand.vmem [shape: f32[2,2,128], index: 9, kind: input, shape index: {}]   ;;  %s5773_s2 = inlined_call_operand.vmem [shape: f32[34,34], index: 2, kind: input, shape index: {}]   ;;  %s5774_s5 = inlined_call_operand.vmem [shape: bf16[2,128,32], index: 5, kind: input, shape index: {}]   ;;  %s5775_s6 = inlined_call_operand.vmem [shape: bf16[2,32,128], index: 6, kind: input, shape index: {}]   ;;  %s5776_s7 = inlined_call_operand.vmem [shape: bf16[2,128,32], index: 7, kind: input, shape index: {}]   ;;  %s5777_s10 = inlined_call_operand.vmem [shape: bf16[32,128], index: 10, kind: input, shape index: {}]   ;;  %s5778_s11 = inlined_call_operand.vmem [shape: f32[1,128], index: 11, kind: input, shape index: {}]   ;;  %s5779_s12 = inlined_call_operand.vmem [shape: f32[8,128], index: 12, kind: output, shape index: {}]  }
   0x1   :  { %3655 = vmatprep.subr.bf16.mxu0 %v4405_v0  ;;  %v4134_v1 = vld [vmem:[%s5767_s3 + $0x8] sm:$0xff]   ;;  %3659 = vmatprep.mubr.msk.bf16.mxu0 %vm4406_vm0, %v4405_v0  ;;  %v4135_v2 = vld [vmem:[%s5767_s3] sm:$0xff]   ;;  %v44_v6 = vld [vmem:[%s5768_s0 + $0x10] sm:$0xff]  ;;  %vm691_vm13 = vcmask 1040384   ;;  %vm490_vm14 = vcmask 277504   ;;  %vm503_vm15 = vcmask 271360  }
   0x2   :  { %4127 = vmatprep.subr.bf16.mxu1 %v4405_v0  ;;  %3679 = vmatprep.mubr.msk.bf16.mxu1 %vm4406_vm0, %v4405_v0  ;;  %v42_v3 = vld [vmem:[%s5768_s0] sm:$0xff]  ;;  %v43_v4 = vld [vmem:[%s5768_s0 + $0x8] sm:$0xff]  ;;  %v45_v7 = vld [vmem:[%s5768_s0 + $0x18] sm:$0xff] }
   0x3   :  { %3656 = vmatpush3.bf16.msra.mxu0 %v4134_v1  ;;  %v51_v5 = vpack.c.bf16 %v43_v4, %v42_v3  ;;  %v52_v8 = vpack.c.bf16 %v45_v7, %v44_v6  ;;  %v46_v9 = vld [vmem:[%s5768_s0 + $0x20] sm:$0x3]  ;;  %v55_v15 = vld [vmem:[%s5769_s1 + $0x8] sm:$0xff]  ;;  %v56_v20 = vld [vmem:[%s5769_s1 + $0x10] sm:$0xff] }
   0x4   :  { %3657 = vmatprep.subr.bf16.mxu0 %v4405_v0  ;;  %v53_v10 = vpack.c.bf16 %v46_v9, %v46_v9  ;;  %v54_v11 = vld [vmem:[%s5769_s1] sm:$0xff]  ;;  %v57_v25 = vld [vmem:[%s5769_s1 + $0x18] sm:$0xff]  ;;  %v4136_v63 = vld [vmem:[%s5770_s4 + $0x8] sm:$0xff]  }
   0x5   :  { %v58_v30 = vld [vmem:[%s5769_s1 + $0x20] sm:$0x3]  ;;  %4129 = vmatpush3.bf16.msra.mxu1 %v4136_v63 }
   0x6   :  { %v4137_v1 = vld [vmem:[%s5770_s4] sm:$0xff]   ;;  %4128 = vmatprep.subr.bf16.mxu1 %v4405_v0 }
   0x7   :  { %3658 = vmatpush3.bf16.msra.mxu0 %v4135_v2 }
   0x8   :  { %3671 = vmatprep.subr.bf16.mxu0 %v4405_v0 }
   0x9   :  { %4130 = vmatpush3.bf16.msra.mxu1 %v4137_v1 }
   0xa   :  { %3660 = vmatmul.mubr.msk.bf16.vlgmr.msra.gmra.mxu0 %vm71_vm1, %v51_v5  ;;  %3703 = vmatprep.subr.bf16.mxu1 %v4405_v0 }
   0xb   :  { %3663 = vmatprep.mubr.msk.bf16.mxu0 %vm4406_vm0, %v4405_v0  ;;  %3672 = vmatpush3.bf16.msra.mxu0 %v4136_v63 }
   0xc   :  { %3673 = vmatprep.subr.bf16.mxu0 %v4405_v0 }
   0xf   :  { %3674 = vmatpush3.bf16.msra.mxu0 %v4137_v1 }
  0x10   :  { %3687 = vmatprep.subr.bf16.mxu0 %v4405_v0 }
  0x12   :  { %3664 = vmatmul.mubr.msk.bf16.gmra.mxu0 %vm71_vm1, %v52_v8 }
  0x13   :  { %3667 = vmatprep.mubr.msk.bf16.mxu0 %vm4406_vm0, %v4405_v0 }
  0x1a   :  { %3668 = vmatmul.mubr.msk.bf16.gmra.mxu0 %vm71_vm1, %v53_v10 }
  0x1b   :  { %3675 = vmatprep.mubr.msk.bf16.mxu0 %vm4406_vm0, %v4405_v0 }
  0xca   :  { %v115_v12 = vpop.f32.mrf.mxu0 }
  0xcb   :  { %v4514_v13 = vadd.f32 %v115_v12, %v54_v11 }
  0xcc   :  { %v3661_v14 = vpop.f32.mrf.mxu0 }
  0xcd   :  { %v192_v16 = vsel %vm71_vm1, %v4514_v13, 0.0 }
  0xce   :  { %193 = vadd.xlane.f32.xlu0 %v192_v16  ;;  %v118_v17 = vpop.f32.mrf.mxu0 }
  0xcf   :  { %v4521_v18 = vadd.f32 %v118_v17, %v55_v15 }
  0xd0   :  { %v3662_v19 = vpop.f32.mrf.mxu0 }
  0xd1   :  { %v195_v21 = vsel %vm71_vm1, %v4521_v18, 0.0 }
  0xd2   :  { %196 = vadd.xlane.f32.xlu0 %v195_v21  ;;  %v123_v22 = vpop.f32.mrf.mxu0  ;;  %v3327_v21 = vld [vmem:[%s5771_s8] ss:$0 sm:$0xff] }
  0xd3   :  { %v4528_v23 = vadd.f32 %v123_v22, %v56_v20 }
  0xd4   :  { %v3665_v24 = vpop.f32.mrf.mxu0 }
  0xd5   :  { %v198_v26 = vsel %vm71_vm1, %v4528_v23, 0.0 }
  0xd6   :  { %199 = vadd.xlane.f32.xlu1 %v198_v26  ;;  %v126_v27 = vpop.f32.mrf.mxu0  ;;  %v3328_v26 = vld [vmem:[%s5771_s8 + $0x1] ss:$0 sm:$0xff] }
  0xd7   :  { %v4535_v28 = vadd.f32 %v126_v27, %v57_v25 }
  0xd8   :  { %v3666_v29 = vpop.f32.mrf.mxu0 }
  0xd9   :  { %v201_v31 = vsel %vm71_vm1, %v4535_v28, 0.0 }
  0xda   :  { %202 = vadd.xlane.f32.xlu1 %v201_v31  ;;  %v131_v32 = vpop.f32.mrf.mxu0 }
  0xdb   :  { %v4542_v33 = vadd.f32 %v131_v32, %v58_v30 }
  0xdc   :  { %v3669_v34 = vpop.f32.mrf.mxu0 }
  0xdd   :  { %v205_v35 = vsel %vm204_vm2, %v4542_v33, 0.0 }
  0xde   :  { %206 = vadd.xlane.f32.xlu0 %v205_v35  ;;  %v134_v36 = vpop.f32.mrf.mxu0 }
  0xe0   :  { %v3670_v37 = vpop.f32.mrf.mxu0 }
 0x157   :  { %v194_v38 = vpop.xlane.xlu0 %193 }
 0x158   :  { %v209_v39 = vmul.f32 0.03125, %v194_v38 }
 0x15a   :  { %v214_v40 = vsub.f32 %v4514_v13, %v209_v39 }
 0x15b   :  { %v197_v41 = vpop.xlane.xlu0 %196 }
 0x15c   :  { %v210_v42 = vmul.f32 0.03125, %v197_v41  ;;  %v219_v43 = vmul.f32 %v214_v40, %v214_v40 }
 0x15e   :  { %v215_v44 = vsub.f32 %v4521_v18, %v210_v42  ;;  %v224_v45 = vsel %vm71_vm1, %v219_v43, 0.0 }
 0x15f   :  { %v200_v46 = vpop.xlane.xlu1 %199  ;;  %225 = vadd.xlane.f32.xlu1 %v224_v45 }
 0x160   :  { %v211_v47 = vmul.f32 0.03125, %v200_v46  ;;  %v220_v48 = vmul.f32 %v215_v44, %v215_v44 }
 0x162   :  { %v216_v49 = vsub.f32 %v4528_v23, %v211_v47  ;;  %v227_v50 = vsel %vm71_vm1, %v220_v48, 0.0  ;;  %v3329_v47 = vld [vmem:[%s5772_s9] ss:$0 sm:$0xff] }
 0x163   :  { %v203_v51 = vpop.xlane.xlu1 %202  ;;  %228 = vadd.xlane.f32.xlu0 %v227_v50 }
 0x164   :  { %v212_v52 = vmul.f32 0.03125, %v203_v51  ;;  %v221_v53 = vmul.f32 %v216_v49, %v216_v49 }
 0x166   :  { %v217_v54 = vsub.f32 %v4535_v28, %v212_v52  ;;  %v230_v55 = vsel %vm71_vm1, %v221_v53, 0.0 }
 0x167   :  { %231 = vadd.xlane.f32.xlu1 %v230_v55  ;;  %v207_v56 = vpop.xlane.xlu0 %206 }
 0x168   :  { %v213_v57 = vmul.f32 0.03125, %v207_v56  ;;  %v222_v58 = vmul.f32 %v217_v54, %v217_v54 }
 0x16a   :  { %v218_v59 = vsub.f32 %v4542_v33, %v213_v57  ;;  %v233_v60 = vsel %vm71_vm1, %v222_v58, 0.0 }
 0x16b   :  { %234 = vadd.xlane.f32.xlu0 %v233_v60 }
 0x16c   :  { %v223_v61 = vmul.f32 %v218_v59, %v218_v59 }
 0x16e   :  { %v236_v62 = vsel %vm204_vm2, %v223_v61, 0.0 }
 0x16f   :  { %237 = vadd.xlane.f32.xlu1 %v236_v62 }
 0x1e8   :  { %v226_v2 = vpop.xlane.xlu1 %225 }
 0x1e9   :  { %v239_v3 = vmul.f32 0.03125, %v226_v2 }
 0x1eb   :  { %v244_v4 = vadd.f32 1e-06, %v239_v3 }
 0x1ec   :  { %v229_v5 = vpop.xlane.xlu0 %228 }
 0x1ed   :  { %4178 = vrsqrt.f32 %v244_v4  ;;  %v240_v6 = vmul.f32 0.03125, %v229_v5 }
 0x1ef   :  { %v245_v7 = vadd.f32 1e-06, %v240_v6 }
 0x1f0   :  { %v232_v8 = vpop.xlane.xlu1 %231 }
 0x1f1   :  { %4180 = vrsqrt.f32 %v245_v7  ;;  %v241_v9 = vmul.f32 0.03125, %v232_v8 }
 0x1f3   :  { %v246_v10 = vadd.f32 1e-06, %v241_v9  ;;  %v142_v9 = vlaneseq }
 0x1f4   :  { %v235_v11 = vpop.xlane.xlu0 %234 }
 0x1f5   :  { %4182 = vrsqrt.f32 %v246_v10  ;;  %v242_v12 = vmul.f32 0.03125, %v235_v11  ;;  %v4593_v11 = vand.u32 127, %v142_v9 }
 0x1f7   :  { %v247_v14 = vadd.f32 1e-06, %v242_v12  ;;  %vm149_vm3 = vcmp.ge.s32.totalorder %v4593_v11, 8  ;;  %vm150_vm4 = vcmp.lt.s32.totalorder %v4593_v11, 16  ;;  %vm169_vm5 = vcmp.ge.s32.totalorder %v4593_v11, 72 }
 0x1f8   :  { %v238_v15 = vpop.xlane.xlu1 %237  ;;  %vm170_vm6 = vcmp.lt.s32.totalorder %v4593_v11, 80  ;;  %vm164_vm7 = vcmp.ge.s32.totalorder %v4593_v11, 64  ;;  %vm165_vm8 = vcmp.lt.s32.totalorder %v4593_v11, 72  ;;  %vm151_vm9 = vmand %vm149_vm3, %vm150_vm4  ;;  %vm145_vm10 = vcmp.lt.s32.totalorder %v4593_v11, 8 }
 0x1f9   :  { %4184 = vrsqrt.f32 %v247_v14  ;;  %v243_v16 = vmul.f32 0.03125, %v238_v15  ;;  %vm171_vm11 = vmand %vm169_vm5, %vm170_vm6  ;;  %vm154_vm3 = vcmp.ge.s32.totalorder %v4593_v11, 16  ;;  %vm155_vm4 = vcmp.lt.s32.totalorder %v4593_v11, 24 }
 0x1fa   :  { %v4179_v17 = vpop.eup %4178  ;;  %vm166_vm12 = vmand %vm164_vm7, %vm165_vm8  ;;  %vm159_vm6 = vcmp.ge.s32.totalorder %v4593_v11, 24  ;;  %vm160_vm7 = vcmp.lt.s32.totalorder %v4593_v11, 32 }
 0x1fb   :  { %v254_v19 = vmul.f32 %v4179_v17, %v214_v40  ;;  %v248_v20 = vadd.f32 1e-06, %v243_v16  ;;  %v147_v16 = vsel %vm145_vm10, 1.0, %v4405_v0  ;;  %vm156_vm5 = vmand %vm154_vm3, %vm155_vm4  ;;  %vm175_vm10 = vcmp.lt.s32.totalorder %v4593_v11, 88 }
 0x1fc   :  { %vm161_vm8 = vmand %vm159_vm6, %vm160_vm7  ;;  %vm180_vm3 = vcmp.lt.s32.totalorder %v4593_v11, 96 }
 0x1fd   :  { %4186 = vrsqrt.f32 %v248_v20  ;;  %v263_v24 = vmul.f32 %v3327_v21, %v254_v19  ;;  %v152_v19 = vsel %vm151_vm9, 1.0, %v4405_v0  ;;  %v172_v20 = vsel %vm171_vm11, 1.0, %v4405_v0 }
 0x1fe   :  { %v4181_v22 = vpop.eup %4180  ;;  %vm174_vm9 = vcmp.ge.s32.totalorder %v4593_v11, 80 }
 0x1ff   :  { %v255_v25 = vmul.f32 %v4181_v22, %v215_v44  ;;  %v272_v30 = vadd.f32 %v3328_v26, %v263_v24  ;;  %v4612_v24 = vpack.c.bf16 %v147_v16, %v147_v16  ;;  %vm176_vm11 = vmand %vm174_vm9, %vm175_vm10 }
 0x201   :  { %v264_v27 = vmul.f32 %v3327_v21, %v255_v25  ;;  %v4616_v25 = vpack.c.bf16 %v152_v19, %v152_v19 }
 0x202   :  { %v4183_v29 = vpop.eup %4182 }
 0x203   :  { %v273_v31 = vadd.f32 %v3328_v26, %v264_v27  ;;  %v256_v32 = vmul.f32 %v4183_v29, %v216_v49 }
 0x205   :  { %v281_v34 = vpack.c.bf16 %v273_v31, %v272_v30  ;;  %v265_v37 = vmul.f32 %v3327_v21, %v256_v32 }
 0x206   :  { %v4185_v35 = vpop.eup %4184 }
 0x207   :  { %3676 = vmatmul.mubr.msk.bf16.vlgmr.msra.gmra.mxu0 %vm71_vm1, %v281_v34  ;;  %v257_v36 = vmul.f32 %v4185_v35, %v217_v54  ;;  %v274_v40 = vadd.f32 %v3328_v26, %v265_v37 }
 0x208   :  { %3691 = vmatprep.mubr.msk.bf16.mxu0 %vm4406_vm0, %v4405_v0 }
 0x209   :  { %v266_v38 = vmul.f32 %v3327_v21, %v257_v36 }
 0x20a   :  { %v4187_v39 = vpop.eup %4186 }
 0x20b   :  { %v275_v41 = vadd.f32 %v3328_v26, %v266_v38  ;;  %v258_v42 = vmul.f32 %v4187_v39, %v218_v59 }
 0x20d   :  { %v282_v43 = vpack.c.bf16 %v275_v41, %v274_v40  ;;  %v267_v44 = vmul.f32 %v3327_v21, %v258_v42  ;;  %v167_v21 = vsel %vm166_vm12, 1.0, %v4405_v0  ;;  %vm179_vm12 = vcmp.ge.s32.totalorder %v4593_v11, 88 }
 0x20e   :  { %v4620_v27 = vpack.c.bf16 %v167_v21, %v167_v21  ;;  %vm181_vm4 = vmand %vm179_vm12, %vm180_vm3 }
 0x20f   :  { %3680 = vmatmul.mubr.msk.bf16.vlgmr.msra.gmra.mxu1 %vm71_vm1, %v282_v43  ;;  %v276_v45 = vadd.f32 %v3328_v26, %v267_v44  ;;  %v4618_v26 = vpack.c.bf16 %v172_v20, %v172_v20 }
 0x210   :  { %3683 = vmatprep.mubr.msk.bf16.mxu1 %vm4406_vm0, %v4405_v0 }
 0x211   :  { %v283_v46 = vpack.c.bf16 %v276_v45, %v276_v45  ;;  %v4681_v45 = vld [vmem:[%s5773_s2] sm:$0xff] }
 0x217   :  { %3684 = vmatmul.mubr.msk.bf16.gmra.mxu1 %vm71_vm1, %v283_v46 }
 0x218   :  { %3707 = vmatprep.mubr.msk.bf16.mxu1 %vm4406_vm0, %v4405_v0 }
 0x2c7   :  { %v343_v48 = vpop.f32.mrf.mxu0 }
 0x2c8   :  { %v344_v49 = vadd.f32 %v3329_v47, %v343_v48 }
 0x2c9   :  { %v3677_v50 = vpop.f32.mrf.mxu0 }
 0x2ca   :  { %373 = vrot.lane.b32.xlu0 %v344_v49, %s4407_s15 }
 0x2cb   :  { %v346_v51 = vpop.f32.mrf.mxu0 }
 0x2cc   :  { %v347_v52 = vadd.f32 %v3329_v47, %v346_v51  ;;  %v4689_v51 = vld [vmem:[%s5773_s2 + $0x8] sm:$0xff] }
 0x2cd   :  { %v3678_v53 = vpop.f32.mrf.mxu0 }
 0x2ce   :  { %v4585_v54 = vpack.c.bf16 %v347_v52, %v344_v49  ;;  %375 = vrot.lane.b32.xlu1 %v347_v52, %s4407_s15 }
 0x2cf   :  { %v351_v55 = vpop.f32.mrf.mxu1 }
 0x2d0   :  { %v352_v56 = vadd.f32 %v3329_v47, %v351_v55  ;;  %v422_v32 = vmul.bf16 %v4585_v54, %v4612_v24  ;;  %v553_v34 = vmul.bf16 %v4585_v54, %v4616_v25  ;;  %v679_v41 = vmul.bf16 %v4585_v54, %v4618_v26 }
 0x2d1   :  { %v3681_v57 = vpop.f32.mrf.mxu1  ;;  %v550_v42 = vmul.bf16 %v4585_v54, %v4620_v27 }
 0x2d2   :  { %377 = vrot.lane.b32.xlu1 %v352_v56, %s4407_s15 }
 0x2d3   :  { %v354_v58 = vpop.f32.mrf.mxu1 }
 0x2d4   :  { %v355_v59 = vadd.f32 %v3329_v47, %v354_v58 }
 0x2d5   :  { %v3682_v60 = vpop.f32.mrf.mxu1 }
 0x2d6   :  { %v4589_v61 = vpack.c.bf16 %v355_v59, %v352_v56  ;;  %379 = vrot.lane.b32.xlu1 %v355_v59, %s4407_s15  ;;  %v4698_v59 = vld [vmem:[%s5773_s2 + $0x10] sm:$0xff] }
 0x2d7   :  { %v359_v62 = vpop.f32.mrf.mxu1 }
 0x2d8   :  { %v360_v63 = vadd.f32 %v3329_v47, %v359_v62  ;;  %v680_v37 = vmul.bf16 %v4589_v61, %v4618_v26  ;;  %v551_v38 = vmul.bf16 %v4589_v61, %v4620_v27  ;;  %v423_v39 = vmul.bf16 %v4589_v61, %v4612_v24 }
 0x2d9   :  { %v3685_v1 = vpop.f32.mrf.mxu1  ;;  %v554_v40 = vmul.bf16 %v4589_v61, %v4616_v25 }
 0x2da   :  { %381 = vrot.lane.b32.xlu0 %v360_v63, %s4407_s15  ;;  %v4608_v22 = vpack.c.bf16 %v360_v63, %v360_v63 }
 0x2db   :  { %v362_v2 = vpop.f32.mrf.mxu1 }
 0x2dc   :  { %v681_v30 = vmul.bf16 %v4608_v22, %v4618_v26  ;;  %v552_v31 = vmul.bf16 %v4608_v22, %v4620_v27  ;;  %v424_v43 = vmul.bf16 %v4608_v22, %v4612_v24  ;;  %v555_v44 = vmul.bf16 %v4608_v22, %v4616_v25 }
 0x2dd   :  { %v3686_v3 = vpop.f32.mrf.mxu1 }
 0x2de   :  { %v693_v35 = vsel %vm691_vm13, %v681_v30, 0  ;;  %v761_v36 = vsel %vm691_vm13, %v552_v31, 0 }
 0x33c   :  { %v374_v4 = vpop.permute.xlu0 %373 }
 0x33d   :  { %388 = vxpose.xlu1.b32.start [1/5] (short) (narrow) %v374_v4, 32  ;;  %v4707_v4 = vld [vmem:[%s5773_s2 + $0x18] sm:$0xff] }
 0x340   :  { %v376_v5 = vpop.permute.xlu1 %375 }
 0x341   :  { %389 = vxpose.xlu1.b32.cont [2/5] (short) (narrow) %v376_v5, 32 }
 0x344   :  { %v378_v6 = vpop.permute.xlu1 %377 }
 0x345   :  { %390 = vxpose.xlu1.b32.cont [3/5] (short) (narrow) %v378_v6, 32 }
 0x348   :  { %v380_v7 = vpop.permute.xlu1 %379 }
 0x349   :  { %391 = vxpose.xlu1.b32.cont [4/5] (short) (narrow) %v380_v7, 32 }
 0x34c   :  { %v382_v8 = vpop.permute.xlu0 %381 }
 0x34d   :  { %392 = vxpose.xlu1.b32.end [5/5] (short) (narrow) %v382_v8, 32 }
 0x3b9   :  { %v404_v10 = vpop.trf.xlu1 }
 0x3bd   :  { %v405_v12 = vpop.trf.xlu1 }
 0x3be   :  { %v4622_v29 = vpack.c.bf16 %v405_v12, %v404_v10  ;;  %v4714_v12 = vld [vmem:[%s5773_s2 + $0x20] sm:$0x3] }
 0x3c1   :  { %v406_v14 = vpop.trf.xlu1 }
 0x3c5   :  { %v407_v15 = vpop.trf.xlu1 }
 0x3c6   :  { %v4603_v17 = vpack.c.bf16 %v407_v15, %v406_v14 }
 0x3c8   :  { %3688 = vmatpush3.bf16.msra.mxu0 %v4603_v17  ;;  %3704 = vmatpush3.bf16.msra.mxu1 %v4603_v17 }
 0x3c9   :  { %3689 = vmatprep.subr.bf16.mxu0 %v4405_v0  ;;  %3705 = vmatprep.subr.bf16.mxu1 %v4405_v0 }
 0x3cc   :  { %3690 = vmatpush3.bf16.msra.mxu0 %v4622_v29  ;;  %3706 = vmatpush3.bf16.msra.mxu1 %v4622_v29 }
 0x3cd   :  { %3719 = vmatprep.subr.bf16.mxu0 %v4405_v0  ;;  %3737 = vmatprep.subr.bf16.mxu1 %v4405_v0 }
 0x3cf   :  { %3692 = vmatmul.mubr.msk.bf16.vlgmr.msra.gmra.mxu0 %vm71_vm1, %v422_v32  ;;  %3708 = vmatmul.mubr.msk.bf16.vlgmr.msra.gmra.mxu1 %vm71_vm1, %v553_v34 }
 0x3d0   :  { %3720 = vmatpush3.bf16.msra.mxu0 %v693_v35  ;;  %3738 = vmatpush3.bf16.msra.mxu1 %v761_v36 }
 0x3d1   :  { %3721 = vmatprep.subr.bf16.mxu0 %v4405_v0  ;;  %3739 = vmatprep.subr.bf16.mxu1 %v4405_v0 }
 0x3d2   :  { %3695 = vmatprep.mubr.msk.bf16.mxu0 %vm4406_vm0, %v4405_v0  ;;  %3711 = vmatprep.mubr.msk.bf16.mxu1 %vm4406_vm0, %v4405_v0 }
 0x3d4   :  { %3722 = vmatpush3.bf16.msra.mxu0 %v680_v37  ;;  %3740 = vmatpush3.bf16.msra.mxu1 %v551_v38 }
 0x3d5   :  { %3723 = vmatprep.subr.bf16.mxu0 %v4405_v0  ;;  %3741 = vmatprep.subr.bf16.mxu1 %v4405_v0 }
 0x3d7   :  { %3696 = vmatmul.mubr.msk.bf16.gmra.mxu0 %vm71_vm1, %v423_v39  ;;  %3712 = vmatmul.mubr.msk.bf16.gmra.mxu1 %vm71_vm1, %v554_v40 }
 0x3d8   :  { %3724 = vmatpush3.bf16.msra.mxu0 %v679_v41  ;;  %3742 = vmatpush3.bf16.msra.mxu1 %v550_v42 }
 0x3d9   :  { %3699 = vmatprep.mubr.msk.bf16.mxu0 %vm4406_vm0, %v4405_v0  ;;  %3715 = vmatprep.mubr.msk.bf16.mxu1 %vm4406_vm0, %v4405_v0 }
 0x3da   :  { %3755 = vmatprep.subr.bf16.mxu0 %v4405_v0  ;;  %3771 = vmatprep.subr.bf16.mxu1 %v4405_v0 }
 0x3df   :  { %3700 = vmatmul.mubr.msk.bf16.gmra.mxu0 %vm71_vm1, %v424_v43  ;;  %3716 = vmatmul.mubr.msk.bf16.gmra.mxu1 %vm71_vm1, %v555_v44 }
 0x3e0   :  { %3725 = vmatprep.mubr.msk.bf16.mxu0 %vm4406_vm0, %v4405_v0  ;;  %3743 = vmatprep.mubr.msk.bf16.mxu1 %vm4406_vm0, %v4405_v0 }
 0x48f   :  { %v4683_v46 = vpop.f32.mrf.mxu0  ;;  %v599_v47 = vpop.f32.mrf.mxu1 }
 0x490   :  { %v600_v48 = vadd.f32 %v599_v47, %v4681_v45 }
 0x491   :  { %v3693_v49 = vpop.f32.mrf.mxu0  ;;  %v3709_v50 = vpop.f32.mrf.mxu1 }
 0x492   :  { %v621_v52 = vsel %vm490_vm14, %v600_v48, -inf }
 0x493   :  { %622 = vmax.xlane.f32.xlu0 %v621_v52  ;;  %v4692_v53 = vpop.f32.mrf.mxu0  ;;  %v602_v55 = vpop.f32.mrf.mxu1 }
 0x494   :  { %v603_v56 = vadd.f32 %v602_v55, %v4689_v51 }
 0x495   :  { %v3694_v57 = vpop.f32.mrf.mxu0  ;;  %v3710_v58 = vpop.f32.mrf.mxu1 }
 0x496   :  { %v624_v60 = vsel %vm490_vm14, %v603_v56, -inf }
 0x497   :  { %625 = vmax.xlane.f32.xlu0 %v624_v60  ;;  %v4701_v62 = vpop.f32.mrf.mxu0  ;;  %v607_v63 = vpop.f32.mrf.mxu1 }
 0x498   :  { %v608_v1 = vadd.f32 %v607_v63, %v4698_v59 }
 0x499   :  { %v3697_v2 = vpop.f32.mrf.mxu0  ;;  %v3713_v3 = vpop.f32.mrf.mxu1 }
 0x49a   :  { %v627_v5 = vsel %vm490_vm14, %v608_v1, -inf }
 0x49b   :  { %628 = vmax.xlane.f32.xlu0 %v627_v5  ;;  %v479_v6 = vpop.f32.mrf.mxu0  ;;  %v610_v7 = vpop.f32.mrf.mxu1 }
 0x49c   :  { %v611_v8 = vadd.f32 %v610_v7, %v4707_v4  ;;  %v4725_v7 = vadd.f32 %v4683_v46, %v4681_v45  ;;  %v4741_v46 = vadd.f32 %v479_v6, %v4707_v4 }
 0x49d   :  { %v3698_v9 = vpop.f32.mrf.mxu0  ;;  %v3714_v10 = vpop.f32.mrf.mxu1 }
 0x49e   :  { %v630_v14 = vsel %vm490_vm14, %v611_v8, -inf  ;;  %v4730_v9 = vadd.f32 %v4692_v53, %v4689_v51  ;;  %v491_v10 = vsel %vm490_vm14, %v4725_v7, -inf }
 0x49f   :  { %631 = vmax.xlane.f32.xlu0 %v630_v14  ;;  %v484_v15 = vpop.f32.mrf.mxu0  ;;  %v615_v16 = vpop.f32.mrf.mxu1  ;;  %v4736_v14 = vadd.f32 %v4701_v62, %v4698_v59 }
 0x4a0   :  { %v616_v19 = vadd.f32 %v615_v16, %v4714_v12  ;;  %v494_v16 = vsel %vm490_vm14, %v4730_v9, -inf  ;;  %v4746_v53 = vadd.f32 %v484_v15, %v4714_v12 }
 0x4a1   :  { %v3701_v20 = vpop.f32.mrf.mxu0  ;;  %v3717_v21 = vpop.f32.mrf.mxu1 }
 0x4a2   :  { %v633_v30 = vsel %vm503_vm15, %v616_v19, -inf  ;;  %v500_v20 = vsel %vm490_vm14, %v4741_v46, -inf  ;;  %v504_v62 = vsel %vm503_vm15, %v4746_v53, -inf }
 0x4a3   :  { %634 = vmax.xlane.f32.xlu0 %v633_v30  ;;  %v487_v31 = vpop.f32.mrf.mxu0  ;;  %v618_v32 = vpop.f32.mrf.mxu1 }
 0x4a5   :  { %v3702_v34 = vpop.f32.mrf.mxu0  ;;  %v3718_v35 = vpop.f32.mrf.mxu1 }
 0x51c   :  { %v623_v36 = vpop.xlane.xlu0 %622 }
 0x51d   :  { %v636_v37 = vsub.f32 %v600_v48, %v623_v36 }
 0x51f   :  { %v641_v38 = vmul.f32 1.442695, %v636_v37 }
 0x520   :  { %v626_v39 = vpop.xlane.xlu0 %625 }
 0x521   :  { %4188 = vpow2.f32 %v641_v38  ;;  %v637_v40 = vsub.f32 %v603_v56, %v626_v39 }
 0x523   :  { %v643_v41 = vmul.f32 1.442695, %v637_v40 }
 0x524   :  { %v629_v42 = vpop.xlane.xlu0 %628 }
 0x525   :  { %4190 = vpow2.f32 %v643_v41  ;;  %v638_v43 = vsub.f32 %v608_v1, %v629_v42 }
 0x527   :  { %v645_v44 = vmul.f32 1.442695, %v638_v43 }
 0x528   :  { %v632_v47 = vpop.xlane.xlu0 %631 }
 0x529   :  { %4192 = vpow2.f32 %v645_v44  ;;  %v639_v49 = vsub.f32 %v611_v8, %v632_v47 }
 0x52b   :  { %v647_v50 = vmul.f32 1.442695, %v639_v49  ;;  %v157_v49 = vsel %vm156_vm5, 1.0, %v4405_v0 }
 0x52c   :  { %v635_v52 = vpop.xlane.xlu0 %634 }
 0x52d   :  { %4194 = vpow2.f32 %v647_v50  ;;  %v640_v55 = vsub.f32 %v616_v19, %v635_v52  ;;  %v497_v19 = vsel %vm490_vm14, %v4736_v14, -inf  ;;  %v4768_v50 = vpack.c.bf16 %v157_v49, %v157_v49 }
 0x52e   :  { %v4189_v57 = vpop.eup %4188 }
 0x52f   :  { %v649_v58 = vmul.f32 1.442695, %v640_v55  ;;  %v651_v48 = vsel %vm490_vm14, %v4189_v57, 0.0  ;;  %v819_v52 = vmul.bf16 %v4585_v54, %v4768_v50  ;;  %v820_v55 = vmul.bf16 %v4589_v61, %v4768_v50 }
 0x530   :  { %652 = vadd.xlane.f32.xlu0 %v651_v48 }
 0x531   :  { %4196 = vpow2.f32 %v649_v58 }
 0x532   :  { %v4191_v60 = vpop.eup %4190 }
 0x533   :  { %v654_v56 = vsel %vm490_vm14, %v4191_v60, 0.0 }
 0x534   :  { %655 = vadd.xlane.f32.xlu0 %v654_v56 }
 0x536   :  { %v4193_v63 = vpop.eup %4192 }
 0x537   :  { %v657_v1 = vsel %vm490_vm14, %v4193_v63, 0.0 }
 0x538   :  { %658 = vadd.xlane.f32.xlu0 %v657_v1 }
 0x53a   :  { %v4195_v2 = vpop.eup %4194 }
 0x53b   :  { %v660_v3 = vsel %vm490_vm14, %v4195_v2, 0.0 }
 0x53c   :  { %661 = vadd.xlane.f32.xlu1 %v660_v3 }
 0x53e   :  { %v4197_v5 = vpop.eup %4196 }
 0x53f   :  { %v663_v8 = vsel %vm503_vm15, %v4197_v5, 0.0 }
 0x540   :  { %664 = vadd.xlane.f32.xlu0 %v663_v8 }
 0x544   :  { %492 = vmax.xlane.f32.xlu0 %v491_v10 }
 0x548   :  { %495 = vmax.xlane.f32.xlu0 %v494_v16 }
 0x54c   :  { %498 = vmax.xlane.f32.xlu0 %v497_v19 }
 0x550   :  { %501 = vmax.xlane.f32.xlu0 %v500_v20 }
 0x554   :  { %505 = vmax.xlane.f32.xlu0 %v504_v62 }
 0x5b9   :  { %v653_v21 = vpop.xlane.xlu0 %652 }
 0x5ba   :  { %4198 = vrcp.f32 %v653_v21 }
 0x5bd   :  { %v656_v30 = vpop.xlane.xlu0 %655 }
 0x5be   :  { %4200 = vrcp.f32 %v656_v30 }
 0x5c1   :  { %v659_v6 = vpop.xlane.xlu0 %658 }
 0x5c2   :  { %4202 = vrcp.f32 %v659_v6 }
 0x5c5   :  { %v662_v31 = vpop.xlane.xlu1 %661 }
 0x5c6   :  { %4204 = vrcp.f32 %v662_v31 }
 0x5c7   :  { %v4199_v32 = vpop.eup %4198 }
 0x5c8   :  { %v671_v35 = vmul.f32 %v4199_v32, %v4189_v57 }
 0x5c9   :  { %v665_v34 = vpop.xlane.xlu0 %664 }
 0x5ca   :  { %4206 = vrcp.f32 %v665_v34 }
 0x5cb   :  { %v4201_v15 = vpop.eup %4200 }
 0x5cc   :  { %v672_v36 = vmul.f32 %v4201_v15, %v4191_v60 }
 0x5cd   :  { %v493_v21 = vpop.xlane.xlu0 %492 }
 0x5ce   :  { %v676_v37 = vpack.c.bf16 %v672_v36, %v671_v35 }
 0x5cf   :  { %v4203_v38 = vpop.eup %4202 }
 0x5d0   :  { %3726 = vmatmul.mubr.msk.bf16.vlgmr.msra.gmra.mxu0 %vm490_vm14, %v676_v37  ;;  %v673_v40 = vmul.f32 %v4203_v38, %v4193_v63 }
 0x5d1   :  { %3756 = vmatpush3.bf16.msra.mxu0 %v4603_v17  ;;  %3729 = vmatprep.mubr.msk.bf16.mxu0 %vm4406_vm0, %v4405_v0  ;;  %v496_v35 = vpop.xlane.xlu0 %495 }
 0x5d2   :  { %3757 = vmatprep.subr.bf16.mxu0 %v4405_v0 }
 0x5d3   :  { %v4205_v39 = vpop.eup %4204 }
 0x5d4   :  { %v674_v41 = vmul.f32 %v4205_v39, %v4195_v2 }
 0x5d5   :  { %3758 = vmatpush3.bf16.msra.mxu0 %v4622_v29 }
 0x5d6   :  { %v677_v42 = vpack.c.bf16 %v674_v41, %v673_v40  ;;  %3789 = vmatprep.subr.bf16.mxu0 %v4405_v0 }
 0x5d7   :  { %v4207_v43 = vpop.eup %4206 }
 0x5d8   :  { %3730 = vmatmul.mubr.msk.bf16.gmra.mxu0 %vm490_vm14, %v677_v42  ;;  %v675_v44 = vmul.f32 %v4207_v43, %v4197_v5  ;;  %v499_v42 = vpop.xlane.xlu0 %498 }
 0x5d9   :  { %3733 = vmatprep.mubr.msk.bf16.mxu0 %vm4406_vm0, %v4405_v0 }
 0x5da   :  { %v678_v47 = vpack.c.bf16 %v675_v44, %v675_v44 }
 0x5e0   :  { %3734 = vmatmul.mubr.msk.bf16.gmra.mxu0 %vm490_vm14, %v678_v47 }
 0x5e1   :  { %3759 = vmatprep.mubr.msk.bf16.mxu0 %vm4406_vm0, %v4405_v0 }
 0x5e8   :  { %3760 = vmatmul.mubr.msk.bf16.vlgmr.msra.gmra.mxu0 %vm71_vm1, %v819_v52 }
 0x5e9   :  { %3790 = vmatpush3.bf16.msra.mxu0 %v4603_v17  ;;  %3763 = vmatprep.mubr.msk.bf16.mxu0 %vm4406_vm0, %v4405_v0  ;;  %v821_v17 = vmul.bf16 %v4608_v22, %v4768_v50 }
 0x5ea   :  { %3791 = vmatprep.subr.bf16.mxu0 %v4405_v0 }
 0x5ed   :  { %3792 = vmatpush3.bf16.msra.mxu0 %v4622_v29  ;;  %v162_v29 = vsel %vm161_vm8, 1.0, %v4405_v0 }
 0x5ee   :  { %3823 = vmatprep.subr.bf16.mxu0 %v4405_v0  ;;  %v4792_v57 = vpack.c.bf16 %v162_v29, %v162_v29 }
 0x5f0   :  { %3764 = vmatmul.mubr.msk.bf16.gmra.mxu0 %vm71_vm1, %v820_v55  ;;  %v1021_v58 = vmul.bf16 %v4585_v54, %v4792_v57  ;;  %v1022_v48 = vmul.bf16 %v4589_v61, %v4792_v57  ;;  %v1023_v60 = vmul.bf16 %v4608_v22, %v4792_v57 }
 0x5f1   :  { %3767 = vmatprep.mubr.msk.bf16.mxu0 %vm4406_vm0, %v4405_v0 }
 0x5f8   :  { %3768 = vmatmul.mubr.msk.bf16.gmra.mxu0 %vm71_vm1, %v821_v17  ;;  %v502_v17 = vpop.xlane.xlu0 %501 }
 0x5f9   :  { %3793 = vmatprep.mubr.msk.bf16.mxu0 %vm4406_vm0, %v4405_v0 }
 0x600   :  { %3794 = vmatmul.mubr.msk.bf16.vlgmr.msra.gmra.mxu0 %vm71_vm1, %v1021_v58  ;;  %v507_v58 = vsub.f32 %v4725_v7, %v493_v21 }
 0x601   :  { %3797 = vmatprep.mubr.msk.bf16.mxu0 %vm4406_vm0, %v4405_v0 }
 0x608   :  { %3798 = vmatmul.mubr.msk.bf16.gmra.mxu0 %vm71_vm1, %v1022_v48 }
 0x609   :  { %3801 = vmatprep.mubr.msk.bf16.mxu0 %vm4406_vm0, %v4405_v0 }
 0x610   :  { %3802 = vmatmul.mubr.msk.bf16.gmra.mxu0 %vm71_vm1, %v1023_v60 }
 0x611   :  { %3839 = vmatprep.mubr.msk.bf16.mxu0 %vm4406_vm0, %v4405_v0 }
 0x690   :  { %v4809_v56 = vpop.f32.mrf.mxu0 }
 0x692   :  { %v3727_v63 = vpop.f32.mrf.mxu0 }
 0x693   :  { %v508_v63 = vsub.f32 %v4730_v9, %v496_v35 }
 0x694   :  { %v4811_v1 = vpop.f32.mrf.mxu0 }
 0x696   :  { %v3728_v2 = vpop.f32.mrf.mxu0 }
 0x698   :  { %v4813_v3 = vpop.f32.mrf.mxu0 }
 0x69a   :  { %v3731_v5 = vpop.f32.mrf.mxu0 }
 0x69b   :  { %v512_v5 = vmul.f32 1.442695, %v507_v58 }
 0x69c   :  { %v4815_v8 = vpop.f32.mrf.mxu0 }
 0x69d   :  { %4208 = vpow2.f32 %v512_v5 }
 0x69e   :  { %v3732_v10 = vpop.f32.mrf.mxu0 }
 0x69f   :  { %v509_v10 = vsub.f32 %v4736_v14, %v499_v42 }
 0x6a0   :  { %v4817_v16 = vpop.f32.mrf.mxu0 }
 0x6a1   :  { %v516_v21 = vmul.f32 1.442695, %v509_v10 }
 0x6a2   :  { %v3735_v19 = vpop.f32.mrf.mxu0 }
 0x6a3   :  { %v506_v19 = vpop.xlane.xlu0 %505 }
 0x6a4   :  { %v748_v20 = vpop.f32.mrf.mxu0 }
 0x6a6   :  { %v3736_v62 = vpop.f32.mrf.mxu0 }
 0x6a8   :  { %v865_v30 = vpop.f32.mrf.mxu0 }
 0x6a9   :  { %v4820_v6 = vadd.f32 %v865_v30, %v4681_v45  ;;  %v514_v30 = vmul.f32 1.442695, %v508_v63 }
 0x6aa   :  { %v3761_v31 = vpop.f32.mrf.mxu0 }
 0x6ab   :  { %v887_v32 = vsel %vm490_vm14, %v4820_v6, -inf  ;;  %v510_v31 = vsub.f32 %v4741_v46, %v502_v17  ;;  %4210 = vpow2.f32 %v514_v30 }
 0x6ac   :  { %888 = vmax.xlane.f32.xlu0 %v887_v32  ;;  %v868_v34 = vpop.f32.mrf.mxu0  ;;  %v511_v32 = vsub.f32 %v4746_v53, %v506_v19  ;;  %4212 = vpow2.f32 %v516_v21 }
 0x6ad   :  { %v4825_v15 = vadd.f32 %v868_v34, %v4689_v51  ;;  %v518_v35 = vmul.f32 1.442695, %v510_v31 }
 0x6ae   :  { %v3762_v36 = vpop.f32.mrf.mxu0 }
 0x6af   :  { %v890_v37 = vsel %vm490_vm14, %v4825_v15, -inf  ;;  %v520_v36 = vmul.f32 1.442695, %v511_v32  ;;  %4214 = vpow2.f32 %v518_v35 }
 0x6b0   :  { %891 = vmax.xlane.f32.xlu0 %v890_v37  ;;  %v873_v38 = vpop.f32.mrf.mxu0 }
 0x6b1   :  { %v4830_v39 = vadd.f32 %v873_v38, %v4698_v59  ;;  %4216 = vpow2.f32 %v520_v36 }
 0x6b2   :  { %v3765_v40 = vpop.f32.mrf.mxu0 }
 0x6b3   :  { %v893_v41 = vsel %vm490_vm14, %v4830_v39, -inf }
 0x6b4   :  { %894 = vmax.xlane.f32.xlu0 %v893_v41  ;;  %v876_v43 = vpop.f32.mrf.mxu0 }
 0x6b5   :  { %v4835_v44 = vadd.f32 %v876_v43, %v4707_v4 }
 0x6b6   :  { %v3766_v47 = vpop.f32.mrf.mxu0 }
 0x6b7   :  { %v896_v49 = vsel %vm490_vm14, %v4835_v44, -inf  ;;  %v4869_v47 = vpop.eup %4208 }
 0x6b8   :  { %897 = vmax.xlane.f32.xlu0 %v896_v49  ;;  %v881_v52 = vpop.f32.mrf.mxu0  ;;  %v4874_v17 = vpop.eup %4210 }
 0x6b9   :  { %v4840_v55 = vadd.f32 %v881_v52, %v4714_v12  ;;  %v4880_v58 = vpop.eup %4212 }
 0x6ba   :  { %v3769_v29 = vpop.f32.mrf.mxu0 }
 0x6bb   :  { %v899_v48 = vsel %vm503_vm15, %v4840_v55, -inf  ;;  %v522_v29 = vsel %vm490_vm14, %v4869_v47, 0.0 }
 0x6bc   :  { %900 = vmax.xlane.f32.xlu1 %v899_v48  ;;  %v884_v60 = vpop.f32.mrf.mxu0  ;;  %v4882_v63 = vpop.eup %4214 }
 0x6bd   :  { %v531_v19 = vsel %vm490_vm14, %v4882_v63, 0.0 }
 0x6be   :  { %v3770_v2 = vpop.f32.mrf.mxu0  ;;  %v4888_v5 = vpop.eup %4216 }
 0x6bf   :  { %v525_v2 = vsel %vm490_vm14, %v4874_v17, 0.0  ;;  %v534_v10 = vsel %vm503_vm15, %v4888_v5, 0.0 }
 0x6c0   :  { %v1067_v20 = vpop.f32.mrf.mxu0 }
 0x6c1   :  { %v4848_v62 = vadd.f32 %v1067_v20, %v4681_v45 }
 0x6c2   :  { %v3795_v7 = vpop.f32.mrf.mxu0 }
 0x6c3   :  { %v1089_v9 = vsel %vm490_vm14, %v4848_v62, -inf }
 0x6c4   :  { %1090 = vmax.xlane.f32.xlu0 %v1089_v9  ;;  %v1070_v34 = vpop.f32.mrf.mxu0 }
 0x6c5   :  { %v4855_v14 = vadd.f32 %v1070_v34, %v4689_v51 }
 0x6c6   :  { %v3796_v45 = vpop.f32.mrf.mxu0 }
 0x6c7   :  { %v1092_v46 = vsel %vm490_vm14, %v4855_v14, -inf }
 0x6c8   :  { %1093 = vmax.xlane.f32.xlu1 %v1092_v46  ;;  %v1075_v37 = vpop.f32.mrf.mxu0 }
 0x6c9   :  { %v4860_v53 = vadd.f32 %v1075_v37, %v4698_v59 }
 0x6ca   :  { %v3799_v38 = vpop.f32.mrf.mxu0 }
 0x6cb   :  { %v1095_v51 = vsel %vm490_vm14, %v4860_v53, -inf }
 0x6cc   :  { %1096 = vmax.xlane.f32.xlu0 %v1095_v51  ;;  %v1078_v40 = vpop.f32.mrf.mxu0 }
 0x6cd   :  { %v4865_v41 = vadd.f32 %v1078_v40, %v4707_v4 }
 0x6ce   :  { %v3800_v42 = vpop.f32.mrf.mxu0 }
 0x6cf   :  { %v1098_v43 = vsel %vm490_vm14, %v4865_v41, -inf }
 0x6d0   :  { %1099 = vmax.xlane.f32.xlu1 %v1098_v43  ;;  %v1083_v59 = vpop.f32.mrf.mxu0 }
 0x6d1   :  { %v4872_v49 = vadd.f32 %v1083_v59, %v4714_v12  ;;  %v528_v12 = vsel %vm490_vm14, %v4880_v58, 0.0 }
 0x6d2   :  { %v3803_v52 = vpop.f32.mrf.mxu0 }
 0x6d3   :  { %v1101_v4 = vsel %vm503_vm15, %v4872_v49, -inf }
 0x6d4   :  { %523 = vadd.xlane.f32.xlu1 %v522_v29  ;;  %1102 = vmax.xlane.f32.xlu0 %v1101_v4  ;;  %v1086_v48 = vpop.f32.mrf.mxu0 }
 0x6d6   :  { %v3804_v60 = vpop.f32.mrf.mxu0 }
 0x6d8   :  { %529 = vadd.xlane.f32.xlu1 %v528_v12  ;;  %526 = vadd.xlane.f32.xlu0 %v525_v2 }
 0x6dc   :  { %535 = vadd.xlane.f32.xlu1 %v534_v10  ;;  %532 = vadd.xlane.f32.xlu0 %v531_v19 }
 0x735   :  { %v889_v20 = vpop.xlane.xlu0 %888 }
 0x736   :  { %v902_v30 = vsub.f32 %v4820_v6, %v889_v20 }
 0x738   :  { %v907_v31 = vmul.f32 1.442695, %v902_v30 }
 0x739   :  { %v892_v7 = vpop.xlane.xlu0 %891 }
 0x73a   :  { %4218 = vpow2.f32 %v907_v31  ;;  %v903_v21 = vsub.f32 %v4825_v15, %v892_v7 }
 0x73c   :  { %v909_v32 = vmul.f32 1.442695, %v903_v21 }
 0x73d   :  { %v895_v9 = vpop.xlane.xlu0 %894 }
 0x73e   :  { %4220 = vpow2.f32 %v909_v32  ;;  %v904_v34 = vsub.f32 %v4830_v39, %v895_v9 }
 0x740   :  { %v911_v35 = vmul.f32 1.442695, %v904_v34 }
 0x741   :  { %v898_v45 = vpop.xlane.xlu0 %897 }
 0x742   :  { %4222 = vpow2.f32 %v911_v35  ;;  %v905_v36 = vsub.f32 %v4835_v44, %v898_v45 }
 0x744   :  { %v913_v46 = vmul.f32 1.442695, %v905_v36 }
 0x745   :  { %v901_v37 = vpop.xlane.xlu1 %900 }
 0x746   :  { %4224 = vpow2.f32 %v913_v46  ;;  %v906_v6 = vsub.f32 %v4840_v55, %v901_v37 }
 0x747   :  { %v4899_v38 = vpop.eup %4218 }
 0x748   :  { %v915_v51 = vmul.f32 1.442695, %v906_v6  ;;  %v917_v15 = vsel %vm490_vm14, %v4899_v38, 0.0 }
 0x749   :  { %918 = vadd.xlane.f32.xlu0 %v917_v15  ;;  %v177_v15 = vsel %vm176_vm11, 1.0, %v4405_v0 }
 0x74a   :  { %4226 = vpow2.f32 %v915_v51 }
 0x74b   :  { %v4903_v40 = vpop.eup %4220 }
 0x74c   :  { %v920_v39 = vsel %vm490_vm14, %v4903_v40, 0.0 }
 0x74d   :  { %v1091_v42 = vpop.xlane.xlu0 %1090  ;;  %921 = vadd.xlane.f32.xlu1 %v920_v39 }
 0x74e   :  { %v1104_v44 = vsub.f32 %v4848_v62, %v1091_v42 }
 0x74f   :  { %v4908_v43 = vpop.eup %4222 }
 0x750   :  { %v1109_v55 = vmul.f32 1.442695, %v1104_v44  ;;  %v923_v59 = vsel %vm490_vm14, %v4908_v43, 0.0 }
 0x751   :  { %v1094_v52 = vpop.xlane.xlu1 %1093  ;;  %924 = vadd.xlane.f32.xlu0 %v923_v59 }
 0x752   :  { %4228 = vpow2.f32 %v1109_v55  ;;  %v1105_v29 = vsub.f32 %v4855_v14, %v1094_v52  ;;  %v4947_v55 = vpack.c.bf16 %v177_v15, %v177_v15 }
 0x753   :  { %v4913_v4 = vpop.eup %4224 }
 0x754   :  { %v1111_v48 = vmul.f32 1.442695, %v1105_v29  ;;  %v926_v60 = vsel %vm490_vm14, %v4913_v4, 0.0 }
 0x755   :  { %v1097_v12 = vpop.xlane.xlu0 %1096  ;;  %927 = vadd.xlane.f32.xlu1 %v926_v60 }
 0x756   :  { %4230 = vpow2.f32 %v1111_v48  ;;  %v1106_v62 = vsub.f32 %v4860_v53, %v1097_v12  ;;  %v947_v48 = vmul.bf16 %v4608_v22, %v4947_v55 }
 0x757   :  { %v4918_v2 = vpop.eup %4226 }
 0x758   :  { %v1113_v10 = vmul.f32 1.442695, %v1106_v62  ;;  %v929_v19 = vsel %vm503_vm15, %v4918_v2, 0.0  ;;  %v958_v62 = vsel %vm691_vm13, %v947_v48, 0 }
 0x759   :  { %v1100_v20 = vpop.xlane.xlu1 %1099  ;;  %930 = vadd.xlane.f32.xlu0 %v929_v19 }
 0x75a   :  { %4232 = vpow2.f32 %v1113_v10  ;;  %v1107_v14 = vsub.f32 %v4865_v41, %v1100_v20 }
 0x75c   :  { %v1115_v30 = vmul.f32 1.442695, %v1107_v14 }
 0x75d   :  { %v1103_v31 = vpop.xlane.xlu0 %1102  ;;  %v524_v7 = vpop.xlane.xlu1 %523 }
 0x75e   :  { %4234 = vpow2.f32 %v1115_v30  ;;  %v1108_v21 = vsub.f32 %v4872_v49, %v1103_v31  ;;  %v945_v30 = vmul.bf16 %v4585_v54, %v4947_v55 }
 0x75f   :  { %v4924_v32 = vpop.eup %4228  ;;  %4236 = vrcp.f32 %v524_v7 }
 0x760   :  { %v1117_v53 = vmul.f32 1.442695, %v1108_v21  ;;  %v1119_v9 = vsel %vm490_vm14, %v4924_v32, 0.0 }
 0x761   :  { %1120 = vadd.xlane.f32.xlu1 %v1119_v9  ;;  %v527_v34 = vpop.xlane.xlu0 %526  ;;  %v530_v49 = vpop.xlane.xlu1 %529 }
 0x762   :  { %4238 = vpow2.f32 %v1117_v53  ;;  %v182_v53 = vsel %vm181_vm4, 1.0, %v4405_v0 }
 0x763   :  { %v4928_v35 = vpop.eup %4230  ;;  %4240 = vrcp.f32 %v527_v34 }
 0x764   :  { %v1122_v41 = vsel %vm490_vm14, %v4928_v35, 0.0 }
 0x765   :  { %1123 = vadd.xlane.f32.xlu0 %v1122_v41  ;;  %v533_v45 = vpop.xlane.xlu0 %532  ;;  %v536_v51 = vpop.xlane.xlu1 %535  ;;  %v4976_v41 = vpack.c.bf16 %v182_v53, %v182_v53 }
 0x766   :  { %4242 = vrcp.f32 %v533_v45 }
 0x767   :  { %v4932_v36 = vpop.eup %4232  ;;  %4244 = vrcp.f32 %v530_v49  ;;  %v1147_v48 = vmul.bf16 %v4585_v54, %v4976_v41 }
 0x768   :  { %v1125_v46 = vsel %vm490_vm14, %v4932_v36, 0.0  ;;  %4246 = vrcp.f32 %v536_v51 }
 0x769   :  { %1126 = vadd.xlane.f32.xlu1 %v1125_v46 }
 0x76b   :  { %v4938_v37 = vpop.eup %4234 }
 0x76c   :  { %v1128_v6 = vsel %vm490_vm14, %v4938_v37, 0.0  ;;  %v4237_v39 = vpop.eup %4236 }
 0x76d   :  { %1129 = vadd.xlane.f32.xlu0 %v1128_v6  ;;  %v542_v52 = vmul.f32 %v4237_v39, %v4869_v47  ;;  %v1149_v6 = vmul.bf16 %v4608_v22, %v4976_v41 }
 0x76f   :  { %v4943_v42 = vpop.eup %4238  ;;  %v1160_v51 = vsel %vm691_vm13, %v1149_v6, 0 }
 0x770   :  { %v1131_v44 = vsel %vm503_vm15, %v4943_v42, 0.0  ;;  %v4241_v59 = vpop.eup %4240 }
 0x771   :  { %1132 = vadd.xlane.f32.xlu1 %v1131_v44  ;;  %v543_v29 = vmul.f32 %v4241_v59, %v4874_v17  ;;  %v946_v17 = vmul.bf16 %v4589_v61, %v4947_v55 }
 0x773   :  { %v547_v60 = vpack.c.bf16 %v543_v29, %v542_v52  ;;  %v4243_v12 = vpop.eup %4242 }
 0x774   :  { %v4245_v10 = vpop.eup %4244  ;;  %v545_v47 = vmul.f32 %v4243_v12, %v4882_v63 }
 0x775   :  { %3744 = vmatmul.mubr.msk.bf16.vlgmr.msra.gmra.mxu1 %vm490_vm14, %v547_v60  ;;  %v544_v19 = vmul.f32 %v4245_v10, %v4880_v58  ;;  %v4247_v14 = vpop.eup %4246 }
 0x776   :  { %3772 = vmatpush3.bf16.msra.mxu1 %v958_v62  ;;  %3747 = vmatprep.mubr.msk.bf16.mxu1 %vm4406_vm0, %v4405_v0  ;;  %v546_v63 = vmul.f32 %v4247_v14, %v4888_v5 }
 0x777   :  { %3773 = vmatprep.subr.bf16.mxu1 %v4405_v0  ;;  %v548_v20 = vpack.c.bf16 %v545_v47, %v544_v19 }
 0x778   :  { %v549_v31 = vpack.c.bf16 %v546_v63, %v546_v63 }
 0x77a   :  { %3774 = vmatpush3.bf16.msra.mxu1 %v946_v17 }
 0x77b   :  { %3775 = vmatprep.subr.bf16.mxu1 %v4405_v0 }
 0x77d   :  { %3748 = vmatmul.mubr.msk.bf16.gmra.mxu1 %vm490_vm14, %v548_v20 }
 0x77e   :  { %3776 = vmatpush3.bf16.msra.mxu1 %v945_v30  ;;  %3751 = vmatprep.mubr.msk.bf16.mxu1 %vm4406_vm0, %v4405_v0 }
 0x77f   :  { %3805 = vmatprep.subr.bf16.mxu1 %v4405_v0 }
 0x785   :  { %3752 = vmatmul.mubr.msk.bf16.gmra.mxu1 %vm490_vm14, %v549_v31 }
 0x786   :  { %3777 = vmatprep.mubr.msk.bf16.mxu1 %vm4406_vm0, %v4405_v0 }
 0x7d2   :  { %v919_v58 = vpop.xlane.xlu0 %918 }
 0x7d3   :  { %4248 = vrcp.f32 %v919_v58  ;;  %v4141_v58 = vld [vmem:[%s5774_s5 + $0x20] sm:$0xff]  }
 0x7d6   :  { %v922_v7 = vpop.xlane.xlu1 %921 }
 0x7d7   :  { %4250 = vrcp.f32 %v922_v7 }
 0x7da   :  { %v925_v21 = vpop.xlane.xlu0 %924 }
 0x7db   :  { %4252 = vrcp.f32 %v925_v21 }
 0x7de   :  { %v928_v5 = vpop.xlane.xlu1 %927 }
 0x7df   :  { %4254 = vrcp.f32 %v928_v5  ;;  %v4142_v5 = vld [vmem:[%s5774_s5 + $0x18] sm:$0xff]  }
 0x7e0   :  { %v4249_v9 = vpop.eup %4248 }
 0x7e1   :  { %v937_v49 = vmul.f32 %v4249_v9, %v4899_v38  ;;  %v1148_v38 = vmul.bf16 %v4589_v61, %v4976_v41 }
 0x7e2   :  { %v931_v34 = vpop.xlane.xlu0 %930 }
 0x7e3   :  { %4256 = vrcp.f32 %v931_v34  ;;  %v4143_v34 = vld [vmem:[%s5774_s5 + $0x10] sm:$0xff]  }
 0x7e4   :  { %v4251_v45 = vpop.eup %4250 }
 0x7e5   :  { %v938_v46 = vmul.f32 %v4251_v45, %v4903_v40 }
 0x7e7   :  { %v942_v11 = vpack.c.bf16 %v938_v46, %v937_v49  ;;  %v4144_v46 = vld [vmem:[%s5774_s5 + $0x8] sm:$0xff]  }
 0x7e8   :  { %v4253_v15 = vpop.eup %4252 }
 0x7e9   :  { %3778 = vmatmul.mubr.msk.bf16.vlgmr.msra.gmra.mxu1 %vm490_vm14, %v942_v11  ;;  %v939_v22 = vmul.f32 %v4253_v15, %v4908_v43  ;;  %v4145_v15 = vld [vmem:[%s5774_s5] sm:$0xff]  }
 0x7ea   :  { %3806 = vmatpush3.bf16.msra.mxu1 %v1160_v51  ;;  %v1121_v39 = vpop.xlane.xlu1 %1120  ;;  %3781 = vmatprep.mubr.msk.bf16.mxu1 %vm4406_vm0, %v4405_v0 }
 0x7eb   :  { %3807 = vmatprep.subr.bf16.mxu1 %v4405_v0  ;;  %4258 = vrcp.f32 %v1121_v39 }
 0x7ec   :  { %v4255_v44 = vpop.eup %4254 }
 0x7ed   :  { %v940_v40 = vmul.f32 %v4255_v44, %v4913_v4 }
 0x7ee   :  { %3808 = vmatpush3.bf16.msra.mxu1 %v1148_v38  ;;  %v1124_v59 = vpop.xlane.xlu0 %1123 }
 0x7ef   :  { %4260 = vrcp.f32 %v1124_v59  ;;  %3809 = vmatprep.subr.bf16.mxu1 %v4405_v0  ;;  %v943_v52 = vpack.c.bf16 %v940_v40, %v939_v22 }
 0x7f0   :  { %v4257_v29 = vpop.eup %4256 }
 0x7f1   :  { %3782 = vmatmul.mubr.msk.bf16.gmra.mxu1 %vm490_vm14, %v943_v52  ;;  %v941_v61 = vmul.f32 %v4257_v29, %v4918_v2 }
 0x7f2   :  { %3810 = vmatpush3.bf16.msra.mxu1 %v1147_v48  ;;  %v1127_v60 = vpop.xlane.xlu1 %1126  ;;  %3785 = vmatprep.mubr.msk.bf16.mxu1 %vm4406_vm0, %v4405_v0 }
 0x7f3   :  { %3851 = vmatprep.subr.bf16.mxu1 %v4405_v0  ;;  %4262 = vrcp.f32 %v1127_v60  ;;  %v944_v4 = vpack.c.bf16 %v941_v61, %v941_v61 }
 0x7f6   :  { %v1130_v43 = vpop.xlane.xlu0 %1129 }
 0x7f7   :  { %4264 = vrcp.f32 %v1130_v43 }
 0x7f8   :  { %v4259_v12 = vpop.eup %4258 }
 0x7f9   :  { %3786 = vmatmul.mubr.msk.bf16.gmra.mxu1 %vm490_vm14, %v944_v4  ;;  %v1139_v10 = vmul.f32 %v4259_v12, %v4924_v32 }
 0x7fa   :  { %v1133_v62 = vpop.xlane.xlu1 %1132  ;;  %3811 = vmatprep.mubr.msk.bf16.mxu1 %vm4406_vm0, %v4405_v0 }
 0x7fb   :  { %4266 = vrcp.f32 %v1133_v62 }
 0x7fc   :  { %v4261_v54 = vpop.eup %4260 }
 0x7fd   :  { %v1140_v47 = vmul.f32 %v4261_v54, %v4928_v35 }
 0x7ff   :  { %v1144_v2 = vpack.c.bf16 %v1140_v47, %v1139_v10 }
 0x800   :  { %v4263_v17 = vpop.eup %4262 }
 0x801   :  { %3812 = vmatmul.mubr.msk.bf16.vlgmr.msra.gmra.mxu1 %vm490_vm14, %v1144_v2  ;;  %v1141_v20 = vmul.f32 %v4263_v17, %v4932_v36  ;;  %v4138_v36 = vld [vmem:[%s5774_s5 + $0x38] sm:$0xff]  }
 0x802   :  { %3815 = vmatprep.mubr.msk.bf16.mxu1 %vm4406_vm0, %v4405_v0  ;;  %3824 = vmatpush3.bf16.msra.mxu0 %v4138_v36 }
 0x803   :  { %3825 = vmatprep.subr.bf16.mxu0 %v4405_v0 }
 0x804   :  { %v4265_v19 = vpop.eup %4264 }
 0x805   :  { %v1142_v14 = vmul.f32 %v4265_v19, %v4938_v37  ;;  %v4139_v37 = vld [vmem:[%s5774_s5 + $0x30] sm:$0xff]  }
 0x806   :  { %3826 = vmatpush3.bf16.msra.mxu0 %v4139_v37 }
 0x807   :  { %v1145_v30 = vpack.c.bf16 %v1142_v14, %v1141_v20  ;;  %3827 = vmatprep.subr.bf16.mxu0 %v4405_v0 }
 0x808   :  { %v4267_v63 = vpop.eup %4266 }
 0x809   :  { %3816 = vmatmul.mubr.msk.bf16.gmra.mxu1 %vm490_vm14, %v1145_v30  ;;  %v1143_v32 = vmul.f32 %v4267_v63, %v4943_v42  ;;  %v4140_v42 = vld [vmem:[%s5774_s5 + $0x28] sm:$0xff]  }
 0x80a   :  { %3819 = vmatprep.mubr.msk.bf16.mxu1 %vm4406_vm0, %v4405_v0  ;;  %3828 = vmatpush3.bf16.msra.mxu0 %v4140_v42 }
 0x80b   :  { %v1146_v35 = vpack.c.bf16 %v1143_v32, %v1143_v32  ;;  %3829 = vmatprep.subr.bf16.mxu0 %v4405_v0 }
 0x80e   :  { %3830 = vmatpush3.bf16.msra.mxu0 %v4141_v58 }
 0x80f   :  { %3831 = vmatprep.subr.bf16.mxu0 %v4405_v0 }
 0x811   :  { %3820 = vmatmul.mubr.msk.bf16.gmra.mxu1 %vm490_vm14, %v1146_v35 }
 0x812   :  { %3855 = vmatprep.mubr.msk.bf16.mxu1 %vm4406_vm0, %v4405_v0  ;;  %3832 = vmatpush3.bf16.msra.mxu0 %v4142_v5 }
 0x813   :  { %3833 = vmatprep.subr.bf16.mxu0 %v4405_v0 }
 0x816   :  { %3834 = vmatpush3.bf16.msra.mxu0 %v4143_v34 }
 0x817   :  { %3835 = vmatprep.subr.bf16.mxu0 %v4405_v0 }
 0x81a   :  { %3836 = vmatpush3.bf16.msra.mxu0 %v4144_v46 }
 0x81b   :  { %3837 = vmatprep.subr.bf16.mxu0 %v4405_v0 }
 0x81e   :  { %3838 = vmatpush3.bf16.msra.mxu0 %v4145_v15 }
 0x81f   :  { %3895 = vmatprep.subr.bf16.mxu0 %v4405_v0 }
 0x835   :  { %v797_v31 = vpop.f32.mrf.mxu1 }
 0x836   :  { %v798_v54 = vadd.f32 %v797_v31, %v4809_v56 }
 0x837   :  { %v3745_v7 = vpop.f32.mrf.mxu1 }
 0x839   :  { %v800_v21 = vpop.f32.mrf.mxu1 }
 0x83a   :  { %v801_v10 = vadd.f32 %v800_v21, %v4811_v1 }
 0x83b   :  { %v3746_v53 = vpop.f32.mrf.mxu1 }
 0x83d   :  { %v805_v9 = vpop.f32.mrf.mxu1 }
 0x83e   :  { %v806_v35 = vadd.f32 %v805_v9, %v4813_v3 }
 0x83f   :  { %v3749_v45 = vpop.f32.mrf.mxu1 }
 0x841   :  { %v808_v49 = vpop.f32.mrf.mxu1 }
 0x842   :  { %v809_v36 = vadd.f32 %v808_v49, %v4815_v8 }
 0x843   :  { %v3750_v6 = vpop.f32.mrf.mxu1 }
 0x845   :  { %v813_v11 = vpop.f32.mrf.mxu1 }
 0x846   :  { %v814_v21 = vadd.f32 %v813_v11, %v4817_v16  ;;  %v3367_v16 = vld [vmem:[%s5771_s8 + $0x2] ss:$0 sm:$0xff] }
 0x847   :  { %v3753_v51 = vpop.f32.mrf.mxu1 }
 0x849   :  { %v816_v39 = vpop.f32.mrf.mxu1 }
 0x84b   :  { %v3754_v44 = vpop.f32.mrf.mxu1 }
 0x8a9   :  { %v994_v38 = vpop.f32.mrf.mxu1 }
 0x8aa   :  { %v1016_v2 = vadd.f32 %v994_v38, %v798_v54 }
 0x8ab   :  { %v3779_v22 = vpop.f32.mrf.mxu1 }
 0x8ad   :  { %v997_v40 = vpop.f32.mrf.mxu1 }
 0x8ae   :  { %v1017_v17 = vadd.f32 %v997_v40, %v801_v10 }
 0x8af   :  { %v3780_v59 = vpop.f32.mrf.mxu1 }
 0x8b1   :  { %v1002_v52 = vpop.f32.mrf.mxu1 }
 0x8b2   :  { %v1018_v56 = vadd.f32 %v1002_v52, %v806_v35 }
 0x8b3   :  { %v3783_v29 = vpop.f32.mrf.mxu1 }
 0x8b5   :  { %v1005_v48 = vpop.f32.mrf.mxu1 }
 0x8b6   :  { %v1019_v1 = vadd.f32 %v1005_v48, %v809_v36 }
 0x8b7   :  { %v3784_v60 = vpop.f32.mrf.mxu1 }
 0x8b9   :  { %v1010_v61 = vpop.f32.mrf.mxu1 }
 0x8ba   :  { %v1020_v34 = vadd.f32 %v1010_v61, %v814_v21 }
 0x8bb   :  { %v3787_v43 = vpop.f32.mrf.mxu1 }
 0x8bd   :  { %v1013_v4 = vpop.f32.mrf.mxu1 }
 0x8bf   :  { %v3788_v12 = vpop.f32.mrf.mxu1 }
 0x8c1   :  { %v1196_v62 = vpop.f32.mrf.mxu1 }
 0x8c2   :  { %v1218_v20 = vadd.f32 %v1196_v62, %v1016_v2 }
 0x8c3   :  { %v3813_v47 = vpop.f32.mrf.mxu1 }
 0x8c5   :  { %v1199_v19 = vpop.f32.mrf.mxu1 }
 0x8c6   :  { %v1219_v14 = vadd.f32 %v1199_v19, %v1017_v17 }
 0x8c7   :  { %v3814_v30 = vpop.f32.mrf.mxu1 }
 0x8c8   :  { %v1239_v63 = vpack.c.bf16 %v1219_v14, %v1218_v20 }
 0x8c9   :  { %v1204_v32 = vpop.f32.mrf.mxu1 }
 0x8ca   :  { %3840 = vmatmul.mubr.bf16.vlgmr.msra.gmra.mxu0 %v1239_v63  ;;  %v1220_v31 = vadd.f32 %v1204_v32, %v1018_v56 }
 0x8cb   :  { %v3817_v37 = vpop.f32.mrf.mxu1  ;;  %3843 = vmatprep.mubr.msk.bf16.mxu0 %vm4406_vm0, %v4405_v0 }
 0x8cd   :  { %v1207_v42 = vpop.f32.mrf.mxu1 }
 0x8ce   :  { %v1221_v58 = vadd.f32 %v1207_v42, %v1019_v1 }
 0x8cf   :  { %v3818_v7 = vpop.f32.mrf.mxu1 }
 0x8d0   :  { %v1240_v5 = vpack.c.bf16 %v1221_v58, %v1220_v31 }
 0x8d1   :  { %v1212_v53 = vpop.f32.mrf.mxu1 }
 0x8d2   :  { %3844 = vmatmul.mubr.bf16.gmra.mxu0 %v1240_v5  ;;  %v1222_v8 = vadd.f32 %v1212_v53, %v1020_v34 }
 0x8d3   :  { %v3821_v3 = vpop.f32.mrf.mxu1  ;;  %3847 = vmatprep.mubr.msk.bf16.mxu0 %vm4406_vm0, %v4405_v0 }
 0x8d4   :  { %v1241_v49 = vpack.c.bf16 %v1222_v8, %v1222_v8 }
 0x8d5   :  { %v1215_v9 = vpop.f32.mrf.mxu1 }
 0x8d7   :  { %v3822_v45 = vpop.f32.mrf.mxu1 }
 0x8d8   :  { %v4146_v45 = vld [vmem:[%s5775_s6 + $0x8] sm:$0xff]  }
 0x8d9   :  { %3852 = vmatpush3.bf16.msra.mxu1 %v4146_v45  ;;  %v3370_v45 = vld [vmem:[%s5772_s9 + $0x1] ss:$0 sm:$0xff] }
 0x8da   :  { %3848 = vmatmul.mubr.bf16.gmra.mxu0 %v1241_v49  ;;  %v4147_v49 = vld [vmem:[%s5775_s6] sm:$0xff]   ;;  %3853 = vmatprep.subr.bf16.mxu1 %v4405_v0 }
 0x8db   :  { %3899 = vmatprep.mubr.msk.bf16.mxu0 %vm4406_vm0, %v4405_v0 }
 0x8dd   :  { %3854 = vmatpush3.bf16.msra.mxu1 %v4147_v49 }
 0x8de   :  { %3867 = vmatprep.subr.bf16.mxu1 %v4405_v0 }
 0x98a   :  { %v1324_v46 = vpop.f32.mrf.mxu0 }
 0x98b   :  { %v1346_v6 = vadd.f32 %v1324_v46, %v4514_v13 }
 0x98c   :  { %v3841_v11 = vpop.f32.mrf.mxu0 }
 0x98d   :  { %v5063_v51 = vadd.f32 %v3367_v16, %v1346_v6 }
 0x98e   :  { %v1327_v15 = vpop.f32.mrf.mxu0 }
 0x98f   :  { %v1347_v39 = vadd.f32 %v1327_v15, %v4521_v18  ;;  %v1360_v44 = vsel %vm71_vm1, %v5063_v51, 0.0 }
 0x990   :  { %1361 = vadd.xlane.f32.xlu0 %v1360_v44  ;;  %v3842_v38 = vpop.f32.mrf.mxu0 }
 0x991   :  { %v5068_v22 = vadd.f32 %v3367_v16, %v1347_v39 }
 0x992   :  { %v1332_v40 = vpop.f32.mrf.mxu0 }
 0x993   :  { %v1348_v59 = vadd.f32 %v1332_v40, %v4528_v23  ;;  %v1363_v52 = vsel %vm71_vm1, %v5068_v22, 0.0 }
 0x994   :  { %1364 = vadd.xlane.f32.xlu1 %v1363_v52  ;;  %v3845_v13 = vpop.f32.mrf.mxu0 }
 0x995   :  { %v5073_v29 = vadd.f32 %v3367_v16, %v1348_v59 }
 0x996   :  { %v1335_v48 = vpop.f32.mrf.mxu0 }
 0x997   :  { %v1349_v18 = vadd.f32 %v1335_v48, %v4535_v28  ;;  %v1366_v60 = vsel %vm71_vm1, %v5073_v29, 0.0 }
 0x998   :  { %1367 = vadd.xlane.f32.xlu0 %v1366_v60  ;;  %v3846_v61 = vpop.f32.mrf.mxu0 }
 0x999   :  { %v5078_v43 = vadd.f32 %v3367_v16, %v1349_v18 }
 0x99a   :  { %v1340_v4 = vpop.f32.mrf.mxu0 }
 0x99b   :  { %v1350_v23 = vadd.f32 %v1340_v4, %v4542_v33  ;;  %v1369_v12 = vsel %vm71_vm1, %v5078_v43, 0.0 }
 0x99c   :  { %1370 = vadd.xlane.f32.xlu1 %v1369_v12  ;;  %v3849_v62 = vpop.f32.mrf.mxu0 }
 0x99d   :  { %v5083_v54 = vadd.f32 %v3367_v16, %v1350_v23  ;;  %v3368_v23 = vld [vmem:[%s5771_s8 + $0x3] ss:$0 sm:$0xff] }
 0x99e   :  { %v1343_v10 = vpop.f32.mrf.mxu0 }
 0x99f   :  { %v1372_v28 = vsel %vm204_vm2, %v5083_v54, 0.0 }
 0x9a0   :  { %1373 = vadd.xlane.f32.xlu0 %v1372_v28  ;;  %v3850_v47 = vpop.f32.mrf.mxu0  ;;  %v3369_v28 = vld [vmem:[%s5771_s8 + $0x4] ss:$0 sm:$0xff] }
 0xa19   :  { %v1362_v2 = vpop.xlane.xlu0 %1361 }
 0xa1a   :  { %v1375_v17 = vmul.f32 0.03125, %v1362_v2 }
 0xa1c   :  { %v1380_v19 = vsub.f32 %v5063_v51, %v1375_v17 }
 0xa1d   :  { %v1365_v20 = vpop.xlane.xlu1 %1364 }
 0xa1e   :  { %v1376_v14 = vmul.f32 0.03125, %v1365_v20  ;;  %v1385_v33 = vmul.f32 %v1380_v19, %v1380_v19 }
 0xa20   :  { %v1381_v30 = vsub.f32 %v5068_v22, %v1376_v14  ;;  %v1390_v63 = vsel %vm71_vm1, %v1385_v33, 0.0 }
 0xa21   :  { %v1368_v32 = vpop.xlane.xlu0 %1367  ;;  %1391 = vadd.xlane.f32.xlu1 %v1390_v63 }
 0xa22   :  { %v1377_v35 = vmul.f32 0.03125, %v1368_v32  ;;  %v1386_v36 = vmul.f32 %v1381_v30, %v1381_v30 }
 0xa24   :  { %v1382_v37 = vsub.f32 %v5073_v29, %v1377_v35  ;;  %v1393_v56 = vsel %vm71_vm1, %v1386_v36, 0.0 }
 0xa25   :  { %v1371_v1 = vpop.xlane.xlu1 %1370  ;;  %1394 = vadd.xlane.f32.xlu0 %v1393_v56 }
 0xa26   :  { %v1378_v42 = vmul.f32 0.03125, %v1371_v1  ;;  %v1387_v31 = vmul.f32 %v1382_v37, %v1382_v37 }
 0xa28   :  { %v1383_v58 = vsub.f32 %v5078_v43, %v1378_v42  ;;  %v1396_v7 = vsel %vm71_vm1, %v1387_v31, 0.0 }
 0xa29   :  { %1397 = vadd.xlane.f32.xlu1 %v1396_v7  ;;  %v1374_v21 = vpop.xlane.xlu0 %1373 }
 0xa2a   :  { %v1379_v5 = vmul.f32 0.03125, %v1374_v21  ;;  %v1388_v53 = vmul.f32 %v1383_v58, %v1383_v58  ;;  %v4149_v21 = vld [vmem:[%s5776_s7 + $0x30] sm:$0xff]  }
 0xa2c   :  { %v1384_v34 = vsub.f32 %v5083_v54, %v1379_v5  ;;  %v1399_v3 = vsel %vm71_vm1, %v1388_v53, 0.0  ;;  %v4150_v5 = vld [vmem:[%s5776_s7 + $0x28] sm:$0xff]   ;;  %v4151_v53 = vld [vmem:[%s5776_s7 + $0x20] sm:$0xff]  }
 0xa2d   :  { %1400 = vadd.xlane.f32.xlu0 %v1399_v3  ;;  %v4153_v3 = vld [vmem:[%s5776_s7 + $0x10] sm:$0xff]  }
 0xa2e   :  { %v1389_v8 = vmul.f32 %v1384_v34, %v1384_v34 }
 0xa30   :  { %v1402_v9 = vsel %vm204_vm2, %v1389_v8, 0.0  ;;  %v4154_v8 = vld [vmem:[%s5776_s7 + $0x8] sm:$0xff]  }
 0xa31   :  { %1403 = vadd.xlane.f32.xlu1 %v1402_v9  ;;  %v4155_v9 = vld [vmem:[%s5776_s7] sm:$0xff]  }
 0xaaa   :  { %v1392_v16 = vpop.xlane.xlu1 %1391 }
 0xaab   :  { %v1405_v46 = vmul.f32 0.03125, %v1392_v16 }
 0xaad   :  { %v1410_v6 = vadd.f32 1e-06, %v1405_v46 }
 0xaae   :  { %v1395_v11 = vpop.xlane.xlu0 %1394 }
 0xaaf   :  { %4268 = vrsqrt.f32 %v1410_v6  ;;  %v1406_v15 = vmul.f32 0.03125, %v1395_v11 }
 0xab1   :  { %v1411_v39 = vadd.f32 1e-06, %v1406_v15 }
 0xab2   :  { %v1398_v44 = vpop.xlane.xlu1 %1397 }
 0xab3   :  { %4270 = vrsqrt.f32 %v1411_v39  ;;  %v1407_v38 = vmul.f32 0.03125, %v1398_v44 }
 0xab5   :  { %v1412_v40 = vadd.f32 1e-06, %v1407_v38 }
 0xab6   :  { %v1401_v59 = vpop.xlane.xlu0 %1400 }
 0xab7   :  { %4272 = vrsqrt.f32 %v1412_v40  ;;  %v1408_v52 = vmul.f32 0.03125, %v1401_v59 }
 0xab9   :  { %v1413_v13 = vadd.f32 1e-06, %v1408_v52 }
 0xaba   :  { %v1404_v48 = vpop.xlane.xlu1 %1403 }
 0xabb   :  { %4274 = vrsqrt.f32 %v1413_v13  ;;  %v1409_v18 = vmul.f32 0.03125, %v1404_v48 }
 0xabc   :  { %v4269_v60 = vpop.eup %4268 }
 0xabd   :  { %v1420_v61 = vmul.f32 %v4269_v60, %v1380_v19  ;;  %v1414_v4 = vadd.f32 1e-06, %v1409_v18 }
 0xabf   :  { %4276 = vrsqrt.f32 %v1414_v4  ;;  %v1429_v62 = vmul.f32 %v3368_v23, %v1420_v61 }
 0xac0   :  { %v4271_v12 = vpop.eup %4270 }
 0xac1   :  { %v1421_v10 = vmul.f32 %v4271_v12, %v1381_v30  ;;  %v1438_v17 = vadd.f32 %v3369_v28, %v1429_v62 }
 0xac3   :  { %v1430_v47 = vmul.f32 %v3368_v23, %v1421_v10 }
 0xac4   :  { %v4273_v2 = vpop.eup %4272 }
 0xac5   :  { %v1439_v20 = vadd.f32 %v3369_v28, %v1430_v47  ;;  %v1422_v14 = vmul.f32 %v4273_v2, %v1382_v37 }
 0xac7   :  { %v1447_v33 = vpack.c.bf16 %v1439_v20, %v1438_v17  ;;  %v1431_v32 = vmul.f32 %v3368_v23, %v1422_v14 }
 0xac8   :  { %v4275_v19 = vpop.eup %4274 }
 0xac9   :  { %3856 = vmatmul.mubr.msk.bf16.vlgmr.msra.gmra.mxu1 %vm71_vm1, %v1447_v33  ;;  %v1423_v63 = vmul.f32 %v4275_v19, %v1383_v58  ;;  %v1440_v36 = vadd.f32 %v3369_v28, %v1431_v32  ;;  %v4148_v58 = vld [vmem:[%s5776_s7 + $0x38] sm:$0xff]  }
 0xaca   :  { %3859 = vmatprep.mubr.msk.bf16.mxu1 %vm4406_vm0, %v4405_v0  ;;  %3868 = vmatpush3.bf16.msra.mxu1 %v4148_v58 }
 0xacb   :  { %v1432_v35 = vmul.f32 %v3368_v23, %v1423_v63  ;;  %3869 = vmatprep.subr.bf16.mxu1 %v4405_v0 }
 0xacc   :  { %v4277_v30 = vpop.eup %4276 }
 0xacd   :  { %v1441_v56 = vadd.f32 %v3369_v28, %v1432_v35  ;;  %v1424_v1 = vmul.f32 %v4277_v30, %v1384_v34  ;;  %v4152_v34 = vld [vmem:[%s5776_s7 + $0x18] sm:$0xff]  }
 0xace   :  { %3870 = vmatpush3.bf16.msra.mxu1 %v4149_v21 }
 0xacf   :  { %v1448_v42 = vpack.c.bf16 %v1441_v56, %v1440_v36  ;;  %v1433_v31 = vmul.f32 %v3368_v23, %v1424_v1  ;;  %3871 = vmatprep.subr.bf16.mxu1 %v4405_v0 }
 0xad1   :  { %3860 = vmatmul.mubr.msk.bf16.gmra.mxu1 %vm71_vm1, %v1448_v42  ;;  %v1442_v37 = vadd.f32 %v3369_v28, %v1433_v31 }
 0xad2   :  { %3863 = vmatprep.mubr.msk.bf16.mxu1 %vm4406_vm0, %v4405_v0  ;;  %3872 = vmatpush3.bf16.msra.mxu1 %v4150_v5 }
 0xad3   :  { %v1449_v7 = vpack.c.bf16 %v1442_v37, %v1442_v37  ;;  %3873 = vmatprep.subr.bf16.mxu1 %v4405_v0 }
 0xad6   :  { %3874 = vmatpush3.bf16.msra.mxu1 %v4151_v53 }
 0xad7   :  { %3875 = vmatprep.subr.bf16.mxu1 %v4405_v0 }
 0xad9   :  { %3864 = vmatmul.mubr.msk.bf16.gmra.mxu1 %vm71_vm1, %v1449_v7 }
 0xada   :  { %3883 = vmatprep.mubr.msk.bf16.mxu1 %vm4406_vm0, %v4405_v0  ;;  %3876 = vmatpush3.bf16.msra.mxu1 %v4152_v34 }
 0xadb   :  { %3877 = vmatprep.subr.bf16.mxu1 %v4405_v0 }
 0xade   :  { %3878 = vmatpush3.bf16.msra.mxu1 %v4153_v3 }
 0xadf   :  { %3879 = vmatprep.subr.bf16.mxu1 %v4405_v0 }
 0xae2   :  { %3880 = vmatpush3.bf16.msra.mxu1 %v4154_v8 }
 0xae3   :  { %3881 = vmatprep.subr.bf16.mxu1 %v4405_v0 }
 0xae6   :  { %3882 = vmatpush3.bf16.msra.mxu1 %v4155_v9 }
 0xae7   :  { %3927 = vmatprep.subr.bf16.mxu1 %v4405_v0 }
 0xb89   :  { %v1509_v49 = vpop.f32.mrf.mxu1 }
 0xb8a   :  { %v1510_v16 = vadd.f32 %v3370_v45, %v1509_v49 }
 0xb8b   :  { %v3857_v46 = vpop.f32.mrf.mxu1 }
 0xb8c   :  { %v1536_v6 = vmul.f32 0.044715, %v1510_v16  ;;  %v1531_v34 = vmul.f32 0.5, %v1510_v16 }
 0xb8d   :  { %v1512_v11 = vpop.f32.mrf.mxu1 }
 0xb8e   :  { %v1541_v15 = vmul.f32 %v1536_v6, %v1510_v16  ;;  %v1513_v39 = vadd.f32 %v3370_v45, %v1512_v11 }
 0xb8f   :  { %v3858_v44 = vpop.f32.mrf.mxu1 }
 0xb90   :  { %v1546_v38 = vmul.f32 %v1541_v15, %v1510_v16  ;;  %v1537_v40 = vmul.f32 0.044715, %v1513_v39  ;;  %v1532_v3 = vmul.f32 0.5, %v1513_v39 }
 0xb91   :  { %v1517_v59 = vpop.f32.mrf.mxu1 }
 0xb92   :  { %v1551_v52 = vadd.f32 %v1546_v38, %v1510_v16  ;;  %v1542_v13 = vmul.f32 %v1537_v40, %v1513_v39  ;;  %v1518_v48 = vadd.f32 %v3370_v45, %v1517_v59 }
 0xb93   :  { %v3861_v18 = vpop.f32.mrf.mxu1 }
 0xb94   :  { %v1556_v60 = vmul.f32 0.7978846, %v1551_v52  ;;  %v1547_v61 = vmul.f32 %v1542_v13, %v1513_v39  ;;  %v1538_v4 = vmul.f32 0.044715, %v1518_v48  ;;  %v1533_v15 = vmul.f32 0.5, %v1518_v48 }
 0xb95   :  { %v1520_v23 = vpop.f32.mrf.mxu1 }
 0xb96   :  { %4278 = vtanh.f32 %v1556_v60  ;;  %v1552_v12 = vadd.f32 %v1547_v61, %v1513_v39  ;;  %v1543_v62 = vmul.f32 %v1538_v4, %v1518_v48  ;;  %v1521_v10 = vadd.f32 %v3370_v45, %v1520_v23 }
 0xb97   :  { %v3862_v28 = vpop.f32.mrf.mxu1 }
 0xb98   :  { %v1557_v47 = vmul.f32 0.7978846, %v1552_v12  ;;  %v1548_v2 = vmul.f32 %v1543_v62, %v1518_v48  ;;  %v1539_v17 = vmul.f32 0.044715, %v1521_v10  ;;  %v1534_v44 = vmul.f32 0.5, %v1521_v10 }
 0xb99   :  { %v1525_v20 = vpop.f32.mrf.mxu1 }
 0xb9a   :  { %4280 = vtanh.f32 %v1557_v47  ;;  %v1544_v14 = vmul.f32 %v1539_v17, %v1521_v10  ;;  %v1526_v33 = vadd.f32 %v3370_v45, %v1525_v20  ;;  %v1553_v19 = vadd.f32 %v1548_v2, %v1518_v48  ;;  %v3384_v48 = vld [vmem:[%s5771_s8 + $0x5] ss:$0 sm:$0xff] }
 0xb9b   :  { %v3865_v63 = vpop.f32.mrf.mxu1 }
 0xb9c   :  { %v1549_v32 = vmul.f32 %v1544_v14, %v1521_v10  ;;  %v1540_v35 = vmul.f32 0.044715, %v1526_v33  ;;  %v1558_v30 = vmul.f32 0.7978846, %v1553_v19  ;;  %v1535_v39 = vmul.f32 0.5, %v1526_v33 }
 0xb9d   :  { %v1528_v36 = vpop.f32.mrf.mxu1 }
 0xb9e   :  { %v1545_v56 = vmul.f32 %v1540_v35, %v1526_v33  ;;  %v1554_v1 = vadd.f32 %v1549_v32, %v1521_v10  ;;  %4282 = vtanh.f32 %v1558_v30 }
 0xb9f   :  { %v3866_v42 = vpop.f32.mrf.mxu1 }
 0xba0   :  { %v1559_v31 = vmul.f32 0.7978846, %v1554_v1  ;;  %v1550_v37 = vmul.f32 %v1545_v56, %v1526_v33 }
 0xba2   :  { %4284 = vtanh.f32 %v1559_v31  ;;  %v1555_v7 = vadd.f32 %v1550_v37, %v1526_v33 }
 0xba3   :  { %v4279_v58 = vpop.eup %4278 }
 0xba4   :  { %v1560_v21 = vmul.f32 0.7978846, %v1555_v7  ;;  %v1566_v5 = vadd.f32 1.0, %v4279_v58 }
 0xba6   :  { %4286 = vtanh.f32 %v1560_v21  ;;  %v1571_v9 = vmul.f32 %v1566_v5, %v1531_v34 }
 0xba7   :  { %v4281_v53 = vpop.eup %4280 }
 0xba8   :  { %v1567_v8 = vadd.f32 1.0, %v4281_v53 }
 0xbaa   :  { %v1572_v45 = vmul.f32 %v1567_v8, %v1532_v3 }
 0xbab   :  { %v4283_v49 = vpop.eup %4282 }
 0xbac   :  { %v1592_v46 = vpack.c.bf16 %v1572_v45, %v1571_v9  ;;  %v1568_v6 = vadd.f32 1.0, %v4283_v49 }
 0xbae   :  { %3884 = vmatmul.mubr.bf16.vlgmr.msra.gmra.mxu1 %v1592_v46  ;;  %v1573_v40 = vmul.f32 %v1568_v6, %v1533_v15 }
 0xbaf   :  { %v4285_v11 = vpop.eup %4284  ;;  %3887 = vmatprep.mubr.msk.bf16.mxu1 %vm4406_vm0, %v4405_v0 }
 0xbb0   :  { %v1569_v38 = vadd.f32 1.0, %v4285_v11 }
 0xbb2   :  { %v1574_v59 = vmul.f32 %v1569_v38, %v1534_v44 }
 0xbb3   :  { %v4287_v52 = vpop.eup %4286 }
 0xbb4   :  { %v1593_v13 = vpack.c.bf16 %v1574_v59, %v1573_v40  ;;  %v1570_v16 = vadd.f32 1.0, %v4287_v52 }
 0xbb6   :  { %3888 = vmatmul.mubr.bf16.gmra.mxu1 %v1593_v13  ;;  %v1575_v18 = vmul.f32 %v1570_v16, %v1535_v39 }
 0xbb7   :  { %3891 = vmatprep.mubr.msk.bf16.mxu1 %vm4406_vm0, %v4405_v0 }
 0xbb8   :  { %v1594_v60 = vpack.c.bf16 %v1575_v18, %v1575_v18  ;;  %v4156_v18 = vld [vmem:[%s5770_s4 + $0x18] sm:$0xff]  }
 0xbb9   :  { %3896 = vmatpush3.bf16.msra.mxu0 %v4156_v18 }
 0xbba   :  { %3897 = vmatprep.subr.bf16.mxu0 %v4405_v0 }
 0xbbe   :  { %3892 = vmatmul.mubr.bf16.gmra.mxu1 %v1594_v60  ;;  %v4157_v60 = vld [vmem:[%s5770_s4 + $0x10] sm:$0xff]  }
 0xbbf   :  { %3931 = vmatprep.mubr.msk.bf16.mxu1 %vm4406_vm0, %v4405_v0  ;;  %3898 = vmatpush3.bf16.msra.mxu0 %v4157_v60 }
 0xbc0   :  { %3911 = vmatprep.subr.bf16.mxu0 %v4405_v0 }
 0xc6e   :  { %v1677_v61 = vpop.f32.mrf.mxu1 }
 0xc6f   :  { %v1699_v4 = vadd.f32 %v1677_v61, %v5063_v51 }
 0xc70   :  { %v3885_v23 = vpop.f32.mrf.mxu1 }
 0xc71   :  { %v5165_v12 = vadd.f32 %v3384_v48, %v1699_v4 }
 0xc72   :  { %v1680_v62 = vpop.f32.mrf.mxu1 }
 0xc73   :  { %v1700_v10 = vadd.f32 %v1680_v62, %v5068_v22  ;;  %v1723_v28 = vsel %vm71_vm1, %v5165_v12, 0.0 }
 0xc74   :  { %1724 = vadd.xlane.f32.xlu0 %v1723_v28  ;;  %v3886_v47 = vpop.f32.mrf.mxu1 }
 0xc75   :  { %v5170_v2 = vadd.f32 %v3384_v48, %v1700_v10 }
 0xc76   :  { %v1685_v17 = vpop.f32.mrf.mxu1 }
 0xc77   :  { %v1701_v20 = vadd.f32 %v1685_v17, %v5073_v29  ;;  %v1726_v14 = vsel %vm71_vm1, %v5170_v2, 0.0 }
 0xc78   :  { %1727 = vadd.xlane.f32.xlu1 %v1726_v14  ;;  %v3889_v51 = vpop.f32.mrf.mxu1 }
 0xc79   :  { %v5175_v33 = vadd.f32 %v3384_v48, %v1701_v20 }
 0xc7a   :  { %v1688_v19 = vpop.f32.mrf.mxu1 }
 0xc7b   :  { %v1702_v22 = vadd.f32 %v1688_v19, %v5078_v43  ;;  %v1729_v63 = vsel %vm71_vm1, %v5175_v33, 0.0 }
 0xc7c   :  { %1730 = vadd.xlane.f32.xlu0 %v1729_v63  ;;  %v3890_v32 = vpop.f32.mrf.mxu1 }
 0xc7d   :  { %v5180_v35 = vadd.f32 %v3384_v48, %v1702_v22 }
 0xc7e   :  { %v1693_v30 = vpop.f32.mrf.mxu1 }
 0xc7f   :  { %v1703_v29 = vadd.f32 %v1693_v30, %v5083_v54  ;;  %v1732_v36 = vsel %vm71_vm1, %v5180_v35, 0.0 }
 0xc80   :  { %1733 = vadd.xlane.f32.xlu1 %v1732_v36  ;;  %v3893_v56 = vpop.f32.mrf.mxu1 }
 0xc81   :  { %v5185_v1 = vadd.f32 %v3384_v48, %v1703_v29  ;;  %v3393_v29 = vld [vmem:[%s5771_s8 + $0x8] ss:$0 sm:$0xff] }
 0xc82   :  { %v1696_v42 = vpop.f32.mrf.mxu1 }
 0xc83   :  { %v1735_v43 = vsel %vm204_vm2, %v5185_v1, 0.0 }
 0xc84   :  { %1736 = vadd.xlane.f32.xlu0 %v1735_v43  ;;  %v3894_v31 = vpop.f32.mrf.mxu1  ;;  %v3394_v43 = vld [vmem:[%s5771_s8 + $0x9] ss:$0 sm:$0xff] }
 0xcfd   :  { %v1725_v37 = vpop.xlane.xlu0 %1724 }
 0xcfe   :  { %v1738_v7 = vmul.f32 0.03125, %v1725_v37 }
 0xd00   :  { %v1743_v58 = vsub.f32 %v5165_v12, %v1738_v7 }
 0xd01   :  { %v1728_v21 = vpop.xlane.xlu1 %1727 }
 0xd02   :  { %v1739_v5 = vmul.f32 0.03125, %v1728_v21  ;;  %v1748_v54 = vmul.f32 %v1743_v58, %v1743_v58 }
 0xd04   :  { %v1744_v53 = vsub.f32 %v5170_v2, %v1739_v5  ;;  %v1753_v34 = vsel %vm71_vm1, %v1748_v54, 0.0 }
 0xd05   :  { %v1731_v3 = vpop.xlane.xlu0 %1730  ;;  %1754 = vadd.xlane.f32.xlu1 %v1753_v34 }
 0xd06   :  { %v1740_v8 = vmul.f32 0.03125, %v1731_v3  ;;  %v1749_v9 = vmul.f32 %v1744_v53, %v1744_v53 }
 0xd08   :  { %v1745_v45 = vsub.f32 %v5175_v33, %v1740_v8  ;;  %v1756_v49 = vsel %vm71_vm1, %v1749_v9, 0.0 }
 0xd09   :  { %v1734_v46 = vpop.xlane.xlu1 %1733  ;;  %1757 = vadd.xlane.f32.xlu0 %v1756_v49 }
 0xd0a   :  { %v1741_v6 = vmul.f32 0.03125, %v1734_v46  ;;  %v1750_v11 = vmul.f32 %v1745_v45, %v1745_v45 }
 0xd0c   :  { %v1746_v15 = vsub.f32 %v5180_v35, %v1741_v6  ;;  %v1759_v44 = vsel %vm71_vm1, %v1750_v11, 0.0 }
 0xd0d   :  { %1760 = vadd.xlane.f32.xlu1 %v1759_v44  ;;  %v1737_v38 = vpop.xlane.xlu0 %1736 }
 0xd0e   :  { %v1742_v40 = vmul.f32 0.03125, %v1737_v38  ;;  %v1751_v59 = vmul.f32 %v1746_v15, %v1746_v15 }
 0xd10   :  { %v1747_v52 = vsub.f32 %v5185_v1, %v1742_v40  ;;  %v1762_v13 = vsel %vm71_vm1, %v1751_v59, 0.0 }
 0xd11   :  { %1763 = vadd.xlane.f32.xlu0 %v1762_v13 }
 0xd12   :  { %v1752_v16 = vmul.f32 %v1747_v52, %v1747_v52 }
 0xd14   :  { %v1765_v39 = vsel %vm204_vm2, %v1752_v16, 0.0 }
 0xd15   :  { %1766 = vadd.xlane.f32.xlu1 %v1765_v39 }
 0xd8e   :  { %v1755_v48 = vpop.xlane.xlu1 %1754 }
 0xd8f   :  { %v1768_v61 = vmul.f32 0.03125, %v1755_v48 }
 0xd91   :  { %v1773_v4 = vadd.f32 1e-06, %v1768_v61 }
 0xd92   :  { %v1758_v23 = vpop.xlane.xlu0 %1757 }
 0xd93   :  { %4288 = vrsqrt.f32 %v1773_v4  ;;  %v1769_v62 = vmul.f32 0.03125, %v1758_v23 }
 0xd95   :  { %v1774_v10 = vadd.f32 1e-06, %v1769_v62 }
 0xd96   :  { %v1761_v28 = vpop.xlane.xlu1 %1760 }
 0xd97   :  { %4290 = vrsqrt.f32 %v1774_v10  ;;  %v1770_v47 = vmul.f32 0.03125, %v1761_v28 }
 0xd99   :  { %v1775_v17 = vadd.f32 1e-06, %v1770_v47 }
 0xd9a   :  { %v1764_v20 = vpop.xlane.xlu0 %1763 }
 0xd9b   :  { %4292 = vrsqrt.f32 %v1775_v17  ;;  %v1771_v14 = vmul.f32 0.03125, %v1764_v20 }
 0xd9d   :  { %v1776_v51 = vadd.f32 1e-06, %v1771_v14 }
 0xd9e   :  { %v1767_v19 = vpop.xlane.xlu1 %1766 }
 0xd9f   :  { %4294 = vrsqrt.f32 %v1776_v51  ;;  %v1772_v22 = vmul.f32 0.03125, %v1767_v19 }
 0xda0   :  { %v4289_v63 = vpop.eup %4288 }
 0xda1   :  { %v1783_v32 = vmul.f32 %v4289_v63, %v1743_v58  ;;  %v1777_v30 = vadd.f32 1e-06, %v1772_v22 }
 0xda3   :  { %4296 = vrsqrt.f32 %v1777_v30  ;;  %v1792_v56 = vmul.f32 %v3393_v29, %v1783_v32 }
 0xda4   :  { %v4291_v36 = vpop.eup %4290 }
 0xda5   :  { %v1784_v42 = vmul.f32 %v4291_v36, %v1744_v53  ;;  %v1801_v7 = vadd.f32 %v3394_v43, %v1792_v56 }
 0xda7   :  { %v1793_v31 = vmul.f32 %v3393_v29, %v1784_v42 }
 0xda8   :  { %v4293_v37 = vpop.eup %4292 }
 0xda9   :  { %v1802_v21 = vadd.f32 %v3394_v43, %v1793_v31  ;;  %v1785_v5 = vmul.f32 %v4293_v37, %v1745_v45 }
 0xdab   :  { %v1811_v54 = vpack.c.bf16 %v1802_v21, %v1801_v7  ;;  %v1794_v3 = vmul.f32 %v3393_v29, %v1785_v5 }
 0xdac   :  { %v4295_v58 = vpop.eup %4294 }
 0xdad   :  { %3900 = vmatmul.mubr.msk.bf16.vlgmr.msra.gmra.mxu0 %vm71_vm1, %v1811_v54  ;;  %v1786_v34 = vmul.f32 %v4295_v58, %v1746_v15  ;;  %v1803_v9 = vadd.f32 %v3394_v43, %v1794_v3  ;;  %v3399_v15 = vld [vmem:[%s5772_s9 + $0x2] ss:$0 sm:$0xff] }
 0xdae   :  { %3903 = vmatprep.mubr.msk.bf16.mxu0 %vm4406_vm0, %v4405_v0 }
 0xdaf   :  { %v1795_v8 = vmul.f32 %v3393_v29, %v1786_v34 }
 0xdb0   :  { %v4297_v53 = vpop.eup %4296 }
 0xdb1   :  { %v1804_v49 = vadd.f32 %v3394_v43, %v1795_v8  ;;  %v1787_v46 = vmul.f32 %v4297_v53, %v1747_v52 }
 0xdb3   :  { %v1812_v6 = vpack.c.bf16 %v1804_v49, %v1803_v9  ;;  %v1796_v11 = vmul.f32 %v3393_v29, %v1787_v46 }
 0xdb5   :  { %3904 = vmatmul.mubr.msk.bf16.gmra.mxu0 %vm71_vm1, %v1812_v6  ;;  %v1805_v45 = vadd.f32 %v3394_v43, %v1796_v11 }
 0xdb6   :  { %3907 = vmatprep.mubr.msk.bf16.mxu0 %vm4406_vm0, %v4405_v0 }
 0xdb7   :  { %v1813_v44 = vpack.c.bf16 %v1805_v45, %v1805_v45 }
 0xdbd   :  { %3908 = vmatmul.mubr.msk.bf16.gmra.mxu0 %vm71_vm1, %v1813_v44 }
 0xdbe   :  { %3915 = vmatprep.mubr.msk.bf16.mxu0 %vm4406_vm0, %v4405_v0 }
 0xe6d   :  { %v1873_v38 = vpop.f32.mrf.mxu0 }
 0xe6e   :  { %v1874_v40 = vadd.f32 %v3399_v15, %v1873_v38  ;;  %v5312_v38 = vld [vmem:[%s5773_s2 + $0x8] sm:$0xff] }
 0xe6f   :  { %v3901_v59 = vpop.f32.mrf.mxu0 }
 0xe70   :  { %1903 = vrot.lane.b32.xlu0 %v1874_v40, %s4407_s15 }
 0xe71   :  { %v1876_v52 = vpop.f32.mrf.mxu0 }
 0xe72   :  { %v1877_v13 = vadd.f32 %v3399_v15, %v1876_v52 }
 0xe73   :  { %v3902_v16 = vpop.f32.mrf.mxu0 }
 0xe74   :  { %v5226_v39 = vpack.c.bf16 %v1877_v13, %v1874_v40  ;;  %1905 = vrot.lane.b32.xlu1 %v1877_v13, %s4407_s15 }
 0xe75   :  { %v1881_v18 = vpop.f32.mrf.mxu0 }
 0xe76   :  { %v1882_v60 = vadd.f32 %v3399_v15, %v1881_v18  ;;  %v1952_v7 = vmul.bf16 %v5226_v39, %v4612_v24  ;;  %v2081_v21 = vmul.bf16 %v5226_v39, %v4616_v25  ;;  %v2207_v53 = vmul.bf16 %v5226_v39, %v4618_v26 }
 0xe77   :  { %v3905_v48 = vpop.f32.mrf.mxu0  ;;  %v2078_v9 = vmul.bf16 %v5226_v39, %v4620_v27 }
 0xe78   :  { %1907 = vrot.lane.b32.xlu1 %v1882_v60, %s4407_s15 }
 0xe79   :  { %v1884_v61 = vpop.f32.mrf.mxu0 }
 0xe7a   :  { %v1885_v4 = vadd.f32 %v3399_v15, %v1884_v61 }
 0xe7b   :  { %v3906_v23 = vpop.f32.mrf.mxu0 }
 0xe7c   :  { %v5230_v62 = vpack.c.bf16 %v1885_v4, %v1882_v60  ;;  %1909 = vrot.lane.b32.xlu1 %v1885_v4, %s4407_s15  ;;  %v5321_v60 = vld [vmem:[%s5773_s2 + $0x10] sm:$0xff] }
 0xe7d   :  { %v1889_v10 = vpop.f32.mrf.mxu0 }
 0xe7e   :  { %v1890_v28 = vadd.f32 %v3399_v15, %v1889_v10  ;;  %v2208_v58 = vmul.bf16 %v5230_v62, %v4618_v26  ;;  %v2079_v34 = vmul.bf16 %v5230_v62, %v4620_v27  ;;  %v1953_v3 = vmul.bf16 %v5230_v62, %v4612_v24 }
 0xe7f   :  { %v3909_v47 = vpop.f32.mrf.mxu0  ;;  %v2082_v8 = vmul.bf16 %v5230_v62, %v4616_v25 }
 0xe80   :  { %1911 = vrot.lane.b32.xlu0 %v1890_v28, %s4407_s15  ;;  %v5236_v42 = vpack.c.bf16 %v1890_v28, %v1890_v28  ;;  %v5328_v47 = vld [vmem:[%s5773_s2 + $0x18] sm:$0xff] }
 0xe81   :  { %v1892_v17 = vpop.f32.mrf.mxu0 }
 0xe82   :  { %v2209_v31 = vmul.bf16 %v5236_v42, %v4618_v26  ;;  %v2080_v37 = vmul.bf16 %v5236_v42, %v4620_v27  ;;  %v1954_v26 = vmul.bf16 %v5236_v42, %v4612_v24  ;;  %v2083_v27 = vmul.bf16 %v5236_v42, %v4616_v25  ;;  %v5303_v24 = vld [vmem:[%s5773_s2] sm:$0xff] }
 0xe83   :  { %v3910_v20 = vpop.f32.mrf.mxu0 }
 0xe84   :  { %v2220_v5 = vsel %vm691_vm13, %v2209_v31, 0  ;;  %v2288_v54 = vsel %vm691_vm13, %v2080_v37, 0 }
 0xee2   :  { %v1904_v14 = vpop.permute.xlu0 %1903 }
 0xee3   :  { %1918 = vxpose.xlu1.b32.start [1/5] (short) (narrow) %v1904_v14, 32 }
 0xee6   :  { %v1906_v51 = vpop.permute.xlu1 %1905 }
 0xee7   :  { %1919 = vxpose.xlu1.b32.cont [2/5] (short) (narrow) %v1906_v51, 32 }
 0xeea   :  { %v1908_v19 = vpop.permute.xlu1 %1907 }
 0xeeb   :  { %1920 = vxpose.xlu1.b32.cont [3/5] (short) (narrow) %v1908_v19, 32 }
 0xeee   :  { %v1910_v22 = vpop.permute.xlu1 %1909 }
 0xeef   :  { %1921 = vxpose.xlu1.b32.cont [4/5] (short) (narrow) %v1910_v22, 32 }
 0xef2   :  { %v1912_v63 = vpop.permute.xlu0 %1911 }
 0xef3   :  { %1922 = vxpose.xlu1.b32.end [5/5] (short) (narrow) %v1912_v63, 32  ;;  %v5335_v63 = vld [vmem:[%s5773_s2 + $0x20] sm:$0x3] }
 0xf5f   :  { %v1934_v32 = vpop.trf.xlu1 }
 0xf63   :  { %v1935_v30 = vpop.trf.xlu1 }
 0xf64   :  { %v5242_v43 = vpack.c.bf16 %v1935_v30, %v1934_v32 }
 0xf67   :  { %v1936_v29 = vpop.trf.xlu1 }
 0xf6b   :  { %v1937_v36 = vpop.trf.xlu1 }
 0xf6c   :  { %v5234_v56 = vpack.c.bf16 %v1937_v36, %v1936_v29 }
 0xf6e   :  { %3912 = vmatpush3.bf16.msra.mxu0 %v5234_v56  ;;  %3928 = vmatpush3.bf16.msra.mxu1 %v5234_v56 }
 0xf6f   :  { %3913 = vmatprep.subr.bf16.mxu0 %v4405_v0  ;;  %3929 = vmatprep.subr.bf16.mxu1 %v4405_v0 }
 0xf72   :  { %3914 = vmatpush3.bf16.msra.mxu0 %v5242_v43  ;;  %3930 = vmatpush3.bf16.msra.mxu1 %v5242_v43 }
 0xf73   :  { %3943 = vmatprep.subr.bf16.mxu0 %v4405_v0  ;;  %3961 = vmatprep.subr.bf16.mxu1 %v4405_v0 }
 0xf75   :  { %3916 = vmatmul.mubr.msk.bf16.vlgmr.msra.gmra.mxu0 %vm71_vm1, %v1952_v7  ;;  %3932 = vmatmul.mubr.msk.bf16.vlgmr.msra.gmra.mxu1 %vm71_vm1, %v2081_v21 }
 0xf76   :  { %3944 = vmatpush3.bf16.msra.mxu0 %v2220_v5  ;;  %3962 = vmatpush3.bf16.msra.mxu1 %v2288_v54 }
 0xf77   :  { %3945 = vmatprep.subr.bf16.mxu0 %v4405_v0  ;;  %3963 = vmatprep.subr.bf16.mxu1 %v4405_v0 }
 0xf78   :  { %3919 = vmatprep.mubr.msk.bf16.mxu0 %vm4406_vm0, %v4405_v0  ;;  %3935 = vmatprep.mubr.msk.bf16.mxu1 %vm4406_vm0, %v4405_v0 }
 0xf7a   :  { %3946 = vmatpush3.bf16.msra.mxu0 %v2208_v58  ;;  %3964 = vmatpush3.bf16.msra.mxu1 %v2079_v34 }
 0xf7b   :  { %3947 = vmatprep.subr.bf16.mxu0 %v4405_v0  ;;  %3965 = vmatprep.subr.bf16.mxu1 %v4405_v0 }
 0xf7d   :  { %3920 = vmatmul.mubr.msk.bf16.gmra.mxu0 %vm71_vm1, %v1953_v3  ;;  %3936 = vmatmul.mubr.msk.bf16.gmra.mxu1 %vm71_vm1, %v2082_v8 }
 0xf7e   :  { %3948 = vmatpush3.bf16.msra.mxu0 %v2207_v53  ;;  %3966 = vmatpush3.bf16.msra.mxu1 %v2078_v9 }
 0xf7f   :  { %3923 = vmatprep.mubr.msk.bf16.mxu0 %vm4406_vm0, %v4405_v0  ;;  %3939 = vmatprep.mubr.msk.bf16.mxu1 %vm4406_vm0, %v4405_v0 }
 0xf80   :  { %3979 = vmatprep.subr.bf16.mxu0 %v4405_v0  ;;  %3995 = vmatprep.subr.bf16.mxu1 %v4405_v0 }
 0xf85   :  { %3924 = vmatmul.mubr.msk.bf16.gmra.mxu0 %vm71_vm1, %v1954_v26  ;;  %3940 = vmatmul.mubr.msk.bf16.gmra.mxu1 %vm71_vm1, %v2083_v27 }
 0xf86   :  { %3949 = vmatprep.mubr.msk.bf16.mxu0 %vm4406_vm0, %v4405_v0  ;;  %3967 = vmatprep.mubr.msk.bf16.mxu1 %vm4406_vm0, %v4405_v0 }
0x1035   :  { %v5298_v49 = vpop.f32.mrf.mxu0  ;;  %v2127_v46 = vpop.f32.mrf.mxu1 }
0x1036   :  { %v2128_v25 = vadd.f32 %v5303_v24, %v2127_v46 }
0x1037   :  { %v3917_v6 = vpop.f32.mrf.mxu0  ;;  %v3933_v11 = vpop.f32.mrf.mxu1 }
0x1038   :  { %v2149_v45 = vsel %vm490_vm14, %v2128_v25, -inf }
0x1039   :  { %2150 = vmax.xlane.f32.xlu0 %v2149_v45  ;;  %v5307_v44 = vpop.f32.mrf.mxu0  ;;  %v2130_v15 = vpop.f32.mrf.mxu1 }
0x103a   :  { %v2131_v40 = vadd.f32 %v5312_v38, %v2130_v15 }
0x103b   :  { %v3918_v59 = vpop.f32.mrf.mxu0  ;;  %v3934_v52 = vpop.f32.mrf.mxu1 }
0x103c   :  { %v2152_v13 = vsel %vm490_vm14, %v2131_v40, -inf }
0x103d   :  { %2153 = vmax.xlane.f32.xlu0 %v2152_v13  ;;  %v5316_v16 = vpop.f32.mrf.mxu0  ;;  %v2135_v18 = vpop.f32.mrf.mxu1 }
0x103e   :  { %v2136_v48 = vadd.f32 %v5321_v60, %v2135_v18 }
0x103f   :  { %v3921_v61 = vpop.f32.mrf.mxu0  ;;  %v3937_v4 = vpop.f32.mrf.mxu1 }
0x1040   :  { %v2155_v23 = vsel %vm490_vm14, %v2136_v48, -inf }
0x1041   :  { %2156 = vmax.xlane.f32.xlu0 %v2155_v23  ;;  %v2009_v10 = vpop.f32.mrf.mxu0  ;;  %v2138_v28 = vpop.f32.mrf.mxu1  ;;  %v5345_v23 = vadd.f32 %v5303_v24, %v5298_v49 }
0x1042   :  { %v2139_v17 = vadd.f32 %v5328_v47, %v2138_v28  ;;  %v5361_v49 = vadd.f32 %v5328_v47, %v2009_v10 }
0x1043   :  { %v3922_v20 = vpop.f32.mrf.mxu0  ;;  %v3938_v14 = vpop.f32.mrf.mxu1 }
0x1044   :  { %v2158_v51 = vsel %vm490_vm14, %v2139_v17, -inf  ;;  %v2020_v20 = vsel %vm490_vm14, %v5345_v23, -inf  ;;  %v5356_v14 = vadd.f32 %v5321_v60, %v5316_v16 }
0x1045   :  { %2159 = vmax.xlane.f32.xlu0 %v2158_v51  ;;  %v2014_v19 = vpop.f32.mrf.mxu0  ;;  %v2143_v22 = vpop.f32.mrf.mxu1 }
0x1046   :  { %v2144_v32 = vadd.f32 %v5335_v63, %v2143_v22  ;;  %v2026_v22 = vsel %vm490_vm14, %v5356_v14, -inf }
0x1047   :  { %v3925_v30 = vpop.f32.mrf.mxu0  ;;  %v3941_v29 = vpop.f32.mrf.mxu1 }
0x1048   :  { %v2161_v36 = vsel %vm503_vm15, %v2144_v32, -inf }
0x1049   :  { %2162 = vmax.xlane.f32.xlu0 %v2161_v36  ;;  %v2017_v31 = vpop.f32.mrf.mxu0  ;;  %v2146_v37 = vpop.f32.mrf.mxu1 }
0x104b   :  { %v3926_v7 = vpop.f32.mrf.mxu0  ;;  %v3942_v21 = vpop.f32.mrf.mxu1 }
0x10c2   :  { %v2151_v5 = vpop.xlane.xlu0 %2150 }
0x10c3   :  { %v2164_v54 = vsub.f32 %v2128_v25, %v2151_v5 }
0x10c5   :  { %v2169_v58 = vmul.f32 1.442695, %v2164_v54 }
0x10c6   :  { %v2154_v34 = vpop.xlane.xlu0 %2153 }
0x10c7   :  { %4298 = vpow2.f32 %v2169_v58  ;;  %v2165_v3 = vsub.f32 %v2131_v40, %v2154_v34 }
0x10c9   :  { %v2171_v8 = vmul.f32 1.442695, %v2165_v3 }
0x10ca   :  { %v2157_v53 = vpop.xlane.xlu0 %2156 }
0x10cb   :  { %4300 = vpow2.f32 %v2171_v8  ;;  %v2166_v9 = vsub.f32 %v2136_v48, %v2157_v53 }
0x10cd   :  { %v2173_v26 = vmul.f32 1.442695, %v2166_v9 }
0x10ce   :  { %v2160_v27 = vpop.xlane.xlu0 %2159 }
0x10cf   :  { %4302 = vpow2.f32 %v2173_v26  ;;  %v2167_v46 = vsub.f32 %v2139_v17, %v2160_v27  ;;  %v5350_v17 = vadd.f32 %v5312_v38, %v5307_v44  ;;  %v5366_v44 = vadd.f32 %v5335_v63, %v2014_v19 }
0x10d0   :  { %v2346_v27 = vmul.bf16 %v5226_v39, %v4768_v50 }
0x10d1   :  { %v2175_v6 = vmul.f32 1.442695, %v2167_v46  ;;  %v2023_v51 = vsel %vm490_vm14, %v5350_v17, -inf  ;;  %v2032_v16 = vsel %vm503_vm15, %v5366_v44, -inf  ;;  %v2347_v46 = vmul.bf16 %v5230_v62, %v4768_v50 }
0x10d2   :  { %v2163_v11 = vpop.xlane.xlu0 %2162 }
0x10d3   :  { %4304 = vpow2.f32 %v2175_v6  ;;  %v2168_v45 = vsub.f32 %v2144_v32, %v2163_v11  ;;  %v2029_v32 = vsel %vm490_vm14, %v5361_v49, -inf  ;;  %v2549_v6 = vmul.bf16 %v5230_v62, %v4792_v57 }
0x10d4   :  { %v4299_v15 = vpop.eup %4298 }
0x10d5   :  { %v2177_v59 = vmul.f32 1.442695, %v2168_v45  ;;  %v2179_v25 = vsel %vm490_vm14, %v4299_v15, 0.0 }
0x10d6   :  { %2180 = vadd.xlane.f32.xlu0 %v2179_v25 }
0x10d7   :  { %4306 = vpow2.f32 %v2177_v59 }
0x10d8   :  { %v4301_v52 = vpop.eup %4300 }
0x10d9   :  { %v2182_v40 = vsel %vm490_vm14, %v4301_v52, 0.0 }
0x10da   :  { %2183 = vadd.xlane.f32.xlu0 %v2182_v40 }
0x10dc   :  { %v4303_v13 = vpop.eup %4302 }
0x10dd   :  { %v2185_v18 = vsel %vm490_vm14, %v4303_v13, 0.0 }
0x10de   :  { %2186 = vadd.xlane.f32.xlu0 %v2185_v18 }
0x10e0   :  { %v4305_v48 = vpop.eup %4304 }
0x10e1   :  { %v2188_v61 = vsel %vm490_vm14, %v4305_v48, 0.0 }
0x10e2   :  { %2189 = vadd.xlane.f32.xlu1 %v2188_v61 }
0x10e4   :  { %v4307_v4 = vpop.eup %4306 }
0x10e5   :  { %v2191_v28 = vsel %vm503_vm15, %v4307_v4, 0.0 }
0x10e6   :  { %2192 = vadd.xlane.f32.xlu0 %v2191_v28 }
0x10ea   :  { %2021 = vmax.xlane.f32.xlu0 %v2020_v20 }
0x10ee   :  { %2024 = vmax.xlane.f32.xlu0 %v2023_v51 }
0x10f2   :  { %2027 = vmax.xlane.f32.xlu0 %v2026_v22 }
0x10f6   :  { %2030 = vmax.xlane.f32.xlu0 %v2029_v32 }
0x10fa   :  { %2033 = vmax.xlane.f32.xlu0 %v2032_v16 }
0x115f   :  { %v2181_v30 = vpop.xlane.xlu0 %2180 }
0x1160   :  { %4308 = vrcp.f32 %v2181_v30 }
0x1163   :  { %v2184_v29 = vpop.xlane.xlu0 %2183 }
0x1164   :  { %4310 = vrcp.f32 %v2184_v29 }
0x1167   :  { %v2187_v10 = vpop.xlane.xlu0 %2186 }
0x1168   :  { %4312 = vrcp.f32 %v2187_v10 }
0x116b   :  { %v2190_v36 = vpop.xlane.xlu1 %2189 }
0x116c   :  { %4314 = vrcp.f32 %v2190_v36 }
0x116d   :  { %v4309_v31 = vpop.eup %4308 }
0x116e   :  { %v2199_v7 = vmul.f32 %v4309_v31, %v4299_v15 }
0x116f   :  { %v2193_v37 = vpop.xlane.xlu0 %2192 }
0x1170   :  { %4316 = vrcp.f32 %v2193_v37 }
0x1171   :  { %v4311_v19 = vpop.eup %4310 }
0x1172   :  { %v2200_v21 = vmul.f32 %v4311_v19, %v4301_v52 }
0x1174   :  { %v2204_v5 = vpack.c.bf16 %v2200_v21, %v2199_v7 }
0x1175   :  { %v4313_v54 = vpop.eup %4312 }
0x1176   :  { %3950 = vmatmul.mubr.msk.bf16.vlgmr.msra.gmra.mxu0 %vm490_vm14, %v2204_v5  ;;  %v2201_v34 = vmul.f32 %v4313_v54, %v4303_v13 }
0x1177   :  { %3980 = vmatpush3.bf16.msra.mxu0 %v5234_v56  ;;  %3953 = vmatprep.mubr.msk.bf16.mxu0 %vm4406_vm0, %v4405_v0 }
0x1178   :  { %3981 = vmatprep.subr.bf16.mxu0 %v4405_v0 }
0x1179   :  { %v4315_v58 = vpop.eup %4314 }
0x117a   :  { %v2202_v3 = vmul.f32 %v4315_v58, %v4305_v48  ;;  %v2022_v48 = vpop.xlane.xlu0 %2021 }
0x117b   :  { %3982 = vmatpush3.bf16.msra.mxu0 %v5242_v43 }
0x117c   :  { %v2205_v8 = vpack.c.bf16 %v2202_v3, %v2201_v34  ;;  %4013 = vmatprep.subr.bf16.mxu0 %v4405_v0  ;;  %v2035_v34 = vsub.f32 %v5345_v23, %v2022_v48 }
0x117d   :  { %v4317_v53 = vpop.eup %4316 }
0x117e   :  { %3954 = vmatmul.mubr.msk.bf16.gmra.mxu0 %vm490_vm14, %v2205_v8  ;;  %v2203_v9 = vmul.f32 %v4317_v53, %v4307_v4  ;;  %v2025_v51 = vpop.xlane.xlu0 %2024 }
0x117f   :  { %3957 = vmatprep.mubr.msk.bf16.mxu0 %vm4406_vm0, %v4405_v0 }
0x1180   :  { %v2206_v26 = vpack.c.bf16 %v2203_v9, %v2203_v9  ;;  %v2036_v9 = vsub.f32 %v5350_v17, %v2025_v51 }
0x1182   :  { %v2028_v36 = vpop.xlane.xlu0 %2027 }
0x1186   :  { %3958 = vmatmul.mubr.msk.bf16.gmra.mxu0 %vm490_vm14, %v2206_v26  ;;  %v2031_v54 = vpop.xlane.xlu0 %2030 }
0x1187   :  { %3983 = vmatprep.mubr.msk.bf16.mxu0 %vm4406_vm0, %v4405_v0 }
0x118e   :  { %3984 = vmatmul.mubr.msk.bf16.vlgmr.msra.gmra.mxu0 %vm71_vm1, %v2346_v27  ;;  %v2040_v27 = vmul.f32 1.442695, %v2035_v34 }
0x118f   :  { %4014 = vmatpush3.bf16.msra.mxu0 %v5234_v56  ;;  %3987 = vmatprep.mubr.msk.bf16.mxu0 %vm4406_vm0, %v4405_v0  ;;  %v2348_v56 = vmul.bf16 %v5236_v42, %v4768_v50  ;;  %v2550_v50 = vmul.bf16 %v5236_v42, %v4792_v57 }
0x1190   :  { %4015 = vmatprep.subr.bf16.mxu0 %v4405_v0  ;;  %4318 = vpow2.f32 %v2040_v27 }
0x1193   :  { %4016 = vmatpush3.bf16.msra.mxu0 %v5242_v43  ;;  %v2548_v43 = vmul.bf16 %v5226_v39, %v4792_v57 }
0x1194   :  { %4047 = vmatprep.subr.bf16.mxu0 %v4405_v0 }
0x1196   :  { %3988 = vmatmul.mubr.msk.bf16.gmra.mxu0 %vm71_vm1, %v2347_v46  ;;  %v2037_v46 = vsub.f32 %v5356_v14, %v2028_v36 }
0x1197   :  { %3991 = vmatprep.mubr.msk.bf16.mxu0 %vm4406_vm0, %v4405_v0 }
0x119e   :  { %3992 = vmatmul.mubr.msk.bf16.gmra.mxu0 %vm71_vm1, %v2348_v56 }
0x119f   :  { %4017 = vmatprep.mubr.msk.bf16.mxu0 %vm4406_vm0, %v4405_v0 }
0x11a6   :  { %4018 = vmatmul.mubr.msk.bf16.vlgmr.msra.gmra.mxu0 %vm71_vm1, %v2548_v43  ;;  %v2034_v43 = vpop.xlane.xlu0 %2033 }
0x11a7   :  { %4021 = vmatprep.mubr.msk.bf16.mxu0 %vm4406_vm0, %v4405_v0 }
0x11ae   :  { %4022 = vmatmul.mubr.msk.bf16.gmra.mxu0 %vm71_vm1, %v2549_v6  ;;  %v2042_v6 = vmul.f32 1.442695, %v2036_v9 }
0x11af   :  { %4025 = vmatprep.mubr.msk.bf16.mxu0 %vm4406_vm0, %v4405_v0 }
0x11b0   :  { %4320 = vpow2.f32 %v2042_v6 }
0x11b6   :  { %4026 = vmatmul.mubr.msk.bf16.gmra.mxu0 %vm71_vm1, %v2550_v50  ;;  %v2038_v50 = vsub.f32 %v5361_v49, %v2031_v54 }
0x11b7   :  { %4063 = vmatprep.mubr.msk.bf16.mxu0 %vm4406_vm0, %v4405_v0 }
0x11b8   :  { %v2046_v14 = vmul.f32 1.442695, %v2038_v50 }
0x1236   :  { %v5419_v11 = vpop.f32.mrf.mxu0 }
0x1238   :  { %v3951_v45 = vpop.f32.mrf.mxu0 }
0x123a   :  { %v5421_v15 = vpop.f32.mrf.mxu0 }
0x123c   :  { %v3952_v59 = vpop.f32.mrf.mxu0 }
0x123d   :  { %v2044_v59 = vmul.f32 1.442695, %v2037_v46 }
0x123e   :  { %v5423_v25 = vpop.f32.mrf.mxu0 }
0x123f   :  { %4322 = vpow2.f32 %v2044_v59 }
0x1240   :  { %v3955_v52 = vpop.f32.mrf.mxu0  ;;  %4324 = vpow2.f32 %v2046_v14 }
0x1241   :  { %v2039_v52 = vsub.f32 %v5366_v44, %v2034_v43 }
0x1242   :  { %v5425_v40 = vpop.f32.mrf.mxu0 }
0x1243   :  { %v2048_v48 = vmul.f32 1.442695, %v2039_v52 }
0x1244   :  { %v3956_v13 = vpop.f32.mrf.mxu0 }
0x1245   :  { %4326 = vpow2.f32 %v2048_v48 }
0x1246   :  { %v5427_v18 = vpop.f32.mrf.mxu0 }
0x1248   :  { %v3959_v57 = vpop.f32.mrf.mxu0 }
0x124a   :  { %v2275_v61 = vpop.f32.mrf.mxu0 }
0x124c   :  { %v3960_v4 = vpop.f32.mrf.mxu0 }
0x124e   :  { %v2392_v28 = vpop.f32.mrf.mxu0 }
0x124f   :  { %v5430_v20 = vadd.f32 %v5303_v24, %v2392_v28 }
0x1250   :  { %v3985_v22 = vpop.f32.mrf.mxu0 }
0x1251   :  { %v2414_v32 = vsel %vm490_vm14, %v5430_v20, -inf }
0x1252   :  { %2415 = vmax.xlane.f32.xlu0 %v2414_v32  ;;  %v2395_v16 = vpop.f32.mrf.mxu0 }
0x1253   :  { %v5435_v30 = vadd.f32 %v5312_v38, %v2395_v16  ;;  %v5474_v16 = vpop.eup %4318 }
0x1254   :  { %v3986_v29 = vpop.f32.mrf.mxu0  ;;  %v5479_v36 = vpop.eup %4320 }
0x1255   :  { %v2417_v10 = vsel %vm490_vm14, %v5435_v30, -inf }
0x1256   :  { %2418 = vmax.xlane.f32.xlu0 %v2417_v10  ;;  %v2400_v31 = vpop.f32.mrf.mxu0 }
0x1257   :  { %v5440_v37 = vadd.f32 %v5321_v60, %v2400_v31  ;;  %v2050_v31 = vsel %vm490_vm14, %v5474_v16, 0.0 }
0x1258   :  { %v3989_v19 = vpop.f32.mrf.mxu0 }
0x1259   :  { %v2420_v7 = vsel %vm490_vm14, %v5440_v37, -inf  ;;  %v5485_v19 = vpop.eup %4322 }
0x125a   :  { %2421 = vmax.xlane.f32.xlu0 %v2420_v7  ;;  %v2403_v21 = vpop.f32.mrf.mxu0  ;;  %v5489_v54 = vpop.eup %4324 }
0x125b   :  { %v5445_v5 = vadd.f32 %v5328_v47, %v2403_v21  ;;  %v5495_v34 = vpop.eup %4326 }
0x125c   :  { %v3990_v58 = vpop.f32.mrf.mxu0  ;;  %v2062_v9 = vsel %vm503_vm15, %v5495_v34, 0.0 }
0x125d   :  { %v2423_v3 = vsel %vm490_vm14, %v5445_v5, -inf  ;;  %v2053_v58 = vsel %vm490_vm14, %v5479_v36, 0.0 }
0x125e   :  { %2424 = vmax.xlane.f32.xlu0 %v2423_v3  ;;  %v2408_v8 = vpop.f32.mrf.mxu0 }
0x125f   :  { %v5451_v53 = vadd.f32 %v5335_v63, %v2408_v8 }
0x1260   :  { %v3993_v26 = vpop.f32.mrf.mxu0 }
0x1261   :  { %v2426_v56 = vsel %vm503_vm15, %v5451_v53, -inf  ;;  %v2059_v26 = vsel %vm490_vm14, %v5489_v54, 0.0 }
0x1262   :  { %2427 = vmax.xlane.f32.xlu1 %v2426_v56  ;;  %v2411_v23 = vpop.f32.mrf.mxu0 }
0x1264   :  { %v3994_v45 = vpop.f32.mrf.mxu0 }
0x1266   :  { %v2594_v13 = vpop.f32.mrf.mxu0 }
0x1267   :  { %v5460_v17 = vadd.f32 %v5303_v24, %v2594_v13 }
0x1268   :  { %v4019_v57 = vpop.f32.mrf.mxu0 }
0x1269   :  { %v2616_v61 = vsel %vm490_vm14, %v5460_v17, -inf }
0x126a   :  { %2617 = vmax.xlane.f32.xlu0 %v2616_v61  ;;  %v2597_v4 = vpop.f32.mrf.mxu0 }
0x126b   :  { %v5465_v49 = vadd.f32 %v5312_v38, %v2597_v4 }
0x126c   :  { %v4020_v28 = vpop.f32.mrf.mxu0 }
0x126d   :  { %v2619_v24 = vsel %vm490_vm14, %v5465_v49, -inf }
0x126e   :  { %2620 = vmax.xlane.f32.xlu1 %v2619_v24  ;;  %v2602_v44 = vpop.f32.mrf.mxu0 }
0x126f   :  { %v5470_v51 = vadd.f32 %v5321_v60, %v2602_v44 }
0x1270   :  { %v4023_v22 = vpop.f32.mrf.mxu0 }
0x1271   :  { %v2622_v32 = vsel %vm490_vm14, %v5470_v51, -inf }
0x1272   :  { %2623 = vmax.xlane.f32.xlu0 %v2622_v32  ;;  %v2605_v38 = vpop.f32.mrf.mxu0 }
0x1273   :  { %v5477_v29 = vadd.f32 %v5328_v47, %v2605_v38  ;;  %v2056_v47 = vsel %vm490_vm14, %v5485_v19, 0.0 }
0x1274   :  { %v4024_v10 = vpop.f32.mrf.mxu0 }
0x1275   :  { %v2625_v60 = vsel %vm490_vm14, %v5477_v29, -inf }
0x1276   :  { %2051 = vadd.xlane.f32.xlu0 %v2050_v31  ;;  %2626 = vmax.xlane.f32.xlu1 %v2625_v60  ;;  %v5487_v7 = vpop.f32.mrf.mxu0 }
0x1278   :  { %v4027_v21 = vpop.f32.mrf.mxu0 }
0x127a   :  { %2057 = vadd.xlane.f32.xlu0 %v2056_v47  ;;  %2054 = vadd.xlane.f32.xlu1 %v2053_v58  ;;  %v2613_v3 = vpop.f32.mrf.mxu0 }
0x127c   :  { %v4028_v8 = vpop.f32.mrf.mxu0 }
0x127e   :  { %2063 = vadd.xlane.f32.xlu0 %v2062_v9  ;;  %2060 = vadd.xlane.f32.xlu1 %v2059_v26 }
0x12db   :  { %v2416_v27 = vpop.xlane.xlu0 %2415 }
0x12dc   :  { %v2429_v46 = vsub.f32 %v5430_v20, %v2416_v27 }
0x12de   :  { %v2434_v56 = vmul.f32 1.442695, %v2429_v46 }
0x12df   :  { %v2419_v43 = vpop.xlane.xlu0 %2418 }
0x12e0   :  { %4328 = vpow2.f32 %v2434_v56  ;;  %v2430_v23 = vsub.f32 %v5435_v30, %v2419_v43 }
0x12e2   :  { %v2436_v6 = vmul.f32 1.442695, %v2430_v23 }
0x12e3   :  { %v2422_v50 = vpop.xlane.xlu0 %2421 }
0x12e4   :  { %4330 = vpow2.f32 %v2436_v6  ;;  %v2431_v45 = vsub.f32 %v5440_v37, %v2422_v50  ;;  %v5542_v6 = vadd.f32 %v5335_v63, %v5487_v7 }
0x12e6   :  { %v2438_v59 = vmul.f32 1.442695, %v2431_v45 }
0x12e7   :  { %v2425_v52 = vpop.xlane.xlu0 %2424 }
0x12e8   :  { %4332 = vpow2.f32 %v2438_v59  ;;  %v2432_v13 = vsub.f32 %v5445_v5, %v2425_v52 }
0x12ea   :  { %v2440_v14 = vmul.f32 1.442695, %v2432_v13 }
0x12eb   :  { %v2428_v57 = vpop.xlane.xlu1 %2427 }
0x12ec   :  { %4334 = vpow2.f32 %v2440_v14  ;;  %v2433_v20 = vsub.f32 %v5451_v53, %v2428_v57  ;;  %v2628_v14 = vsel %vm503_vm15, %v5542_v6, -inf }
0x12ed   :  { %v5506_v48 = vpop.eup %4328 }
0x12ee   :  { %v2442_v61 = vmul.f32 1.442695, %v2433_v20  ;;  %v2444_v30 = vsel %vm490_vm14, %v5506_v48, 0.0  ;;  %v2474_v20 = vmul.bf16 %v5236_v42, %v4947_v55 }
0x12ef   :  { %2445 = vadd.xlane.f32.xlu1 %v2444_v30 }
0x12f0   :  { %4336 = vpow2.f32 %v2442_v61 }
0x12f1   :  { %v5510_v4 = vpop.eup %4330 }
0x12f2   :  { %v2447_v37 = vsel %vm490_vm14, %v5510_v4, 0.0 }
0x12f3   :  { %v2618_v28 = vpop.xlane.xlu0 %2617  ;;  %2448 = vadd.xlane.f32.xlu0 %v2447_v37  ;;  %v2485_v37 = vsel %vm691_vm13, %v2474_v20, 0 }
0x12f4   :  { %v2631_v5 = vsub.f32 %v5460_v17, %v2618_v28 }
0x12f5   :  { %v5515_v24 = vpop.eup %4332 }
0x12f6   :  { %v2636_v53 = vmul.f32 1.442695, %v2631_v5  ;;  %v2450_v44 = vsel %vm490_vm14, %v5515_v24, 0.0 }
0x12f7   :  { %v2621_v22 = vpop.xlane.xlu1 %2620  ;;  %2451 = vadd.xlane.f32.xlu1 %v2450_v44 }
0x12f8   :  { %4338 = vpow2.f32 %v2636_v53  ;;  %v2632_v32 = vsub.f32 %v5465_v49, %v2621_v22  ;;  %v2472_v22 = vmul.bf16 %v5226_v39, %v4947_v55 }
0x12f9   :  { %v5520_v38 = vpop.eup %4334 }
0x12fa   :  { %v2638_v10 = vmul.f32 1.442695, %v2632_v32  ;;  %v2453_v31 = vsel %vm490_vm14, %v5520_v38, 0.0 }
0x12fb   :  { %2454 = vadd.xlane.f32.xlu0 %v2453_v31  ;;  %v2624_v60 = vpop.xlane.xlu0 %2623 }
0x12fc   :  { %4340 = vpow2.f32 %v2638_v10  ;;  %v2633_v17 = vsub.f32 %v5470_v51, %v2624_v60 }
0x12fd   :  { %v5525_v21 = vpop.eup %4336 }
0x12fe   :  { %v2640_v47 = vmul.f32 1.442695, %v2633_v17  ;;  %v2456_v58 = vsel %vm503_vm15, %v5525_v21, 0.0 }
0x12ff   :  { %2457 = vadd.xlane.f32.xlu1 %v2456_v58  ;;  %v2627_v3 = vpop.xlane.xlu1 %2626  ;;  %v2052_v49 = vpop.xlane.xlu0 %2051 }
0x1300   :  { %4342 = vpow2.f32 %v2640_v47  ;;  %v2634_v8 = vsub.f32 %v5477_v29, %v2627_v3  ;;  %v2676_v3 = vmul.bf16 %v5236_v42, %v4976_v41 }
0x1301   :  { %4344 = vrcp.f32 %v2052_v49 }
0x1302   :  { %v2642_v9 = vmul.f32 1.442695, %v2634_v8  ;;  %v2687_v8 = vsel %vm691_vm13, %v2676_v3, 0 }
0x1303   :  { %v2055_v26 = vpop.xlane.xlu1 %2054  ;;  %v2058_v43 = vpop.xlane.xlu0 %2057 }
0x1304   :  { %4346 = vpow2.f32 %v2642_v9 }
0x1305   :  { %v5530_v27 = vpop.eup %4338  ;;  %4348 = vrcp.f32 %v2055_v26 }
0x1306   :  { %v2646_v51 = vsel %vm490_vm14, %v5530_v27, 0.0 }
0x1307   :  { %2647 = vadd.xlane.f32.xlu0 %v2646_v51  ;;  %v2061_v46 = vpop.xlane.xlu1 %2060  ;;  %v2064_v45 = vpop.xlane.xlu0 %2063 }
0x1308   :  { %4350 = vrcp.f32 %v2061_v46 }
0x1309   :  { %v5534_v56 = vpop.eup %4340  ;;  %4352 = vrcp.f32 %v2058_v43 }
0x130a   :  { %v2649_v23 = vsel %vm490_vm14, %v5534_v56, 0.0  ;;  %4354 = vrcp.f32 %v2064_v45 }
0x130b   :  { %2650 = vadd.xlane.f32.xlu1 %v2649_v23 }
0x130d   :  { %v5538_v29 = vpop.eup %4342 }
0x130e   :  { %v2652_v50 = vsel %vm490_vm14, %v5538_v29, 0.0  ;;  %v4345_v59 = vpop.eup %4344 }
0x130f   :  { %2653 = vadd.xlane.f32.xlu0 %v2652_v50  ;;  %v2070_v63 = vmul.f32 %v4345_v59, %v5474_v16  ;;  %v2674_v50 = vmul.bf16 %v5226_v39, %v4976_v41 }
0x1311   :  { %v5546_v52 = vpop.eup %4346 }
0x1312   :  { %v2655_v13 = vsel %vm490_vm14, %v5546_v52, 0.0  ;;  %v4349_v57 = vpop.eup %4348 }
0x1313   :  { %2656 = vadd.xlane.f32.xlu1 %v2655_v13  ;;  %2629 = vmax.xlane.f32.xlu0 %v2628_v14  ;;  %v2071_v7 = vmul.f32 %v4349_v57, %v5479_v36  ;;  %v2473_v36 = vmul.bf16 %v5230_v62, %v4947_v55 }
0x1315   :  { %v2075_v61 = vpack.c.bf16 %v2071_v7, %v2070_v63  ;;  %v4351_v30 = vpop.eup %4350 }
0x1316   :  { %v4353_v28 = vpop.eup %4352  ;;  %v2073_v16 = vmul.f32 %v4351_v30, %v5489_v54 }
0x1317   :  { %3968 = vmatmul.mubr.msk.bf16.vlgmr.msra.gmra.mxu1 %vm490_vm14, %v2075_v61  ;;  %v2072_v5 = vmul.f32 %v4353_v28, %v5485_v19  ;;  %v4355_v44 = vpop.eup %4354  ;;  %v4160_v28 = vld [vmem:[%s5774_s5 + $0x68] sm:$0xff]  }
0x1318   :  { %3996 = vmatpush3.bf16.msra.mxu1 %v2485_v37  ;;  %3971 = vmatprep.mubr.msk.bf16.mxu1 %vm4406_vm0, %v4405_v0  ;;  %v2074_v54 = vmul.f32 %v4355_v44, %v5495_v34 }
0x1319   :  { %3997 = vmatprep.subr.bf16.mxu1 %v4405_v0  ;;  %v2076_v53 = vpack.c.bf16 %v2073_v16, %v2072_v5  ;;  %v4161_v5 = vld [vmem:[%s5774_s5 + $0x60] sm:$0xff]  }
0x131a   :  { %v2077_v32 = vpack.c.bf16 %v2074_v54, %v2074_v54 }
0x131c   :  { %3998 = vmatpush3.bf16.msra.mxu1 %v2473_v36 }
0x131d   :  { %3999 = vmatprep.subr.bf16.mxu1 %v4405_v0 }
0x131f   :  { %3972 = vmatmul.mubr.msk.bf16.gmra.mxu1 %vm490_vm14, %v2076_v53 }
0x1320   :  { %4000 = vmatpush3.bf16.msra.mxu1 %v2472_v22  ;;  %3975 = vmatprep.mubr.msk.bf16.mxu1 %vm4406_vm0, %v4405_v0  ;;  %v4162_v22 = vld [vmem:[%s5774_s5 + $0x58] sm:$0xff]  }
0x1321   :  { %4029 = vmatprep.subr.bf16.mxu1 %v4405_v0 }
0x1327   :  { %3976 = vmatmul.mubr.msk.bf16.gmra.mxu1 %vm490_vm14, %v2077_v32 }
0x1328   :  { %4001 = vmatprep.mubr.msk.bf16.mxu1 %vm4406_vm0, %v4405_v0 }
0x1378   :  { %v2446_v19 = vpop.xlane.xlu1 %2445 }
0x1379   :  { %4356 = vrcp.f32 %v2446_v19  ;;  %v4163_v19 = vld [vmem:[%s5774_s5 + $0x50] sm:$0xff]  }
0x137c   :  { %v2449_v10 = vpop.xlane.xlu0 %2448 }
0x137d   :  { %4358 = vrcp.f32 %v2449_v10 }
0x1380   :  { %v2452_v55 = vpop.xlane.xlu1 %2451 }
0x1381   :  { %4360 = vrcp.f32 %v2452_v55 }
0x1384   :  { %v2455_v31 = vpop.xlane.xlu0 %2454 }
0x1385   :  { %4362 = vrcp.f32 %v2455_v31  ;;  %v4164_v31 = vld [vmem:[%s5774_s5 + $0x48] sm:$0xff]  }
0x1386   :  { %v4357_v60 = vpop.eup %4356 }
0x1387   :  { %v2464_v47 = vmul.f32 %v4357_v60, %v5506_v48  ;;  %v2675_v48 = vmul.bf16 %v5230_v62, %v4976_v41 }
0x1388   :  { %v2458_v17 = vpop.xlane.xlu1 %2457 }
0x1389   :  { %4364 = vrcp.f32 %v2458_v17 }
0x138a   :  { %v4359_v34 = vpop.eup %4358 }
0x138b   :  { %v2465_v58 = vmul.f32 %v4359_v34, %v5510_v4 }
0x138d   :  { %v2469_v49 = vpack.c.bf16 %v2465_v58, %v2464_v47  ;;  %v4165_v47 = vld [vmem:[%s5774_s5 + $0x40] sm:$0xff]  }
0x138e   :  { %v4361_v9 = vpop.eup %4360 }
0x138f   :  { %4002 = vmatmul.mubr.msk.bf16.vlgmr.msra.gmra.mxu1 %vm490_vm14, %v2469_v49  ;;  %v2466_v42 = vmul.f32 %v4361_v9, %v5515_v24 }
0x1390   :  { %4030 = vmatpush3.bf16.msra.mxu1 %v2687_v8  ;;  %v2648_v26 = vpop.xlane.xlu0 %2647  ;;  %4005 = vmatprep.mubr.msk.bf16.mxu1 %vm4406_vm0, %v4405_v0 }
0x1391   :  { %4031 = vmatprep.subr.bf16.mxu1 %v4405_v0  ;;  %4366 = vrcp.f32 %v2648_v26 }
0x1392   :  { %v4363_v51 = vpop.eup %4362 }
0x1393   :  { %v2467_v4 = vmul.f32 %v4363_v51, %v5520_v38 }
0x1394   :  { %4032 = vmatpush3.bf16.msra.mxu1 %v2675_v48  ;;  %v2651_v46 = vpop.xlane.xlu1 %2650 }
0x1395   :  { %4368 = vrcp.f32 %v2651_v46  ;;  %4033 = vmatprep.subr.bf16.mxu1 %v4405_v0  ;;  %v2470_v43 = vpack.c.bf16 %v2467_v4, %v2466_v42 }
0x1396   :  { %v4365_v23 = vpop.eup %4364 }
0x1397   :  { %4006 = vmatmul.mubr.msk.bf16.gmra.mxu1 %vm490_vm14, %v2470_v43  ;;  %v2468_v62 = vmul.f32 %v4365_v23, %v5525_v21 }
0x1398   :  { %4034 = vmatpush3.bf16.msra.mxu1 %v2674_v50  ;;  %v2654_v45 = vpop.xlane.xlu0 %2653  ;;  %4009 = vmatprep.mubr.msk.bf16.mxu1 %vm4406_vm0, %v4405_v0 }
0x1399   :  { %4075 = vmatprep.subr.bf16.mxu1 %v4405_v0  ;;  %4370 = vrcp.f32 %v2654_v45  ;;  %v2471_v13 = vpack.c.bf16 %v2468_v62, %v2468_v62 }
0x139c   :  { %v2657_v24 = vpop.xlane.xlu1 %2656  ;;  %v2630_v38 = vpop.xlane.xlu0 %2629 }
0x139d   :  { %4372 = vrcp.f32 %v2657_v24  ;;  %v2635_v59 = vsub.f32 %v5542_v6, %v2630_v38 }
0x139e   :  { %v4367_v41 = vpop.eup %4366 }
0x139f   :  { %v2644_v14 = vmul.f32 1.442695, %v2635_v59  ;;  %4010 = vmatmul.mubr.msk.bf16.gmra.mxu1 %vm490_vm14, %v2471_v13  ;;  %v2666_v21 = vmul.f32 %v4367_v41, %v5530_v27 }
0x13a0   :  { %4035 = vmatprep.mubr.msk.bf16.mxu1 %vm4406_vm0, %v4405_v0 }
0x13a1   :  { %4374 = vpow2.f32 %v2644_v14 }
0x13a2   :  { %v4369_v39 = vpop.eup %4368 }
0x13a3   :  { %v2667_v57 = vmul.f32 %v4369_v39, %v5534_v56  ;;  %v4158_v56 = vld [vmem:[%s5774_s5 + $0x78] sm:$0xff]  }
0x13a4   :  { %4048 = vmatpush3.bf16.msra.mxu0 %v4158_v56 }
0x13a5   :  { %v2671_v63 = vpack.c.bf16 %v2667_v57, %v2666_v21  ;;  %4049 = vmatprep.subr.bf16.mxu0 %v4405_v0 }
0x13a6   :  { %v4371_v7 = vpop.eup %4370 }
0x13a7   :  { %4036 = vmatmul.mubr.msk.bf16.vlgmr.msra.gmra.mxu1 %vm490_vm14, %v2671_v63  ;;  %v2668_v20 = vmul.f32 %v4371_v7, %v5538_v29  ;;  %v4159_v29 = vld [vmem:[%s5774_s5 + $0x70] sm:$0xff]  }
0x13a8   :  { %4039 = vmatprep.mubr.msk.bf16.mxu1 %vm4406_vm0, %v4405_v0  ;;  %4050 = vmatpush3.bf16.msra.mxu0 %v4159_v29 }
0x13a9   :  { %4051 = vmatprep.subr.bf16.mxu0 %v4405_v0 }
0x13aa   :  { %v4373_v6 = vpop.eup %4372 }
0x13ab   :  { %v2669_v61 = vmul.f32 %v4373_v6, %v5546_v52 }
0x13ac   :  { %4052 = vmatpush3.bf16.msra.mxu0 %v4160_v28 }
0x13ad   :  { %v2672_v30 = vpack.c.bf16 %v2669_v61, %v2668_v20  ;;  %4053 = vmatprep.subr.bf16.mxu0 %v4405_v0 }
0x13ae   :  { %v4375_v37 = vpop.eup %4374 }
0x13af   :  { %4040 = vmatmul.mubr.msk.bf16.gmra.mxu1 %vm490_vm14, %v2672_v30  ;;  %v2658_v27 = vsel %vm503_vm15, %v4375_v37, 0.0 }
0x13b0   :  { %2659 = vadd.xlane.f32.xlu1 %v2658_v27  ;;  %4043 = vmatprep.mubr.msk.bf16.mxu1 %vm4406_vm0, %v4405_v0 }
0x13b1   :  { %4054 = vmatpush3.bf16.msra.mxu0 %v4161_v5 }
0x13b2   :  { %4055 = vmatprep.subr.bf16.mxu0 %v4405_v0 }
0x13b5   :  { %4056 = vmatpush3.bf16.msra.mxu0 %v4162_v22 }
0x13b6   :  { %4057 = vmatprep.subr.bf16.mxu0 %v4405_v0 }
0x13b9   :  { %4058 = vmatpush3.bf16.msra.mxu0 %v4163_v19 }
0x13ba   :  { %4059 = vmatprep.subr.bf16.mxu0 %v4405_v0 }
0x13bd   :  { %4060 = vmatpush3.bf16.msra.mxu0 %v4164_v31 }
0x13be   :  { %4061 = vmatprep.subr.bf16.mxu0 %v4405_v0 }
0x13c1   :  { %4062 = vmatpush3.bf16.msra.mxu0 %v4165_v47 }
0x13c2   :  { %4119 = vmatprep.subr.bf16.mxu0 %v4405_v0 }
0x13d7   :  { %v2324_v52 = vpop.f32.mrf.mxu1 }
0x13d8   :  { %v2325_v13 = vadd.f32 %v2324_v52, %v5419_v11 }
0x13d9   :  { %v3969_v16 = vpop.f32.mrf.mxu1 }
0x13db   :  { %v2327_v36 = vpop.f32.mrf.mxu1 }
0x13dc   :  { %v2328_v14 = vadd.f32 %v2327_v36, %v5421_v15 }
0x13dd   :  { %v3970_v53 = vpop.f32.mrf.mxu1 }
0x13df   :  { %v2332_v44 = vpop.f32.mrf.mxu1 }
0x13e1   :  { %v3973_v54 = vpop.f32.mrf.mxu1 }
0x13e3   :  { %v2335_v32 = vpop.f32.mrf.mxu1 }
0x13e4   :  { %v2336_v30 = vadd.f32 %v2335_v32, %v5425_v40 }
0x13e5   :  { %v3974_v10 = vpop.f32.mrf.mxu1 }
0x13e7   :  { %v2340_v55 = vpop.f32.mrf.mxu1 }
0x13e8   :  { %v2341_v23 = vadd.f32 %v2340_v55, %v5427_v18  ;;  %v2333_v18 = vadd.f32 %v2332_v44, %v5423_v25  ;;  %v3453_v44 = vld [vmem:[%s5771_s8 + $0xa] ss:$0 sm:$0xff] }
0x13e9   :  { %v3977_v60 = vpop.f32.mrf.mxu1 }
0x13eb   :  { %v2343_v17 = vpop.f32.mrf.mxu1 }
0x13ed   :  { %v3978_v34 = vpop.f32.mrf.mxu1 }
0x1439   :  { %v2660_v58 = vpop.xlane.xlu1 %2659 }
0x143a   :  { %4376 = vrcp.f32 %v2660_v58 }
0x1447   :  { %v4377_v3 = vpop.eup %4376 }
0x1448   :  { %v2670_v49 = vmul.f32 %v4377_v3, %v4375_v37 }
0x144a   :  { %v2673_v8 = vpack.c.bf16 %v2670_v49, %v2670_v49 }
0x144c   :  { %4044 = vmatmul.mubr.msk.bf16.gmra.mxu1 %vm490_vm14, %v2673_v8 }
0x144d   :  { %4079 = vmatprep.mubr.msk.bf16.mxu1 %vm4406_vm0, %v4405_v0 }
0x144f   :  { %v2521_v9 = vpop.f32.mrf.mxu1 }
0x1450   :  { %v2543_v39 = vadd.f32 %v2521_v9, %v2325_v13 }
0x1451   :  { %v4003_v26 = vpop.f32.mrf.mxu1 }
0x1453   :  { %v2524_v51 = vpop.f32.mrf.mxu1 }
0x1454   :  { %v2544_v21 = vadd.f32 %v2524_v51, %v2328_v14 }
0x1455   :  { %v4004_v48 = vpop.f32.mrf.mxu1 }
0x1457   :  { %v2529_v42 = vpop.f32.mrf.mxu1 }
0x1458   :  { %v2545_v11 = vadd.f32 %v2529_v42, %v2333_v18 }
0x1459   :  { %v4007_v4 = vpop.f32.mrf.mxu1 }
0x145b   :  { %v2532_v46 = vpop.f32.mrf.mxu1 }
0x145c   :  { %v2546_v15 = vadd.f32 %v2532_v46, %v2336_v30 }
0x145d   :  { %v4008_v43 = vpop.f32.mrf.mxu1 }
0x145f   :  { %v2537_v50 = vpop.f32.mrf.mxu1 }
0x1460   :  { %v2547_v45 = vadd.f32 %v2537_v50, %v2341_v23 }
0x1461   :  { %v4011_v62 = vpop.f32.mrf.mxu1 }
0x1463   :  { %v2540_v24 = vpop.f32.mrf.mxu1 }
0x1465   :  { %v4012_v38 = vpop.f32.mrf.mxu1 }
0x1467   :  { %v2723_v59 = vpop.f32.mrf.mxu1 }
0x1468   :  { %v2745_v63 = vadd.f32 %v2723_v59, %v2543_v39 }
0x1469   :  { %v4037_v41 = vpop.f32.mrf.mxu1 }
0x146b   :  { %v2726_v57 = vpop.f32.mrf.mxu1 }
0x146c   :  { %v2746_v7 = vadd.f32 %v2726_v57, %v2544_v21 }
0x146d   :  { %v4038_v6 = vpop.f32.mrf.mxu1 }
0x146e   :  { %v2767_v20 = vpack.c.bf16 %v2746_v7, %v2745_v63 }
0x146f   :  { %v2731_v61 = vpop.f32.mrf.mxu1 }
0x1470   :  { %4064 = vmatmul.mubr.bf16.vlgmr.msra.gmra.mxu0 %v2767_v20  ;;  %v2747_v56 = vadd.f32 %v2731_v61, %v2545_v11 }
0x1471   :  { %v4041_v37 = vpop.f32.mrf.mxu1  ;;  %4067 = vmatprep.mubr.msk.bf16.mxu0 %vm4406_vm0, %v4405_v0 }
0x1472   :  { %v4166_v37 = vld [vmem:[%s5775_s6 + $0x18] sm:$0xff]  }
0x1473   :  { %v2734_v27 = vpop.f32.mrf.mxu1  ;;  %4076 = vmatpush3.bf16.msra.mxu1 %v4166_v37 }
0x1474   :  { %v2748_v29 = vadd.f32 %v2734_v27, %v2546_v15  ;;  %4077 = vmatprep.subr.bf16.mxu1 %v4405_v0 }
0x1475   :  { %v4042_v52 = vpop.f32.mrf.mxu1 }
0x1476   :  { %v2768_v28 = vpack.c.bf16 %v2748_v29, %v2747_v56 }
0x1478   :  { %4068 = vmatmul.mubr.bf16.gmra.mxu0 %v2768_v28 }
0x1479   :  { %4071 = vmatprep.mubr.msk.bf16.mxu0 %vm4406_vm0, %v4405_v0 }
0x150c   :  { %v2739_v16 = vpop.f32.mrf.mxu1 }
0x150d   :  { %v2749_v25 = vadd.f32 %v2739_v16, %v2547_v45 }
0x150e   :  { %v4045_v36 = vpop.f32.mrf.mxu1 }
0x150f   :  { %v2769_v40 = vpack.c.bf16 %v2749_v25, %v2749_v25 }
0x1510   :  { %v2742_v5 = vpop.f32.mrf.mxu1 }
0x1511   :  { %4072 = vmatmul.mubr.bf16.gmra.mxu0 %v2769_v40 }
0x1512   :  { %v4046_v53 = vpop.f32.mrf.mxu1  ;;  %4123 = vmatprep.mubr.msk.bf16.mxu0 %vm4406_vm0, %v4405_v0 }
0x1530   :  { %v2852_v22 = vpop.f32.mrf.mxu0 }
0x1531   :  { %v2874_v54 = vadd.f32 %v2852_v22, %v5165_v12 }
0x1532   :  { %v4065_v32 = vpop.f32.mrf.mxu0 }
0x1533   :  { %v5662_v19 = vadd.f32 %v3453_v44, %v2874_v54 }
0x1534   :  { %v2855_v10 = vpop.f32.mrf.mxu0 }
0x1535   :  { %v2875_v55 = vadd.f32 %v2855_v10, %v5170_v2  ;;  %v2888_v31 = vsel %vm71_vm1, %v5662_v19, 0.0  ;;  %v3454_v10 = vld [vmem:[%s5771_s8 + $0xb] ss:$0 sm:$0xff] }
0x1536   :  { %2889 = vadd.xlane.f32.xlu0 %v2888_v31  ;;  %v4066_v60 = vpop.f32.mrf.mxu0 }
0x1537   :  { %v2884_v17 = vadd.f32 %v3453_v44, %v2875_v55 }
0x1538   :  { %v2860_v34 = vpop.f32.mrf.mxu0 }
0x1539   :  { %v2876_v47 = vadd.f32 %v2860_v34, %v5175_v33  ;;  %v2891_v58 = vsel %vm71_vm1, %v2884_v17, 0.0 }
0x153a   :  { %2892 = vadd.xlane.f32.xlu1 %v2891_v58  ;;  %v4069_v3 = vpop.f32.mrf.mxu0 }
0x153b   :  { %v5669_v12 = vadd.f32 %v3453_v44, %v2876_v47  ;;  %v3455_v47 = vld [vmem:[%s5771_s8 + $0xc] ss:$0 sm:$0xff] }
0x153c   :  { %v2863_v49 = vpop.f32.mrf.mxu0 }
0x153d   :  { %v2877_v8 = vadd.f32 %v2863_v49, %v5180_v35  ;;  %v2894_v2 = vsel %vm71_vm1, %v5669_v12, 0.0 }
0x153e   :  { %2895 = vadd.xlane.f32.xlu0 %v2894_v2  ;;  %v4070_v9 = vpop.f32.mrf.mxu0 }
0x153f   :  { %v2886_v26 = vadd.f32 %v3453_v44, %v2877_v8 }
0x1541   :  { %v2897_v51 = vsel %vm71_vm1, %v2886_v26, 0.0 }
0x1542   :  { %2898 = vadd.xlane.f32.xlu1 %v2897_v51 }
0x15bf   :  { %v2890_v48 = vpop.xlane.xlu0 %2889 }
0x15c0   :  { %v2903_v33 = vmul.f32 0.03125, %v2890_v48 }
0x15c2   :  { %v2908_v42 = vsub.f32 %v5662_v19, %v2903_v33 }
0x15c3   :  { %v2893_v4 = vpop.xlane.xlu1 %2892 }
0x15c4   :  { %v2904_v46 = vmul.f32 0.03125, %v2893_v4  ;;  %v2913_v43 = vmul.f32 %v2908_v42, %v2908_v42 }
0x15c6   :  { %v2909_v23 = vsub.f32 %v2884_v17, %v2904_v46  ;;  %v2918_v50 = vsel %vm71_vm1, %v2913_v43, 0.0  ;;  %v4168_v43 = vld [vmem:[%s5776_s7 + $0x78] sm:$0xff]  }
0x15c7   :  { %2919 = vadd.xlane.f32.xlu0 %v2918_v50  ;;  %v2896_v35 = vpop.xlane.xlu0 %2895  ;;  %v4170_v50 = vld [vmem:[%s5776_s7 + $0x68] sm:$0xff]  }
0x15c8   :  { %v2905_v45 = vmul.f32 0.03125, %v2896_v35  ;;  %v2914_v62 = vmul.f32 %v2909_v23, %v2909_v23  ;;  %v4171_v35 = vld [vmem:[%s5776_s7 + $0x60] sm:$0xff]  }
0x15ca   :  { %v2910_v24 = vsub.f32 %v5669_v12, %v2905_v45  ;;  %v2921_v38 = vsel %vm71_vm1, %v2914_v62, 0.0  ;;  %v4172_v45 = vld [vmem:[%s5776_s7 + $0x58] sm:$0xff]   ;;  %v4173_v62 = vld [vmem:[%s5776_s7 + $0x50] sm:$0xff]  }
0x15cb   :  { %2922 = vadd.xlane.f32.xlu1 %v2921_v38  ;;  %v2899_v59 = vpop.xlane.xlu1 %2898  ;;  %v4175_v38 = vld [vmem:[%s5776_s7 + $0x40] sm:$0xff]  }
0x15cc   :  { %v2906_v13 = vmul.f32 0.03125, %v2899_v59  ;;  %v2915_v14 = vmul.f32 %v2910_v24, %v2910_v24 }
0x15ce   :  { %v2911_v41 = vsub.f32 %v2886_v26, %v2906_v13  ;;  %v2924_v39 = vsel %vm71_vm1, %v2915_v14, 0.0 }
0x15cf   :  { %2925 = vadd.xlane.f32.xlu0 %v2924_v39 }
0x15d0   :  { %v2916_v21 = vmul.f32 %v2911_v41, %v2911_v41 }
0x15d1   :  { %v2868_v57 = vpop.f32.mrf.mxu0 }
0x15d2   :  { %v2878_v63 = vadd.f32 %v2868_v57, %v5185_v1  ;;  %v2927_v7 = vsel %vm71_vm1, %v2916_v21, 0.0  ;;  %v4167_v1 = vld [vmem:[%s5775_s6 + $0x10] sm:$0xff]  }
0x15d3   :  { %2928 = vadd.xlane.f32.xlu1 %v2927_v7  ;;  %v4073_v6 = vpop.f32.mrf.mxu0  ;;  %4078 = vmatpush3.bf16.msra.mxu1 %v4167_v1  ;;  %v3460_v7 = vld [vmem:[%s5772_s9 + $0x3] ss:$0 sm:$0xff] }
0x15d4   :  { %v2887_v20 = vadd.f32 %v3453_v44, %v2878_v63  ;;  %4091 = vmatprep.subr.bf16.mxu1 %v4405_v0 }
0x15d5   :  { %v2871_v61 = vpop.f32.mrf.mxu0 }
0x15d6   :  { %v2900_v18 = vsel %vm204_vm2, %v2887_v20, 0.0 }
0x15d7   :  { %2901 = vadd.xlane.f32.xlu0 %v2900_v18  ;;  %v4074_v30 = vpop.f32.mrf.mxu0 }
0x1650   :  { %v2920_v11 = vpop.xlane.xlu0 %2919 }
0x1651   :  { %v2933_v15 = vmul.f32 0.03125, %v2920_v11 }
0x1653   :  { %v2938_v27 = vadd.f32 1e-06, %v2933_v15 }
0x1654   :  { %v2923_v56 = vpop.xlane.xlu1 %2922 }
0x1655   :  { %4378 = vrsqrt.f32 %v2938_v27  ;;  %v2934_v29 = vmul.f32 0.03125, %v2923_v56 }
0x1657   :  { %v2939_v52 = vadd.f32 1e-06, %v2934_v29 }
0x1658   :  { %v2926_v28 = vpop.xlane.xlu0 %2925 }
0x1659   :  { %4380 = vrsqrt.f32 %v2939_v52  ;;  %v2935_v16 = vmul.f32 0.03125, %v2926_v28 }
0x165b   :  { %v2940_v25 = vadd.f32 1e-06, %v2935_v16 }
0x165c   :  { %v2929_v36 = vpop.xlane.xlu1 %2928 }
0x165d   :  { %4382 = vrsqrt.f32 %v2940_v25  ;;  %v2936_v40 = vmul.f32 0.03125, %v2929_v36 }
0x165f   :  { %v2941_v5 = vadd.f32 1e-06, %v2936_v40 }
0x1660   :  { %v2902_v53 = vpop.xlane.xlu0 %2901 }
0x1661   :  { %4384 = vrsqrt.f32 %v2941_v5  ;;  %v2907_v44 = vmul.f32 0.03125, %v2902_v53 }
0x1662   :  { %v4379_v22 = vpop.eup %4378 }
0x1663   :  { %v2948_v54 = vmul.f32 %v4379_v22, %v2908_v42  ;;  %v2912_v32 = vsub.f32 %v2887_v20, %v2907_v44 }
0x1665   :  { %v2917_v55 = vmul.f32 %v2912_v32, %v2912_v32  ;;  %v2957_v60 = vmul.f32 %v3454_v10, %v2948_v54 }
0x1666   :  { %v4381_v31 = vpop.eup %4380 }
0x1667   :  { %v2949_v17 = vmul.f32 %v4381_v31, %v2909_v23  ;;  %v2930_v34 = vsel %vm204_vm2, %v2917_v55, 0.0  ;;  %v2966_v49 = vadd.f32 %v3455_v47, %v2957_v60  ;;  %v4169_v23 = vld [vmem:[%s5776_s7 + $0x70] sm:$0xff]  }
0x1668   :  { %2931 = vadd.xlane.f32.xlu1 %v2930_v34 }
0x1669   :  { %v2958_v58 = vmul.f32 %v3454_v10, %v2949_v17 }
0x166a   :  { %v4383_v3 = vpop.eup %4382 }
0x166b   :  { %v2967_v8 = vadd.f32 %v3455_v47, %v2958_v58  ;;  %v2950_v2 = vmul.f32 %v4383_v3, %v2910_v24  ;;  %v4174_v24 = vld [vmem:[%s5776_s7 + $0x48] sm:$0xff]  }
0x166d   :  { %v2976_v9 = vpack.c.bf16 %v2967_v8, %v2966_v49  ;;  %v2959_v48 = vmul.f32 %v3454_v10, %v2950_v2 }
0x166e   :  { %v4385_v26 = vpop.eup %4384 }
0x166f   :  { %v2951_v51 = vmul.f32 %v4385_v26, %v2911_v41  ;;  %4080 = vmatmul.mubr.msk.bf16.vlgmr.msra.gmra.mxu1 %vm71_vm1, %v2976_v9  ;;  %v2968_v42 = vadd.f32 %v3455_v47, %v2959_v48 }
0x1670   :  { %4083 = vmatprep.mubr.msk.bf16.mxu1 %vm4406_vm0, %v4405_v0  ;;  %4092 = vmatpush3.bf16.msra.mxu1 %v4168_v43 }
0x1671   :  { %v2960_v33 = vmul.f32 %v3454_v10, %v2951_v51  ;;  %4093 = vmatprep.subr.bf16.mxu1 %v4405_v0 }
0x1673   :  { %v2969_v4 = vadd.f32 %v3455_v47, %v2960_v33 }
0x1674   :  { %4094 = vmatpush3.bf16.msra.mxu1 %v4169_v23 }
0x1675   :  { %v2977_v46 = vpack.c.bf16 %v2969_v4, %v2968_v42  ;;  %4095 = vmatprep.subr.bf16.mxu1 %v4405_v0 }
0x1677   :  { %4084 = vmatmul.mubr.msk.bf16.gmra.mxu1 %vm71_vm1, %v2977_v46 }
0x1678   :  { %4087 = vmatprep.mubr.msk.bf16.mxu1 %vm4406_vm0, %v4405_v0  ;;  %4096 = vmatpush3.bf16.msra.mxu1 %v4170_v50 }
0x1679   :  { %4097 = vmatprep.subr.bf16.mxu1 %v4405_v0 }
0x167c   :  { %4098 = vmatpush3.bf16.msra.mxu1 %v4171_v35 }
0x167d   :  { %4099 = vmatprep.subr.bf16.mxu1 %v4405_v0 }
0x1680   :  { %4100 = vmatpush3.bf16.msra.mxu1 %v4172_v45 }
0x1681   :  { %4101 = vmatprep.subr.bf16.mxu1 %v4405_v0 }
0x1684   :  { %4102 = vmatpush3.bf16.msra.mxu1 %v4173_v62 }
0x1685   :  { %4103 = vmatprep.subr.bf16.mxu1 %v4405_v0 }
0x1688   :  { %4104 = vmatpush3.bf16.msra.mxu1 %v4174_v24 }
0x1689   :  { %4105 = vmatprep.subr.bf16.mxu1 %v4405_v0 }
0x168c   :  { %4106 = vmatpush3.bf16.msra.mxu1 %v4175_v38 }
0x16f1   :  { %v2932_v59 = vpop.xlane.xlu1 %2931 }
0x16f2   :  { %v2937_v13 = vmul.f32 0.03125, %v2932_v59 }
0x16f4   :  { %v2942_v14 = vadd.f32 1e-06, %v2937_v13 }
0x16f6   :  { %4386 = vrsqrt.f32 %v2942_v14 }
0x1703   :  { %v4387_v41 = vpop.eup %4386 }
0x1704   :  { %v2952_v39 = vmul.f32 %v4387_v41, %v2912_v32 }
0x1706   :  { %v2961_v21 = vmul.f32 %v3454_v10, %v2952_v39 }
0x1708   :  { %v2970_v57 = vadd.f32 %v3455_v47, %v2961_v21 }
0x170a   :  { %v2978_v63 = vpack.c.bf16 %v2970_v57, %v2970_v57 }
0x170c   :  { %4088 = vmatmul.mubr.msk.bf16.gmra.mxu1 %vm71_vm1, %v2978_v63 }
0x170d   :  { %4107 = vmatprep.mubr.msk.bf16.mxu1 %vm4406_vm0, %v4405_v0 }
0x172f   :  { %v3038_v6 = vpop.f32.mrf.mxu1 }
0x1730   :  { %v3039_v20 = vadd.f32 %v3460_v7, %v3038_v6 }
0x1731   :  { %v4081_v61 = vpop.f32.mrf.mxu1 }
0x1732   :  { %v3065_v18 = vmul.f32 0.044715, %v3039_v20  ;;  %v3060_v2 = vmul.f32 0.5, %v3039_v20 }
0x1733   :  { %v3041_v30 = vpop.f32.mrf.mxu1 }
0x1734   :  { %v3070_v37 = vmul.f32 %v3065_v18, %v3039_v20  ;;  %v3042_v1 = vadd.f32 %v3460_v7, %v3041_v30 }
0x1735   :  { %v4082_v11 = vpop.f32.mrf.mxu1 }
0x1736   :  { %v3075_v15 = vmul.f32 %v3070_v37, %v3039_v20  ;;  %v3066_v27 = vmul.f32 0.044715, %v3042_v1  ;;  %v3061_v9 = vmul.f32 0.5, %v3042_v1 }
0x1737   :  { %v3046_v56 = vpop.f32.mrf.mxu1 }
0x1738   :  { %v3080_v29 = vadd.f32 %v3075_v15, %v3039_v20  ;;  %v3071_v52 = vmul.f32 %v3066_v27, %v3042_v1  ;;  %v3047_v28 = vadd.f32 %v3460_v7, %v3046_v56  ;;  %v3490_v27 = vld [vmem:[%s5771_s8 + $0xd] ss:$0 sm:$0xff] }
0x1739   :  { %v4085_v16 = vpop.f32.mrf.mxu1 }
0x173a   :  { %v3085_v25 = vmul.f32 0.7978846, %v3080_v29  ;;  %v3076_v36 = vmul.f32 %v3071_v52, %v3042_v1  ;;  %v3067_v40 = vmul.f32 0.044715, %v3047_v28  ;;  %v3062_v43 = vmul.f32 0.5, %v3047_v28 }
0x173b   :  { %v3049_v5 = vpop.f32.mrf.mxu1 }
0x173c   :  { %4388 = vtanh.f32 %v3085_v25  ;;  %v3081_v53 = vadd.f32 %v3076_v36, %v3042_v1  ;;  %v3072_v44 = vmul.f32 %v3067_v40, %v3047_v28  ;;  %v3050_v22 = vadd.f32 %v3460_v7, %v3049_v5 }
0x173d   :  { %v4086_v54 = vpop.f32.mrf.mxu1 }
0x173e   :  { %v3086_v32 = vmul.f32 0.7978846, %v3081_v53  ;;  %v3077_v10 = vmul.f32 %v3072_v44, %v3047_v28  ;;  %v3068_v55 = vmul.f32 0.044715, %v3050_v22  ;;  %v3063_v23 = vmul.f32 0.5, %v3050_v22 }
0x1740   :  { %4390 = vtanh.f32 %v3086_v32  ;;  %v3082_v31 = vadd.f32 %v3077_v10, %v3047_v28  ;;  %v3073_v60 = vmul.f32 %v3068_v55, %v3050_v22 }
0x1742   :  { %v3087_v17 = vmul.f32 0.7978846, %v3082_v31  ;;  %v3078_v34 = vmul.f32 %v3073_v60, %v3050_v22  ;;  %v4176_v60 = vld [vmem:[%s5777_s10 + $0x8] sm:$0xff]  }
0x1743   :  { %4120 = vmatpush3.bf16.msra.mxu0 %v4176_v60 }
0x1744   :  { %4392 = vtanh.f32 %v3087_v17  ;;  %v3083_v47 = vadd.f32 %v3078_v34, %v3050_v22  ;;  %4121 = vmatprep.subr.bf16.mxu0 %v4405_v0  ;;  %v4177_v17 = vld [vmem:[%s5777_s10] sm:$0xff]  }
0x1746   :  { %v3088_v58 = vmul.f32 0.7978846, %v3083_v47 }
0x1747   :  { %4122 = vmatpush3.bf16.msra.mxu0 %v4177_v17 }
0x1748   :  { %4394 = vtanh.f32 %v3088_v58 }
0x1749   :  { %v4389_v3 = vpop.eup %4388 }
0x174a   :  { %v3095_v49 = vadd.f32 1.0, %v4389_v3 }
0x174c   :  { %v3100_v51 = vmul.f32 %v3095_v49, %v3060_v2  ;;  %v3491_v2 = vld [vmem:[%s5778_s11] ss:$0 sm:$0xff] }
0x174d   :  { %v4391_v8 = vpop.eup %4390 }
0x174e   :  { %v3096_v26 = vadd.f32 1.0, %v4391_v8 }
0x1750   :  { %v3101_v48 = vmul.f32 %v3096_v26, %v3061_v9 }
0x1751   :  { %v4393_v33 = vpop.eup %4392 }
0x1752   :  { %v3122_v42 = vpack.c.bf16 %v3101_v48, %v3100_v51  ;;  %v3097_v4 = vadd.f32 1.0, %v4393_v33 }
0x1754   :  { %4108 = vmatmul.mubr.bf16.vlgmr.msra.gmra.mxu1 %v3122_v42  ;;  %v3102_v35 = vmul.f32 %v3097_v4, %v3062_v43 }
0x1755   :  { %v4395_v46 = vpop.eup %4394  ;;  %4111 = vmatprep.mubr.msk.bf16.mxu1 %vm4406_vm0, %v4405_v0 }
0x1756   :  { %v3098_v50 = vadd.f32 1.0, %v4395_v46 }
0x1758   :  { %v3103_v45 = vmul.f32 %v3098_v50, %v3063_v23 }
0x175a   :  { %v3123_v62 = vpack.c.bf16 %v3103_v45, %v3102_v35 }
0x175c   :  { %4112 = vmatmul.mubr.bf16.gmra.mxu1 %v3123_v62 }
0x175d   :  { %4115 = vmatprep.mubr.msk.bf16.mxu1 %vm4406_vm0, %v4405_v0  ;;  %vm3235_vm0 = vcmask 1041408  }
0x17cc   :  { %v3054_v24 = vpop.f32.mrf.mxu1 }
0x17cd   :  { %v3055_v38 = vadd.f32 %v3460_v7, %v3054_v24 }
0x17ce   :  { %v4089_v59 = vpop.f32.mrf.mxu1 }
0x17cf   :  { %v3069_v13 = vmul.f32 0.044715, %v3055_v38  ;;  %v3064_v20 = vmul.f32 0.5, %v3055_v38 }
0x17d0   :  { %v3057_v14 = vpop.f32.mrf.mxu1 }
0x17d1   :  { %v3074_v41 = vmul.f32 %v3069_v13, %v3055_v38 }
0x17d2   :  { %v4090_v39 = vpop.f32.mrf.mxu1 }
0x17d3   :  { %v3079_v21 = vmul.f32 %v3074_v41, %v3055_v38 }
0x17d5   :  { %v3084_v57 = vadd.f32 %v3079_v21, %v3055_v38 }
0x17d7   :  { %v3089_v63 = vmul.f32 0.7978846, %v3084_v57 }
0x17d9   :  { %4396 = vtanh.f32 %v3089_v63 }
0x17e6   :  { %v4397_v6 = vpop.eup %4396 }
0x17e7   :  { %v3099_v61 = vadd.f32 1.0, %v4397_v6 }
0x17e9   :  { %v3104_v18 = vmul.f32 %v3099_v61, %v3064_v20 }
0x17eb   :  { %v3124_v30 = vpack.c.bf16 %v3104_v18, %v3104_v18 }
0x17ed   :  { %4116 = vmatmul.mubr.bf16.gmra.mxu1 %v3124_v30 }
0x1814   :  { %v3207_v37 = vpop.f32.mrf.mxu1 }
0x1815   :  { %v3226_v7 = vadd.f32 %v3207_v37, %v5662_v19 }
0x1816   :  { %v4109_v1 = vpop.f32.mrf.mxu1 }
0x1817   :  { %v3232_v28 = vadd.f32 %v3490_v27, %v3226_v7 }
0x1818   :  { %v3210_v11 = vpop.f32.mrf.mxu1 }
0x181a   :  { %v4110_v15 = vpop.f32.mrf.mxu1 }
0x181c   :  { %v3214_v56 = vpop.f32.mrf.mxu1 }
0x181d   :  { %v3227_v29 = vadd.f32 %v3214_v56, %v5669_v12 }
0x181e   :  { %v4113_v52 = vpop.f32.mrf.mxu1 }
0x181f   :  { %v3233_v16 = vadd.f32 %v3490_v27, %v3227_v29 }
0x1820   :  { %v3217_v25 = vpop.f32.mrf.mxu1 }
0x1821   :  { %v3234_v36 = vsel %vm691_vm13, %v3232_v28, %v3233_v16 }
0x1822   :  { %v4114_v40 = vpop.f32.mrf.mxu1  ;;  %v3236_v5 = vsel %vm3235_vm0, %v3234_v36, 0.0 }
0x1823   :  { %v3237_v53 = vsel %vm71_vm1, %v3236_v5, 0.0 }
0x1824   :  { %3238 = vadd.xlane.f32.xlu0 %v3237_v53 }
0x18ad   :  { %v3239_v19 = vpop.xlane.xlu0 %3238  ;;  %v3221_v44 = vpop.f32.mrf.mxu1 }
0x18ae   :  { %v3240_v22 = vmul.f32 0.03125, %v3239_v19 }
0x18af   :  { %v4117_v54 = vpop.f32.mrf.mxu1 }
0x18b0   :  { %v3241_v32 = vsub.f32 %v3236_v5, %v3240_v22 }
0x18b1   :  { %v3223_v10 = vpop.f32.mrf.mxu1 }
0x18b2   :  { %v3242_v55 = vmul.f32 %v3241_v32, %v3241_v32 }
0x18b3   :  { %v4118_v12 = vpop.f32.mrf.mxu1 }
0x18b4   :  { %v3243_v31 = vsel %vm71_vm1, %v3242_v55, 0.0 }
0x18b5   :  { %3244 = vadd.xlane.f32.xlu1 %v3243_v31 }
0x193e   :  { %v3245_v34 = vpop.xlane.xlu1 %3244 }
0x193f   :  { %v3246_v47 = vmul.f32 0.03125, %v3245_v34 }
0x1941   :  { %v3247_v58 = vadd.f32 1e-06, %v3246_v47 }
0x1943   :  { %4398 = vrsqrt.f32 %v3247_v58 }
0x1950   :  { %v4399_v3 = vpop.eup %4398 }
0x1951   :  { %v3249_v49 = vmul.f32 %v4399_v3, %v3241_v32 }
0x1953   :  { %v3254_v8 = vpack.c.bf16 %v3249_v49, %v3249_v49 }
0x1955   :  { %4124 = vmatmul.mubr.msk.bf16.vlgmr.msra.gmra.mxu0 %vm71_vm1, %v3254_v8 }
0x1a15   :  { %v3311_v9 = vpop.f32.mrf.mxu0 }
0x1a16   :  { %v3312_v0 = vadd.f32 %v3491_v2, %v3311_v9 }
0x1a17   :  { %v4125_v26 = vpop.f32.mrf.mxu0 }
0x1a18   :  { %3317 = vst [vmem:[%s5779_s12] sm:$0xff] %v3312_v0 }
0x1a19   :  { %v3314_v51 = vpop.f32.mrf.mxu0 }
0x1a1b   :  { %v4126_v48 = vpop.f32.mrf.mxu0 }

</bundles_post_ra>
